<compile_context>
chip_gen: v7x
topology: tpu7x:2x2x1
jax: 0.10.0
libtpu: 0.0.40
codegen_flags: <defaults>
</compile_context>

<pallas_src>
import jax
import jax.numpy as jnp
from jax.experimental import pallas as pl
from jax.experimental.pallas import tpu as pltpu

EPS = 1e-5
IN_DIM = 729
IN_PAD = 768   # 729 padded up to a multiple of 128
H1 = 512
H2 = 128
OUT = 5


def mlp_kernel(
    x_ref,
    w1_ref, b1_ref,
    w2_ref, b2_ref,
    w3_ref, b3_ref,
    o_ref,
):
    def layernorm(h, n):
        # Single-pass f32 statistics; gamma/beta are folded into the following Linear.
        s = jnp.sum(h, axis=-1, keepdims=True)
        s2 = jnp.sum(h * h, axis=-1, keepdims=True)
        mu = s * (1.0 / n)
        var = s2 * (1.0 / n) - mu * mu
        var = jnp.maximum(var, 0.0)  # guard tiny negative from E[x^2]-mu^2 cancellation
        return (h - mu) * jax.lax.rsqrt(var + EPS)

    # x arrives as bf16 (halved HBM bytes), zero-padded 729 -> 768 columns.
    x = x_ref[...].astype(jnp.float32)

    # Block 1: LN over the original 729 features (zero-padded columns contribute
    # nothing to the sums; their normalized values hit zero rows of w1) -> Linear -> ReLU.
    h = layernorm(x, IN_DIM).astype(jnp.bfloat16)
    h = jnp.dot(h, w1_ref[...], preferred_element_type=jnp.float32) + b1_ref[...]
    h = jnp.maximum(h, 0.0)

    # Block 2: LN(512) -> Linear(512, 128) -> ReLU
    h = layernorm(h, H1).astype(jnp.bfloat16)
    h = jnp.dot(h, w2_ref[...], preferred_element_type=jnp.float32) + b2_ref[...]
    h = jnp.maximum(h, 0.0)

    # Block 3: LN(128) -> Linear(128, 5)
    h = layernorm(h, H2).astype(jnp.bfloat16)
    h = jnp.dot(h, w3_ref[...], preferred_element_type=jnp.float32) + b3_ref[...]

    o_ref[...] = h.astype(o_ref.dtype)


def _choose_tb(B):
    # Big tiles amortize per-grid-step overhead; keep >=4 grid steps when possible
    # so v7x's two TensorCores each get several pipelined steps.
    for tb in (1024, 512, 256):
        if B >= 4 * tb:
            return tb
    return 128


def mlp_forward(x, folded_params):
    w1, b1, w2, b2, w3, b3 = folded_params
    B = x.shape[0]
    TB = _choose_tb(B)
    B_pad = ((B + TB - 1) // TB) * TB

    # bf16 input stream; zero-pad batch rows and feature columns (729 -> 768).
    x = jnp.pad(x.astype(jnp.bfloat16), ((0, B_pad - B), (0, IN_PAD - IN_DIM)))

    const = lambda i: (0, 0)  # weights/biases stay VMEM-resident across batch tiles

    out = pl.pallas_call(
        mlp_kernel,
        out_shape=jax.ShapeDtypeStruct((B_pad, OUT), jnp.float32),
        grid_spec=pltpu.PrefetchScalarGridSpec(
            num_scalar_prefetch=0,
            grid=(B_pad // TB,),
            in_specs=[
                pl.BlockSpec((TB, IN_PAD), lambda i: (i, 0)),
                pl.BlockSpec((IN_PAD, H1), const),
                pl.BlockSpec((1, H1), const),
                pl.BlockSpec((H1, H2), const),
                pl.BlockSpec((1, H2), const),
                pl.BlockSpec((H2, OUT), const),
                pl.BlockSpec((1, OUT), const),
            ],
            out_specs=pl.BlockSpec((TB, OUT), lambda i: (i, 0)),
        ),
        compiler_params=pltpu.CompilerParams(
            dimension_semantics=("parallel",),     # shard batch tiles over v7x's 2 TCs
            vmem_limit_bytes=48 * 1024 * 1024,     # headroom; fits v7x's 64 MiB VMEM
        ),
    )(x, w1, b1, w2, b2, w3, b3)
    return out[:B]


def init_params(key):
    # Deterministic init mimicking PyTorch defaults:
    # LayerNorm: weight=1, bias=0. Linear: U(-1/sqrt(fan_in), 1/sqrt(fan_in)).
    dims = [(IN_DIM, H1), (H1, H2), (H2, OUT)]
    params = []
    keys = jax.random.split(key, len(dims) * 2)
    for i, (fan_in, fan_out) in enumerate(dims):
        g = jnp.ones((1, fan_in), jnp.float32)
        be = jnp.zeros((1, fan_in), jnp.float32)
        bound = 1.0 / (fan_in ** 0.5)
        w = jax.random.uniform(
            keys[2 * i], (fan_in, fan_out), jnp.float32, -bound, bound
        )
        b = jax.random.uniform(
            keys[2 * i + 1], (1, fan_out), jnp.float32, -bound, bound
        )
        params += [g, be, w, b]
    return tuple(params)


def fold_params(params):
    """Fold each LayerNorm's gamma/beta into the following Linear; pad w1's K to 768;
    weights -> bf16, biases stay f32."""
    (g1, be1, w1, b1, g2, be2, w2, b2, g3, be3, w3, b3) = params

    def fold(g, be, w, b):
        w_f = g.reshape(-1, 1) * w            # diag(g) @ W
        b_f = (be @ w + b).astype(jnp.float32)  # be @ W + b
        return w_f, b_f

    w1f, b1f = fold(g1, be1, w1, b1)
    w1f = jnp.pad(w1f, ((0, IN_PAD - IN_DIM), (0, 0)))  # zero K-rows match padded x cols
    w2f, b2f = fold(g2, be2, w2, b2)
    w3f, b3f = fold(g3, be3, w3, b3)
    return (
        w1f.astype(jnp.bfloat16), b1f,
        w2f.astype(jnp.bfloat16), b2f,
        w3f.astype(jnp.bfloat16), b3f,
    )


def reference_forward(x, params):
    # Pure-JAX f32 reference with unfolded params (PyTorch eval-mode semantics).
    (g1, be1, w1, b1, g2, be2, w2, b2, g3, be3, w3, b3) = params

    def ln(h, g, b):
        mu = jnp.mean(h, axis=-1, keepdims=True)
        var = jnp.mean((h - mu) ** 2, axis=-1, keepdims=True)
        return (h - mu) / jnp.sqrt(var + EPS) * g + b

    h = ln(x, g1, be1)
    h = jnp.maximum(h @ w1 + b1, 0.0)
    h = ln(h, g2, be2)
    h = jnp.maximum(h @ w2 + b2, 0.0)
    h = ln(h, g3, be3)
    return h @ w3 + b3


if __name__ == "__main__":
    key = jax.random.PRNGKey(0)
    k_x, k_p = jax.random.split(key)

    B = 300  # not a multiple of the tile -> exercises batch padding + a multi-step grid
    x = jax.random.normal(k_x, (B, IN_DIM), jnp.float32)
    params = init_params(k_p)
    folded = fold_params(params)

    out = mlp_forward(x, folded)
    out = jax.block_until_ready(out)

    ref = reference_forward(x, params)
    assert out.shape == (B, OUT), out.shape
    # bf16 x / bf16 weights / bf16 matmul inputs -> looser tolerance than all-f32.
    assert jnp.allclose(out, ref, atol=5e-2, rtol=5e-2), (
        float(jnp.max(jnp.abs(out - ref)))
    )
    print("KERNEL_OK")
</pallas_src>

<mosaic_0001>
module attributes {stable_mosaic.version = 11 : i64} {
  func.func @mlp_kernel(%arg0: i32, %arg1: memref<128x768xbf16, #tpu.memory_space<vmem>>, %arg2: memref<768x512xbf16, #tpu.memory_space<vmem>>, %arg3: memref<1x512xf32, #tpu.memory_space<vmem>>, %arg4: memref<512x128xbf16, #tpu.memory_space<vmem>>, %arg5: memref<1x128xf32, #tpu.memory_space<vmem>>, %arg6: memref<128x5xbf16, #tpu.memory_space<vmem>>, %arg7: memref<1x5xf32, #tpu.memory_space<vmem>>, %arg8: memref<128x5xf32, #tpu.memory_space<vmem>>) attributes {dimension_semantics = [#tpu.dimension_semantics<parallel>], iteration_bounds = array<i64: 3>, scalar_prefetch = 0 : i64, scratch_operands = 0 : i64, tpu.core_type = #tpu.core_type<tc>, window_params = [{transform_indices = @transform_0, window_bounds = array<i64: 128, 768>}, {pipeline_mode = #tpu.pipeline_mode<synchronous>, transform_indices = @transform_1, window_bounds = array<i64: 768, 512>}, {pipeline_mode = #tpu.pipeline_mode<synchronous>, transform_indices = @transform_2, window_bounds = array<i64: 1, 512>}, {pipeline_mode = #tpu.pipeline_mode<synchronous>, transform_indices = @transform_3, window_bounds = array<i64: 512, 128>}, {pipeline_mode = #tpu.pipeline_mode<synchronous>, transform_indices = @transform_4, window_bounds = array<i64: 1, 128>}, {pipeline_mode = #tpu.pipeline_mode<synchronous>, transform_indices = @transform_5, window_bounds = array<i64: 128, 5>}, {pipeline_mode = #tpu.pipeline_mode<synchronous>, transform_indices = @transform_6, window_bounds = array<i64: 1, 5>}, {transform_indices = @transform_7, window_bounds = array<i64: 128, 5>}]} {
    %c0 = arith.constant 0 : index
    %c0_0 = arith.constant 0 : index
    %0 = vector.load %arg1[%c0, %c0_0] : memref<128x768xbf16, #tpu.memory_space<vmem>>, vector<128x768xbf16>
    %1 = arith.extf %0 : vector<128x768xbf16> to vector<128x768xf32>
    %cst = arith.constant dense<0.000000e+00> : vector<128xf32>
    %2 = vector.multi_reduction <add>, %1, %cst [1] : vector<128x768xf32> to vector<128xf32>
    %3 = vector.shape_cast %2 : vector<128xf32> to vector<128x1xf32>
    %4 = arith.mulf %1, %1 : vector<128x768xf32>
    %cst_1 = arith.constant dense<0.000000e+00> : vector<128xf32>
    %5 = vector.multi_reduction <add>, %4, %cst_1 [1] : vector<128x768xf32> to vector<128xf32>
    %6 = vector.shape_cast %5 : vector<128xf32> to vector<128x1xf32>
    %cst_2 = arith.constant 0.00137174211 : f32
    %7 = vector.broadcast %cst_2 : f32 to vector<128x1xf32>
    %8 = arith.mulf %3, %7 : vector<128x1xf32>
    %cst_3 = arith.constant 0.00137174211 : f32
    %9 = vector.broadcast %cst_3 : f32 to vector<128x1xf32>
    %10 = arith.mulf %6, %9 : vector<128x1xf32>
    %11 = arith.mulf %8, %8 : vector<128x1xf32>
    %12 = arith.subf %10, %11 : vector<128x1xf32>
    %cst_4 = arith.constant 0.000000e+00 : f32
    %13 = vector.broadcast %cst_4 : f32 to vector<128x1xf32>
    %14 = arith.maximumf %12, %13 : vector<128x1xf32>
    %15 = vector.broadcast %8 : vector<128x1xf32> to vector<128x768xf32>
    %16 = arith.subf %1, %15 : vector<128x768xf32>
    %cst_5 = arith.constant 9.99999974E-6 : f32
    %17 = vector.broadcast %cst_5 : f32 to vector<128x1xf32>
    %18 = arith.addf %14, %17 : vector<128x1xf32>
    %19 = math.rsqrt %18 : vector<128x1xf32>
    %20 = vector.broadcast %19 : vector<128x1xf32> to vector<128x768xf32>
    %21 = arith.mulf %16, %20 : vector<128x768xf32>
    %22 = arith.truncf %21 : vector<128x768xf32> to vector<128x768xbf16>
    %c0_6 = arith.constant 0 : index
    %c0_7 = arith.constant 0 : index
    %23 = vector.load %arg2[%c0_6, %c0_7] : memref<768x512xbf16, #tpu.memory_space<vmem>>, vector<768x512xbf16>
    %cst_8 = arith.constant dense<0.000000e+00> : vector<128x512xf32>
    %24 = tpu.matmul %22, %23, %cst_8 {dimension_numbers = #tpu.dot_dimension_numbers<[1], [0], [0], [1], [0, 0, 1, 1], [], []>} : vector<128x768xbf16>, vector<768x512xbf16>, vector<128x512xf32> -> vector<128x512xf32>
    %c0_9 = arith.constant 0 : index
    %c0_10 = arith.constant 0 : index
    %25 = vector.load %arg3[%c0_9, %c0_10] : memref<1x512xf32, #tpu.memory_space<vmem>>, vector<1x512xf32>
    %26 = vector.broadcast %25 : vector<1x512xf32> to vector<128x512xf32>
    %27 = arith.addf %24, %26 : vector<128x512xf32>
    %cst_11 = arith.constant 0.000000e+00 : f32
    %28 = vector.broadcast %cst_11 : f32 to vector<128x512xf32>
    %29 = arith.maximumf %27, %28 : vector<128x512xf32>
    %cst_12 = arith.constant dense<0.000000e+00> : vector<128xf32>
    %30 = vector.multi_reduction <add>, %29, %cst_12 [1] : vector<128x512xf32> to vector<128xf32>
    %31 = vector.shape_cast %30 : vector<128xf32> to vector<128x1xf32>
    %32 = arith.mulf %29, %29 : vector<128x512xf32>
    %cst_13 = arith.constant dense<0.000000e+00> : vector<128xf32>
    %33 = vector.multi_reduction <add>, %32, %cst_13 [1] : vector<128x512xf32> to vector<128xf32>
    %34 = vector.shape_cast %33 : vector<128xf32> to vector<128x1xf32>
    %cst_14 = arith.constant 0.001953125 : f32
    %35 = vector.broadcast %cst_14 : f32 to vector<128x1xf32>
    %36 = arith.mulf %31, %35 : vector<128x1xf32>
    %cst_15 = arith.constant 0.001953125 : f32
    %37 = vector.broadcast %cst_15 : f32 to vector<128x1xf32>
    %38 = arith.mulf %34, %37 : vector<128x1xf32>
    %39 = arith.mulf %36, %36 : vector<128x1xf32>
    %40 = arith.subf %38, %39 : vector<128x1xf32>
    %cst_16 = arith.constant 0.000000e+00 : f32
    %41 = vector.broadcast %cst_16 : f32 to vector<128x1xf32>
    %42 = arith.maximumf %40, %41 : vector<128x1xf32>
    %43 = vector.broadcast %36 : vector<128x1xf32> to vector<128x512xf32>
    %44 = arith.subf %29, %43 : vector<128x512xf32>
    %cst_17 = arith.constant 9.99999974E-6 : f32
    %45 = vector.broadcast %cst_17 : f32 to vector<128x1xf32>
    %46 = arith.addf %42, %45 : vector<128x1xf32>
    %47 = math.rsqrt %46 : vector<128x1xf32>
    %48 = vector.broadcast %47 : vector<128x1xf32> to vector<128x512xf32>
    %49 = arith.mulf %44, %48 : vector<128x512xf32>
    %50 = arith.truncf %49 : vector<128x512xf32> to vector<128x512xbf16>
    %c0_18 = arith.constant 0 : index
    %c0_19 = arith.constant 0 : index
    %51 = vector.load %arg4[%c0_18, %c0_19] : memref<512x128xbf16, #tpu.memory_space<vmem>>, vector<512x128xbf16>
    %cst_20 = arith.constant dense<0.000000e+00> : vector<128x128xf32>
    %52 = tpu.matmul %50, %51, %cst_20 {dimension_numbers = #tpu.dot_dimension_numbers<[1], [0], [0], [1], [0, 0, 1, 1], [], []>} : vector<128x512xbf16>, vector<512x128xbf16>, vector<128x128xf32> -> vector<128x128xf32>
    %c0_21 = arith.constant 0 : index
    %c0_22 = arith.constant 0 : index
    %53 = vector.load %arg5[%c0_21, %c0_22] : memref<1x128xf32, #tpu.memory_space<vmem>>, vector<1x128xf32>
    %54 = vector.broadcast %53 : vector<1x128xf32> to vector<128x128xf32>
    %55 = arith.addf %52, %54 : vector<128x128xf32>
    %cst_23 = arith.constant 0.000000e+00 : f32
    %56 = vector.broadcast %cst_23 : f32 to vector<128x128xf32>
    %57 = arith.maximumf %55, %56 : vector<128x128xf32>
    %cst_24 = arith.constant dense<0.000000e+00> : vector<128xf32>
    %58 = vector.multi_reduction <add>, %57, %cst_24 [1] : vector<128x128xf32> to vector<128xf32>
    %59 = vector.shape_cast %58 : vector<128xf32> to vector<128x1xf32>
    %60 = arith.mulf %57, %57 : vector<128x128xf32>
    %cst_25 = arith.constant dense<0.000000e+00> : vector<128xf32>
    %61 = vector.multi_reduction <add>, %60, %cst_25 [1] : vector<128x128xf32> to vector<128xf32>
    %62 = vector.shape_cast %61 : vector<128xf32> to vector<128x1xf32>
    %cst_26 = arith.constant 7.812500e-03 : f32
    %63 = vector.broadcast %cst_26 : f32 to vector<128x1xf32>
    %64 = arith.mulf %59, %63 : vector<128x1xf32>
    %cst_27 = arith.constant 7.812500e-03 : f32
    %65 = vector.broadcast %cst_27 : f32 to vector<128x1xf32>
    %66 = arith.mulf %62, %65 : vector<128x1xf32>
    %67 = arith.mulf %64, %64 : vector<128x1xf32>
    %68 = arith.subf %66, %67 : vector<128x1xf32>
    %cst_28 = arith.constant 0.000000e+00 : f32
    %69 = vector.broadcast %cst_28 : f32 to vector<128x1xf32>
    %70 = arith.maximumf %68, %69 : vector<128x1xf32>
    %71 = vector.broadcast %64 : vector<128x1xf32> to vector<128x128xf32>
    %72 = arith.subf %57, %71 : vector<128x128xf32>
    %cst_29 = arith.constant 9.99999974E-6 : f32
    %73 = vector.broadcast %cst_29 : f32 to vector<128x1xf32>
    %74 = arith.addf %70, %73 : vector<128x1xf32>
    %75 = math.rsqrt %74 : vector<128x1xf32>
    %76 = vector.broadcast %75 : vector<128x1xf32> to vector<128x128xf32>
    %77 = arith.mulf %72, %76 : vector<128x128xf32>
    %78 = arith.truncf %77 : vector<128x128xf32> to vector<128x128xbf16>
    %c0_30 = arith.constant 0 : index
    %c0_31 = arith.constant 0 : index
    %79 = vector.load %arg6[%c0_30, %c0_31] : memref<128x5xbf16, #tpu.memory_space<vmem>>, vector<128x5xbf16>
    %cst_32 = arith.constant dense<0.000000e+00> : vector<128x5xf32>
    %80 = tpu.matmul %78, %79, %cst_32 {dimension_numbers = #tpu.dot_dimension_numbers<[1], [0], [0], [1], [0, 0, 1, 1], [], []>} : vector<128x128xbf16>, vector<128x5xbf16>, vector<128x5xf32> -> vector<128x5xf32>
    %c0_33 = arith.constant 0 : index
    %c0_34 = arith.constant 0 : index
    %81 = vector.load %arg7[%c0_33, %c0_34] : memref<1x5xf32, #tpu.memory_space<vmem>>, vector<1x5xf32>
    %82 = vector.broadcast %81 : vector<1x5xf32> to vector<128x5xf32>
    %83 = arith.addf %80, %82 : vector<128x5xf32>
    %c0_35 = arith.constant 0 : index
    %c0_36 = arith.constant 0 : index
    %84 = vector.load %arg8[%c0_35, %c0_36] : memref<128x5xf32, #tpu.memory_space<vmem>>, vector<128x5xf32>
    tpu.vector_store %arg8[%c0_35, %c0_36], %83 {strides = array<i32>} : memref<128x5xf32, #tpu.memory_space<vmem>>, vector<128x5xf32>,
    return
  }
  func.func @transform_0(%arg0: i32) -> (i32, i32) {
    %c0_i32 = arith.constant 0 : i32
    %c0_i32_0 = arith.constant 0 : i32
    return %arg0, %c0_i32 : i32, i32
  }
  func.func @transform_1(%arg0: i32) -> (i32, i32) {
    %c0_i32 = arith.constant 0 : i32
    %c0_i32_0 = arith.constant 0 : i32
    %c0_i32_1 = arith.constant 0 : i32
    return %c0_i32, %c0_i32_0 : i32, i32
  }
  func.func @transform_2(%arg0: i32) -> (i32, i32) {
    %c0_i32 = arith.constant 0 : i32
    %c0_i32_0 = arith.constant 0 : i32
    %c0_i32_1 = arith.constant 0 : i32
    return %c0_i32, %c0_i32_0 : i32, i32
  }
  func.func @transform_3(%arg0: i32) -> (i32, i32) {
    %c0_i32 = arith.constant 0 : i32
    %c0_i32_0 = arith.constant 0 : i32
    %c0_i32_1 = arith.constant 0 : i32
    return %c0_i32, %c0_i32_0 : i32, i32
  }
  func.func @transform_4(%arg0: i32) -> (i32, i32) {
    %c0_i32 = arith.constant 0 : i32
    %c0_i32_0 = arith.constant 0 : i32
    %c0_i32_1 = arith.constant 0 : i32
    return %c0_i32, %c0_i32_0 : i32, i32
  }
  func.func @transform_5(%arg0: i32) -> (i32, i32) {
    %c0_i32 = arith.constant 0 : i32
    %c0_i32_0 = arith.constant 0 : i32
    %c0_i32_1 = arith.constant 0 : i32
    return %c0_i32, %c0_i32_0 : i32, i32
  }
  func.func @transform_6(%arg0: i32) -> (i32, i32) {
    %c0_i32 = arith.constant 0 : i32
    %c0_i32_0 = arith.constant 0 : i32
    %c0_i32_1 = arith.constant 0 : i32
    return %c0_i32, %c0_i32_0 : i32, i32
  }
  func.func @transform_7(%arg0: i32) -> (i32, i32) {
    %c0_i32 = arith.constant 0 : i32
    %c0_i32_0 = arith.constant 0 : i32
    return %arg0, %c0_i32 : i32, i32
  }
}

</mosaic_0001>

<bundles_post_ra>
// kernel: tpu_custom_call.1
= control target key start
LH: loop header
LB: loop body
LE: loop exit
PB: predicated region body
PF: predicated region fallthrough
CT: control target
= control target key end

     0   :  { %12 = vsyncpa [#allocation3], 0  ;;  %s7939_s0 = inlined_call_operand.hbm [shape: bf16[384,768], index: 0, kind: input, shape index: {}]   ;;  %s7940_s1 = inlined_call_operand.hbm [shape: bf16[768,512], index: 1, kind: input, shape index: {}]   ;;  %s7941_s2 = inlined_call_operand.vmem [shape: f32[1,512], index: 2, kind: input, shape index: {}]   ;;  %s7942_s3 = inlined_call_operand.hbm [shape: bf16[512,128], index: 3, kind: input, shape index: {}]   ;;  %s7943_s4 = inlined_call_operand.vmem [shape: f32[1,128], index: 4, kind: input, shape index: {}]   ;;  %s7944_s5 = inlined_call_operand.vmem [shape: bf16[128,5], index: 5, kind: input, shape index: {}]   ;;  %s7945_s6 = inlined_call_operand.vmem [shape: f32[1,5], index: 6, kind: input, shape index: {}]   ;;  %s7946_s7 = inlined_call_operand.vmem [shape: f32[384,5], index: 7, kind: output, shape index: {}]  }
   0x1   :  { %14 = vsyncpa [#allocation3 + $0x1], 0 }
   0x2   :  { %15 = vsyncpa [#allocation5], 0  ;;  %s5838_s24 = smov 0   ;;  %s5840_s25 = smov 0  }
   0x3   :  { %s5842_s26 = smov 0   ;;  %s5844_s27 = smov 0  }
   0x4 LB: > { %s4536_s28 = sadd.s32 4294967295, %s5787_s27   ;;  %p41_p0 = scmp.ne.s32.totalorder %s5779_s25, %s5775_s24  ;;  %s5787_s27 = sphi %s5844_s27, %s8310_s27   ;;  %s5783_s26 = sphi %s5842_s26, %s8313_s26   ;;  %s5779_s25 = sphi %s5840_s25, %s8312_s25   ;;  %s5775_s24 = sphi %s5838_s24, %s8311_s24  }
   0x5   : > { %p5860_p1 = scmp.eq.s32.totalorder %s4536_s28, 0  ;;  %p4538_p2 = scmp.ge.s32.totalorder %s5787_s27, 1 }
   0x6   : > { %p204_p3 = scmp.lt.s32.totalorder %s5787_s27, 4  ;;  %s5789_s9 = smov [#allocation4]  }
   0x7   : > { %s8076_s29 = scalar_select %p5860_p1, 1, 0 }
   0x8   : > { %p5868_p4 = por %p5860_p1, %p41_p0  ;;  %p5872_p5 = pnand %p4538_p2, %p204_p3 }
   0x9   : > { %s216_s10 = sshll.u32 %s5789_s9, 4  ;;  %s5790_s12 = smov [#allocation6]   ;;  %s217_s10 = int_to_ptr.vmem [resolvable:$true] %s216_s10 }
   0xa   : > { %s8077_s30 = scalar_select %p5868_p4, 1, 0 }
   0xb   : > { %s8078_s8 = scalar_select %p5872_p5, 1, 0 }
   0xc   : > { %p5183_p6 = pneg %p5872_p5  ;;  %s232_s13 = sshll.u32 %s5790_s12, 4  ;;  %s5884_s13 = int_to_ptr.vmem [resolvable:$true] %s232_s13 }
   0xd   : > { %s5663_s16 = scalar_lea.hbm %s7940_s1, 24576 }
   0xe   : > { %p5880_p7 = pnand %p5183_p6, %p5860_p1  ;;  %p5664_p8 = scmp.ne.s32.totalorder %s7940_s1, %s5663_s16 }
   0xf   : > { %p5670_p12 = scmp.lt.u32.totalorder %s5663_s16, %s7940_s1 }
  0x10   : > { %p5665_p9 = pneg %p5880_p7 }
  0x12   : > { %p5666_p10 = pnand %p5665_p9, %p5664_p8 }
  0x14   : > { %p5667_p11 = pneg %p5666_p10 }
  0x16   : > { %p5672_p13 = pnand %p5670_p12, %p5667_p11 }
  0x18   : > { %5675 = shalt.err (!%p5672_p13)
}
  0x19   : > { %s5676_s21 = scalar_lea.vmem %s217_s10, 24576  ;;  %p5684_p6 = scmp.lt.s32.totalorder %s217_s10, %s217_s10 }
  0x1a   : > { %p5677_p0 = scmp.ne.s32.totalorder %s217_s10, %s5676_s21  ;;  %p5685_p1 = scmp.lt.s32.totalorder %s5676_s21, %s5676_s21 }
  0x1c   : > { %p5679_p2 = pnand %p5677_p0, %p5665_p9  ;;  %p5686_p4 = por %p5685_p1, %p5684_p6 }
  0x1e   : > { %p5680_p3 = pneg %p5679_p2 }
  0x20   : > { %p5687_p5 = pnand %p5686_p4, %p5680_p3 }
  0x22   : > { %5690 = shalt.err (!%p5687_p5)
}
  0x23   : > { %s5791_s22 = smov 256   ;;  %s5792_s23 = smov 16  }
  0x24   : > { %5186 = dma.hbm_to_vmem [thread:$0]  (!%p5880_p7), %s7940_s1, 24576, %s217_s10, [#allocation5], %s5791_s22, %s5791_s22, %s5792_s23  }
  0x25   : > { %s5691_s15 = scalar_lea.hbm %s7942_s3, 4096 }
  0x26   : > { %p5692_p8 = scmp.ne.s32.totalorder %s7942_s3, %s5691_s15  ;;  %p5698_p5 = scmp.lt.u32.totalorder %s5691_s15, %s7942_s3 }
  0x28   : > { %p5694_p1 = pnand %p5692_p8, %p5665_p9 }
  0x2a   : > { %p5695_p4 = pneg %p5694_p1 }
  0x2c   : > { %p5700_p10 = pnand %p5698_p5, %p5695_p4 }
  0x2e   : > { %5703 = shalt.err (!%p5700_p10)
}
  0x2f   : > { %s5704_s10 = scalar_lea.vmem %s5884_s13, 4096  ;;  %p5712_p0 = scmp.lt.s32.totalorder %s5884_s13, %s5884_s13 }
  0x30   : > { %p5705_p11 = scmp.ne.s32.totalorder %s5884_s13, %s5704_s10  ;;  %p5713_p2 = scmp.lt.s32.totalorder %s5704_s10, %s5704_s10 }
  0x32   : > { %p5707_p12 = pnand %p5705_p11, %p5665_p9  ;;  %p5714_p3 = por %p5713_p2, %p5712_p0 }
  0x34   : > { %p5708_p13 = pneg %p5707_p12 }
  0x36   : > { %p5715_p6 = pnand %p5714_p3, %p5708_p13 }
  0x38   : > { %5718 = shalt.err (!%p5715_p6)
}
  0x39   : > { %s5793_s20 = smov 64   ;;  %s5794_s21 = smov 4  }
  0x3a   : > { %5189 = dma.hbm_to_vmem [thread:$0]  (!%p5880_p7), %s7942_s3, 4096, %s5884_s13, [#allocation5], %s5793_s20, %s5793_s20, %s5794_s21  }
  0x3b   : > { %s5934_s24 = sadd.s32 1, %s5787_s27   ;;  %s28_s12 = sadd.s32 1, %s5783_s26 }
  0x3c   : > { %s25_s9 = ssub.s32 %s5787_s27, %s5934_s24  ;;  %p35_p8 = scmp.ne.s32.totalorder %s5783_s26, %s5779_s25 }
  0x3d   : > { %p26_p9 = scmp.eq.s32.totalorder %s25_s9, 0  ;;  %p36_p1 = scmp.eq.s32.totalorder %s5787_s27, 0 }
  0x3e   : > { %p5196_p5 = scmp.lt.s32.totalorder %s5787_s27, 3  ;;  %s255_s15 = sand.u32 1, %s5783_s26  }
  0x3f   : > { %s5943_s14 = scalar_select %p26_p9, %s5783_s26, %s28_s12  }
  0x40   : > { %p37_p4 = por %p36_p1, %p35_p8  ;;  %s5171_s16 = smul.u32 6144, %s5787_s27 }
  0x41   : > { %s5170_s17 = smul.u32 384, %s255_s15  ;;  %s5959_s21 = scalar_lea.sflag [#allocation3], %s255_s15 }
  0x42   : > { %s5951_s19 = scalar_lea.hbm %s7939_s0, %s5171_s16  ;;  %p5953_p7 = pnand %p5196_p5, %p37_p4 }
  0x43   : > { %s259_s10 = scalar_lea.vmem [#allocation2], %s5170_s17  ;;  %s5719_s22 = scalar_lea.hbm %s5951_s19, 6144 }
  0x44   : > { %s267_s20 = sshll.u32 %s259_s10, 4  ;;  %p5720_p10 = scmp.ne.s32.totalorder %s5951_s19, %s5719_s22  ;;  %s5957_s20 = int_to_ptr.vmem [resolvable:$true] %s267_s20 }
  0x45   : > { %p5721_p11 = pneg %p5953_p7  ;;  %s5724_s12 = scalar_lea.hbm %s7939_s0, 18432 }
  0x46   : > { %p5725_p0 = scmp.lt.u32.totalorder %s5951_s19, %s7939_s0  ;;  %p5726_p2 = scmp.lt.u32.totalorder %s5724_s12, %s5719_s22 }
  0x47   : > { %p5722_p12 = pnand %p5721_p11, %p5720_p10  ;;  %p5728_p6 = scmp.lt.u32.totalorder %s5719_s22, %s5951_s19 }
  0x48   : > { %p5727_p3 = por %p5726_p2, %p5725_p0 }
  0x49   : > { %p5723_p13 = pneg %p5722_p12 }
  0x4a   : > { %p5729_p9 = por %p5728_p6, %p5727_p3 }
  0x4c   : > { %p5730_p8 = pnand %p5729_p9, %p5723_p13 }
  0x4e   : > { %5733 = shalt.err (!%p5730_p8)
}
  0x4f   : > { %s5734_s15 = scalar_lea.vmem %s5957_s20, 6144  ;;  %s5795_s17 = smov [#allocation2]  }
  0x50   : > { %p5735_p1 = scmp.ne.s32.totalorder %s5957_s20, %s5734_s15  ;;  %s5739_s18 = sshll.u32 %s5795_s17, 4  ;;  %s5740_s18 = int_to_ptr.vmem [resolvable:$false] %s5739_s18 }
  0x51   : > { %s5741_s10 = scalar_lea.vmem %s5740_s18, 12288  ;;  %p5742_p10 = scmp.lt.s32.totalorder %s5957_s20, %s5740_s18 }
  0x52   : > { %p5737_p4 = pnand %p5735_p1, %p5721_p11  ;;  %p5743_p12 = scmp.lt.s32.totalorder %s5741_s10, %s5734_s15 }
  0x54   : > { %p5738_p5 = pneg %p5737_p4  ;;  %p5744_p0 = por %p5743_p12, %p5742_p10 }
  0x56   : > { %p5745_p2 = pnand %p5744_p0, %p5738_p5 }
  0x58   : > { %5748 = shalt.err (!%p5745_p2)
}
  0x59   : > { %s5796_s22 = smov 384   ;;  %s5797_s23 = smov 24  }
  0x5a   : > { %5193 = dma.hbm_to_vmem [thread:$0]  (!%p5953_p7), %s5951_s19, 6144, %s5957_s20, %s5959_s21, %s5796_s22, %s5796_s22, %s5797_s23  }
  0x5b   : > { %p8081_p11 = scmp.ne.s32.totalorder %s8078_s8, 0 }
  0x5d   : > { %279 = sbr.rel (%p8081_p11) target bundleno = 1516 (0x5ec), region = 48 }
  0x64   : > { %s281_s9 = sand.u32 1, %s5779_s25   ;;  %p8082_p13 = scmp.ne.s32.totalorder %s8077_s30, 0 }
  0x65   : > { %s5172_s12 = smul.u32 384, %s281_s9  ;;  %s282_s16 = scalar_lea.sflag [#allocation3], %s281_s9 }
  0x67   : > { %s5990_s11 = scalar_lea.vmem [#allocation2], %s5172_s12 }
  0x68   : > { %5766 = dma.done.wait (%p8082_p13), %s282_s16, 6144  }
  0x69   : > { %5768 = vsyncadd (%p8082_p13), %s282_s16, 4294961152  ;;  %p8083_p3 = scmp.ne.s32.totalorder %s8076_s29, 0 }
  0x6b   : > { %5770 = dma.done.wait (%p8083_p3), [#allocation5], 28672  }
  0x6c   : > { %5772 = vsyncadd (%p8083_p3), [#allocation5], 4294938624  ;;  %v332_v0 = vld [vmem:[%s5990_s11] sm:$0xff]  ;;  %v333_v1 = vld [vmem:[%s5990_s11 + $0x8] sm:$0xff]  ;;  %s4548_s19 = sshll.u32 %s4536_s28, 4  ;;  %vm4433_vm0 = vcmask 39936  }
  0x6d   : > { %v334_v2 = vld [vmem:[%s5990_s11 + $0x10] sm:$0xff]  ;;  %v6003_v3 = vunpack.c.l.bf16 %v332_v0  ;;  %v6005_v4 = vunpack.c.h.bf16 %v332_v0  ;;  %v6007_v5 = vunpack.c.l.bf16 %v333_v1  ;;  %v6009_v6 = vunpack.c.h.bf16 %v333_v1  ;;  %v335_v7 = vld [vmem:[%s5990_s11 + $0x18] sm:$0xff]  ;;  %v336_v8 = vld [vmem:[%s5990_s11 + $0x20] sm:$0xff]  ;;  %p326_p7 = scmp.lt.s32.totalorder %s4548_s19, 47 }
  0x6e   : > { %v6013_v9 = vunpack.c.l.bf16 %v334_v2  ;;  %v6015_v10 = vunpack.c.l.bf16 %v335_v7  ;;  %v6017_v11 = vunpack.c.h.bf16 %v335_v7  ;;  %v337_v16 = vld [vmem:[%s5990_s11 + $0x28] sm:$0xff]  ;;  %v6028_v17 = vunpack.c.h.bf16 %v334_v2  ;;  %v338_v28 = vld [vmem:[%s5990_s11 + $0x30] sm:$0xff]  ;;  %v339_v33 = vld [vmem:[%s5990_s11 + $0x38] sm:$0xff] }
  0x6f   : > { %v476_v12 = vadd.f32 %v6005_v4, %v6003_v3  ;;  %v588_v13 = vmul.f32 %v6003_v3, %v6003_v3  ;;  %v589_v14 = vmul.f32 %v6005_v4, %v6005_v4  ;;  %v590_v15 = vmul.f32 %v6007_v5, %v6007_v5  ;;  %v341_v42 = vld [vmem:[%s5990_s11 + $0x48] sm:$0xff]  ;;  %v340_v46 = vld [vmem:[%s5990_s11 + $0x40] sm:$0xff]  ;;  %v342_v48 = vld [vmem:[%s5990_s11 + $0x50] sm:$0xff]  ;;  %s8315_s19 = smov (!%p326_p7, %s4548_s19), 47 }
  0x70   : > { %v591_v18 = vmul.f32 %v6009_v6, %v6009_v6  ;;  %v6032_v19 = vunpack.c.l.bf16 %v336_v8  ;;  %v592_v21 = vmul.f32 %v6013_v9, %v6013_v9  ;;  %v6037_v23 = vunpack.c.h.bf16 %v336_v8  ;;  %v343_v59 = vld [vmem:[%s5990_s11 + $0x58] sm:$0xff]  ;;  %s4549_s13 = sshll.u32 %s8315_s19, 3 }
  0x71   : > { %v477_v20 = vadd.f32 %v476_v12, %v6007_v5  ;;  %v684_v22 = vadd.f32 %v589_v14, %v588_v13  ;;  %v6039_v24 = vunpack.c.l.bf16 %v337_v16  ;;  %v483_v25 = vadd.f32 %v6017_v11, %v6015_v10  ;;  %v344_v13 = vld [vmem:[%s5990_s11 + $0x60] sm:$0xff]  ;;  %s7892_s18 = scalar_lea.vmem %s7946_s7, %s4549_s13 }
  0x72   : > { %v594_v26 = vmul.f32 %v6015_v10, %v6015_v10  ;;  %v595_v27 = vmul.f32 %v6017_v11, %v6017_v11  ;;  %v6049_v31 = vunpack.c.h.bf16 %v337_v16  ;;  %v596_v32 = vmul.f32 %v6032_v19, %v6032_v19 }
  0x73   : > { %v478_v29 = vadd.f32 %v477_v20, %v6009_v6  ;;  %v685_v30 = vadd.f32 %v684_v22, %v590_v15  ;;  %v593_v34 = vmul.f32 %v6028_v17, %v6028_v17  ;;  %v484_v35 = vadd.f32 %v483_v25, %v6032_v19  ;;  %v345_v20 = vld [vmem:[%s5990_s11 + $0x68] sm:$0xff] }
  0x74   : > { %v597_v36 = vmul.f32 %v6037_v23, %v6037_v23  ;;  %v691_v37 = vadd.f32 %v595_v27, %v594_v26  ;;  %v6060_v40 = vunpack.c.l.bf16 %v338_v28  ;;  %v6062_v41 = vunpack.c.h.bf16 %v338_v28  ;;  %v5241_v28 = vld [vmem:[#allocation4] ss:$16 sps:$4 sm:$0xff]  }
  0x75   : > { %v479_v38 = vadd.f32 %v478_v29, %v6013_v9  ;;  %v686_v39 = vadd.f32 %v685_v30, %v591_v18  ;;  %v485_v43 = vadd.f32 %v484_v35, %v6037_v23  ;;  %v598_v44 = vmul.f32 %v6039_v24, %v6039_v24  ;;  %v5242_v35 = vld [vmem:[#allocation4 + $0xc] ss:$16 sps:$4 sm:$0xff]  }
  0x76   : > { %v692_v45 = vadd.f32 %v691_v37, %v596_v32  ;;  %v6069_v47 = vunpack.c.l.bf16 %v339_v33  ;;  %v599_v51 = vmul.f32 %v6049_v31, %v6049_v31  ;;  %v6075_v52 = vunpack.c.h.bf16 %v339_v33  ;;  %2661 = vmatprep.subr.bf16.mxu1 %v5242_v35  ;;  %v5254_v35 = vld [vmem:[#allocation4 + $0x4c] ss:$16 sps:$4 sm:$0xff]  }
  0x77   : > { %v480_v49 = vadd.f32 %v479_v38, %v6028_v17  ;;  %v687_v50 = vadd.f32 %v686_v39, %v592_v21  ;;  %v486_v53 = vadd.f32 %v485_v43, %v6039_v24  ;;  %v490_v55 = vadd.f32 %v6062_v41, %v6060_v40  ;;  %v5239_v21 = vld [vmem:[#allocation4 + $0x4] ss:$16 sps:$4 sm:$0xff]  }
  0x78   : > { %v693_v54 = vadd.f32 %v692_v45, %v597_v36  ;;  %v6080_v56 = vunpack.c.l.bf16 %v341_v42  ;;  %v6082_v58 = vunpack.c.l.bf16 %v340_v46  ;;  %v6085_v60 = vunpack.c.h.bf16 %v341_v42  ;;  %2322 = vmatprep.subr.bf16.mxu0 %v5239_v21  ;;  %v5244_v36 = vld [vmem:[#allocation4 + $0x8] ss:$16 sps:$4 sm:$0xff]   ;;  %v346_v43 = vld [vmem:[%s5990_s11 + $0x70] sm:$0xff] }
  0x79   : > { %481 = vadd.xlane.f32.xlu0 %v480_v49  ;;  %v688_v57 = vadd.f32 %v687_v50, %v593_v34  ;;  %v6087_v61 = vunpack.c.l.bf16 %v342_v48  ;;  %v487_v62 = vadd.f32 %v486_v53, %v6049_v31  ;;  %v6090_v0 = vunpack.c.h.bf16 %v340_v46  ;;  %v347_v34 = vld [vmem:[%s5990_s11 + $0x78] sm:$0xff]  ;;  %v5245_v45 = vld [vmem:[#allocation4 + $0x24] ss:$16 sps:$4 sm:$0xff]   ;;  %v5247_v46 = vld [vmem:[#allocation4 + $0x20] ss:$16 sps:$4 sm:$0xff]   ;;  %2323 = vmatpush1.bf16.msra.mxu0 %v5241_v28 }
  0x7a   : > { %v694_v63 = vadd.f32 %v693_v54, %v598_v44  ;;  %v491_v1 = vadd.f32 %v490_v55, %v6069_v47  ;;  %v6093_v2 = vunpack.c.h.bf16 %v342_v48  ;;  %v497_v7 = vadd.f32 %v6085_v60, %v6080_v56  ;;  %v348_v44 = vld [vmem:[%s5990_s11 + $0x80] sm:$0xff]  ;;  %v5248_v53 = vld [vmem:[#allocation4 + $0x2c] ss:$16 sps:$4 sm:$0xff]   ;;  %2662 = vmatpush1.bf16.msra.mxu1 %v5244_v36  ;;  %2324 = vmatprep.subr.bf16.mxu0 %v5245_v45 }
  0x7b   : > { %689 = vadd.xlane.f32.xlu1 %v688_v57  ;;  %v600_v8 = vmul.f32 %v6060_v40, %v6060_v40  ;;  %v601_v12 = vmul.f32 %v6062_v41, %v6062_v41  ;;  %v6103_v16 = vunpack.c.l.bf16 %v343_v59  ;;  %v602_v18 = vmul.f32 %v6069_v47, %v6069_v47  ;;  %2663 = vmatprep.subr.bf16.mxu1 %v5248_v53 }
  0x7c   : > { %v695_v14 = vadd.f32 %v694_v63, %v599_v51  ;;  %v492_v15 = vadd.f32 %v491_v1, %v6075_v52  ;;  %v6108_v22 = vunpack.c.h.bf16 %v343_v59  ;;  %v498_v25 = vadd.f32 %v497_v7, %v6087_v61 }
  0x7d   : > { %488 = vadd.xlane.f32.xlu0 %v487_v62  ;;  %v603_v26 = vmul.f32 %v6075_v52, %v6075_v52  ;;  %v698_v27 = vadd.f32 %v601_v12, %v600_v8  ;;  %v606_v30 = vmul.f32 %v6080_v56, %v6080_v56  ;;  %v607_v32 = vmul.f32 %v6085_v60, %v6085_v60  ;;  %v5250_v62 = vld [vmem:[#allocation4 + $0x28] ss:$16 sps:$4 sm:$0xff]   ;;  %v5251_v12 = vld [vmem:[#allocation4 + $0x44] ss:$16 sps:$4 sm:$0xff]  }
  0x7e   : > { %v493_v29 = vadd.f32 %v492_v15, %v6082_v58  ;;  %v608_v33 = vmul.f32 %v6087_v61, %v6087_v61  ;;  %v499_v37 = vadd.f32 %v498_v25, %v6093_v2  ;;  %v604_v38 = vmul.f32 %v6082_v58, %v6082_v58  ;;  %2325 = vmatpush1.bf16.msra.mxu0 %v5247_v46 }
  0x7f   : > { %696 = vadd.xlane.f32.xlu1 %v695_v14  ;;  %v605_v39 = vmul.f32 %v6090_v0, %v6090_v0  ;;  %v699_v42 = vadd.f32 %v698_v27, %v602_v18  ;;  %v609_v49 = vmul.f32 %v6093_v2, %v6093_v2  ;;  %v705_v50 = vadd.f32 %v607_v32, %v606_v30  ;;  %v349_v18 = vld [vmem:[%s5990_s11 + $0x88] sm:$0xff] }
  0x80   : > { %v494_v48 = vadd.f32 %v493_v29, %v6090_v0  ;;  %v6131_v51 = vunpack.c.l.bf16 %v344_v13  ;;  %v500_v54 = vadd.f32 %v499_v37, %v6103_v16  ;;  %v6134_v57 = vunpack.c.h.bf16 %v344_v13  ;;  %2664 = vmatpush1.bf16.msra.mxu1 %v5250_v62  ;;  %2326 = vmatprep.subr.bf16.mxu0 %v5251_v12 }
  0x81   : > { %v700_v55 = vadd.f32 %v699_v42, %v603_v26  ;;  %v6136_v59 = vunpack.c.l.bf16 %v345_v20  ;;  %v610_v63 = vmul.f32 %v6103_v16, %v6103_v16  ;;  %v611_v1 = vmul.f32 %v6108_v22, %v6108_v22  ;;  %v5256_v42 = vld [vmem:[#allocation4 + $0x48] ss:$16 sps:$4 sm:$0xff]   ;;  %2665 = vmatprep.subr.bf16.mxu1 %v5254_v35 }
  0x82   : > { %495 = vadd.xlane.f32.xlu0 %v494_v48  ;;  %v706_v7 = vadd.f32 %v705_v50, %v608_v33  ;;  %v6142_v8 = vunpack.c.h.bf16 %v345_v20  ;;  %v501_v13 = vadd.f32 %v500_v54, %v6108_v22  ;;  %v504_v15 = vadd.f32 %v6134_v57, %v6131_v51  ;;  %v5253_v20 = vld [vmem:[#allocation4 + $0x40] ss:$16 sps:$4 sm:$0xff]   ;;  %v351_v48 = vld [vmem:[%s5990_s11 + $0x98] sm:$0xff] }
  0x83   : > { %v701_v14 = vadd.f32 %v700_v55, %v604_v38  ;;  %v6148_v21 = vunpack.c.l.bf16 %v347_v34  ;;  %v6150_v26 = vunpack.c.l.bf16 %v346_v43  ;;  %v6152_v27 = vunpack.c.h.bf16 %v347_v34  ;;  %v5259_v50 = vld [vmem:[#allocation4 + $0x60] ss:$16 sps:$4 sm:$0xff]   ;;  %2327 = vmatpush1.bf16.msra.mxu0 %v5253_v20 }
  0x84   : > { %v707_v25 = vadd.f32 %v706_v7, %v609_v49  ;;  %v6154_v28 = vunpack.c.l.bf16 %v348_v44  ;;  %502 = vadd.xlane.f32.xlu1 %v501_v13  ;;  %v6156_v30 = vunpack.c.h.bf16 %v346_v43  ;;  %v505_v32 = vadd.f32 %v504_v15, %v6136_v59  ;;  %v5257_v49 = vld [vmem:[#allocation4 + $0x64] ss:$16 sps:$4 sm:$0xff]   ;;  %2666 = vmatpush1.bf16.msra.mxu1 %v5256_v42 }
  0x85   : > { %8084 = vst [vmem:[#allocation9_spill] sm:$0xff] %v6148_v21  ;;  %8085 = vst [vmem:[#allocation10_spill] sm:$0xff] %v6150_v26  ;;  %v702_v29 = vadd.f32 %v701_v14, %v605_v39  ;;  %v6159_v33 = vunpack.c.h.bf16 %v348_v44  ;;  %v511_v34 = vadd.f32 %v6152_v27, %v6148_v21  ;;  %v612_v37 = vmul.f32 %v6131_v51, %v6131_v51  ;;  %v350_v39 = vld [vmem:[%s5990_s11 + $0x90] sm:$0xff] }
  0x86   : > { %8086 = vst [vmem:[#allocation11_spill] sm:$0xff] %v6154_v28  ;;  %v708_v36 = vadd.f32 %v707_v25, %v610_v63  ;;  %v613_v38 = vmul.f32 %v6134_v57, %v6134_v57  ;;  %v506_v43 = vadd.f32 %v505_v32, %v6142_v8  ;;  %v6169_v44 = vunpack.c.l.bf16 %v349_v18  ;;  %v5260_v63 = vld [vmem:[#allocation4 + $0x6c] ss:$16 sps:$4 sm:$0xff]   ;;  %v5263_v14 = vld [vmem:[#allocation4 + $0x84] ss:$16 sps:$4 sm:$0xff]   ;;  %2328 = vmatprep.subr.bf16.mxu0 %v5257_v49 }
  0x87   : > { %8087 = vst [vmem:[#allocation12_spill] sm:$0xff] %v6159_v33  ;;  %703 = vadd.xlane.f32.xlu0 %v702_v29  ;;  %v6171_v45 = vunpack.c.h.bf16 %v349_v18  ;;  %v614_v46 = vmul.f32 %v6136_v59, %v6136_v59  ;;  %v512_v54 = vadd.f32 %v511_v34, %v6154_v28  ;;  %v615_v55 = vmul.f32 %v6142_v8, %v6142_v8  ;;  %v352_v29 = vld [vmem:[%s5990_s11 + $0xa0] sm:$0xff]  ;;  %v353_v32 = vld [vmem:[%s5990_s11 + $0xa8] sm:$0xff] }
  0x88   : > { %8088 = vst [vmem:[#allocation13_spill] sm:$0xff] %v6169_v44  ;;  %v709_v53 = vadd.f32 %v708_v36, %v611_v1  ;;  %v712_v62 = vadd.f32 %v613_v38, %v612_v37  ;;  %v507_v7 = vadd.f32 %v506_v43, %v6150_v26  ;;  %v618_v12 = vmul.f32 %v6148_v21, %v6148_v21  ;;  %v354_v38 = vld [vmem:[%s5990_s11 + $0xb0] sm:$0xff]  ;;  %v5262_v43 = vld [vmem:[#allocation4 + $0x68] ss:$16 sps:$4 sm:$0xff]  }
  0x89   : > { %8089 = vst [vmem:[#allocation14_spill] sm:$0xff] %v6171_v45  ;;  %v619_v13 = vmul.f32 %v6152_v27, %v6152_v27  ;;  %v620_v1 = vmul.f32 %v6154_v28, %v6154_v28  ;;  %v513_v15 = vadd.f32 %v512_v54, %v6159_v33  ;;  %v616_v18 = vmul.f32 %v6150_v26, %v6150_v26 }
  0x8a   : > { %710 = vadd.xlane.f32.xlu1 %v709_v53  ;;  %v617_v25 = vmul.f32 %v6156_v30, %v6156_v30  ;;  %v713_v20 = vadd.f32 %v712_v62, %v614_v46  ;;  %v508_v36 = vadd.f32 %v507_v7, %v6156_v30  ;;  %v621_v34 = vmul.f32 %v6159_v33, %v6159_v33  ;;  %v5265_v62 = vld [vmem:[#allocation4 + $0x80] ss:$16 sps:$4 sm:$0xff]  }
  0x8b   : > { %v719_v37 = vadd.f32 %v619_v13, %v618_v12  ;;  %v6196_v35 = vunpack.c.l.bf16 %v350_v39  ;;  %v514_v53 = vadd.f32 %v513_v15, %v6169_v44  ;;  %v6200_v26 = vunpack.c.h.bf16 %v350_v39  ;;  %2329 = vmatpush1.bf16.msra.mxu0 %v5259_v50  ;;  %2667 = vmatprep.subr.bf16.mxu1 %v5260_v63 }
  0x8c   : > { %v714_v54 = vadd.f32 %v713_v20, %v615_v55  ;;  %v6202_v46 = vunpack.c.l.bf16 %v351_v48  ;;  %509 = vadd.xlane.f32.xlu0 %v508_v36  ;;  %v622_v7 = vmul.f32 %v6169_v44, %v6169_v44  ;;  %v623_v42 = vmul.f32 %v6171_v45, %v6171_v45  ;;  %2330 = vmatprep.subr.bf16.mxu0 %v5263_v14  ;;  %v5266_v55 = vld [vmem:[#allocation4 + $0x8c] ss:$16 sps:$4 sm:$0xff]  }
  0x8d   : > { %8090 = vst [vmem:[#allocation15_spill] sm:$0xff] %v6196_v35  ;;  %8091 = vst [vmem:[#allocation16_spill] sm:$0xff] %v6200_v26  ;;  %v720_v49 = vadd.f32 %v719_v37, %v620_v1  ;;  %v6208_v12 = vunpack.c.h.bf16 %v351_v48  ;;  %v515_v39 = vadd.f32 %v514_v53, %v6171_v45  ;;  %v518_v50 = vadd.f32 %v6200_v26, %v6196_v35  ;;  %v355_v36 = vld [vmem:[%s5990_s11 + $0xb8] sm:$0xff] }
  0x8e   : > { %8092 = vst [vmem:[#allocation17_spill] sm:$0xff] %v6202_v46  ;;  %v715_v13 = vadd.f32 %v714_v54, %v616_v18  ;;  %v6213_v63 = vunpack.c.l.bf16 %v353_v32  ;;  %v6215_v20 = vunpack.c.l.bf16 %v352_v29  ;;  %v6218_v44 = vunpack.c.h.bf16 %v353_v32  ;;  %2668 = vmatpush1.bf16.msra.mxu1 %v5262_v43  ;;  %v5268_v48 = vld [vmem:[#allocation4 + $0x88] ss:$16 sps:$4 sm:$0xff]  }
  0x8f   : > { %8093 = vst [vmem:[#allocation18_spill] sm:$0xff] %v6208_v12  ;;  %v721_v15 = vadd.f32 %v720_v49, %v621_v34  ;;  %v6220_v1 = vunpack.c.l.bf16 %v354_v38  ;;  %516 = vadd.xlane.f32.xlu1 %v515_v39  ;;  %v6222_v37 = vunpack.c.h.bf16 %v352_v29  ;;  %v519_v18 = vadd.f32 %v518_v50, %v6202_v46  ;;  %2331 = vmatpush1.bf16.msra.mxu0 %v5265_v62  ;;  %v5269_v34 = vld [vmem:[#allocation4 + $0xa4] ss:$16 sps:$4 sm:$0xff]   ;;  %v5272_v50 = vld [vmem:[#allocation4 + $0xac] ss:$16 sps:$4 sm:$0xff]  }
  0x90   : > { %8094 = vst [vmem:[#allocation19_spill] sm:$0xff] %v6213_v63  ;;  %8095 = vst [vmem:[#allocation20_spill] sm:$0xff] %v6215_v20  ;;  %v716_v14 = vadd.f32 %v715_v13, %v617_v25  ;;  %v6225_v53 = vunpack.c.h.bf16 %v354_v38  ;;  %v525_v32 = vadd.f32 %v6218_v44, %v6213_v63  ;;  %v624_v49 = vmul.f32 %v6196_v35, %v6196_v35  ;;  %v356_v25 = vld [vmem:[%s5990_s11 + $0xc0] sm:$0xff] }
  0x91   : > { %8096 = vst [vmem:[#allocation21_spill] sm:$0xff] %v6218_v44  ;;  %8097 = vst [vmem:[#allocation22_spill] sm:$0xff] %v6220_v1  ;;  %v722_v54 = vadd.f32 %v721_v15, %v622_v7  ;;  %v625_v43 = vmul.f32 %v6200_v26, %v6200_v26  ;;  %2669 = vmatprep.subr.bf16.mxu1 %v5266_v55  ;;  %v520_v29 = vadd.f32 %v519_v18, %v6208_v12  ;;  %v357_v7 = vld [vmem:[%s5990_s11 + $0xc8] sm:$0xff]  ;;  %v5271_v13 = vld [vmem:[#allocation4 + $0xa0] ss:$16 sps:$4 sm:$0xff]  }
  0x92   : > { %8098 = vst [vmem:[#allocation23_spill] sm:$0xff] %v6222_v37  ;;  %8099 = vst [vmem:[#allocation24_spill] sm:$0xff] %v6225_v53  ;;  %717 = vadd.xlane.f32.xlu0 %v716_v14  ;;  %v6235_v39 = vunpack.c.l.bf16 %v355_v36  ;;  %v6237_v38 = vunpack.c.h.bf16 %v355_v36  ;;  %v626_v62 = vmul.f32 %v6202_v46, %v6202_v46  ;;  %v526_v35 = vadd.f32 %v525_v32, %v6220_v1  ;;  %v5274_v14 = vld [vmem:[#allocation4 + $0xa8] ss:$16 sps:$4 sm:$0xff]   ;;  %v5275_v18 = vld [vmem:[#allocation4 + $0xc4] ss:$16 sps:$4 sm:$0xff]  }
  0x93   : > { %v723_v15 = vadd.f32 %v722_v54, %v623_v42  ;;  %v627_v26 = vmul.f32 %v6208_v12, %v6208_v12  ;;  %v726_v55 = vadd.f32 %v625_v43, %v624_v49  ;;  %2670 = vmatpush1.bf16.msra.mxu1 %v5268_v48  ;;  %v521_v36 = vadd.f32 %v520_v29, %v6215_v20  ;;  %v5278_v54 = vld [vmem:[#allocation4 + $0xcc] ss:$16 sps:$4 sm:$0xff]   ;;  %v358_v29 = vld [vmem:[%s5990_s11 + $0xd0] sm:$0xff] }
  0x94   : > { %8100 = vst [vmem:[#allocation25_spill] sm:$0xff] %v6235_v39  ;;  %8101 = vst [vmem:[#allocation26_spill] sm:$0xff] %v6237_v38  ;;  %v630_v46 = vmul.f32 %v6213_v63, %v6213_v63  ;;  %v631_v45 = vmul.f32 %v6218_v44, %v6218_v44  ;;  %v632_v42 = vmul.f32 %v6220_v1, %v6220_v1  ;;  %2332 = vmatprep.subr.bf16.mxu0 %v5269_v34 }
  0x95   : > { %724 = vadd.xlane.f32.xlu1 %v723_v15  ;;  %v527_v32 = vadd.f32 %v526_v35, %v6225_v53  ;;  %v628_v48 = vmul.f32 %v6215_v20, %v6215_v20  ;;  %v629_v49 = vmul.f32 %v6222_v37, %v6222_v37  ;;  %v727_v43 = vadd.f32 %v726_v55, %v626_v62  ;;  %v359_v15 = vld [vmem:[%s5990_s11 + $0xd8] sm:$0xff]  ;;  %v5277_v35 = vld [vmem:[#allocation4 + $0xc0] ss:$16 sps:$4 sm:$0xff]  }
  0x96   : > { %v522_v63 = vadd.f32 %v521_v36, %v6222_v37  ;;  %v633_v44 = vmul.f32 %v6225_v53, %v6225_v53  ;;  %v733_v1 = vadd.f32 %v631_v45, %v630_v46  ;;  %v6261_v34 = vunpack.c.l.bf16 %v356_v25  ;;  %2333 = vmatpush1.bf16.msra.mxu0 %v5271_v13  ;;  %2671 = vmatprep.subr.bf16.mxu1 %v5272_v50  ;;  %v360_v55 = vld [vmem:[%s5990_s11 + $0xe0] sm:$0xff]  ;;  %v5280_v36 = vld [vmem:[#allocation4 + $0xc8] ss:$16 sps:$4 sm:$0xff]  }
  0x97   : > { %v528_v20 = vadd.f32 %v527_v32, %v6235_v39  ;;  %v728_v12 = vadd.f32 %v727_v43, %v627_v26  ;;  %v6265_v28 = vunpack.c.h.bf16 %v356_v25  ;;  %v6267_v62 = vunpack.c.l.bf16 %v357_v7  ;;  %2672 = vmatpush1.bf16.msra.mxu1 %v5274_v14  ;;  %2334 = vmatprep.subr.bf16.mxu0 %v5275_v18  ;;  %v5281_v26 = vld [vmem:[#allocation4 + $0xe4] ss:$16 sps:$4 sm:$0xff]   ;;  %v361_v18 = vld [vmem:[%s5990_s11 + $0xe8] sm:$0xff] }
  0x98   : > { %8102 = vst [vmem:[#allocation27_spill] sm:$0xff] %v6261_v34  ;;  %523 = vadd.xlane.f32.xlu0 %v522_v63  ;;  %v634_v45 = vmul.f32 %v6235_v39, %v6235_v39  ;;  %v635_v46 = vmul.f32 %v6237_v38, %v6237_v38  ;;  %v734_v13 = vadd.f32 %v733_v1, %v632_v42  ;;  %v6274_v50 = vunpack.c.h.bf16 %v357_v7  ;;  %v5283_v1 = vld [vmem:[#allocation4 + $0xe0] ss:$16 sps:$4 sm:$0xff]   ;;  %v5284_v7 = vld [vmem:[#allocation4 + $0xec] ss:$16 sps:$4 sm:$0xff]  }
  0x99   : > { %8103 = vst [vmem:[#allocation28_spill] sm:$0xff] %v6265_v28  ;;  %8104 = vst [vmem:[#allocation29_spill] sm:$0xff] %v6267_v62  ;;  %2673 = vmatprep.subr.bf16.mxu1 %v5278_v54  ;;  %v529_v25 = vadd.f32 %v528_v20, %v6237_v38  ;;  %v729_v32 = vadd.f32 %v728_v12, %v628_v48  ;;  %v532_v14 = vadd.f32 %v6265_v28, %v6261_v34  ;;  %v5287_v48 = vld [vmem:[#allocation4 + $0x104] ss:$16 sps:$4 sm:$0xff]  }
  0x9a   : > { %8105 = vst [vmem:[#allocation30_spill] sm:$0xff] %v6274_v50  ;;  %v6280_v43 = vunpack.c.l.bf16 %v359_v15  ;;  %v735_v63 = vadd.f32 %v734_v13, %v633_v44  ;;  %v6282_v37 = vunpack.c.l.bf16 %v358_v29  ;;  %v6284_v39 = vunpack.c.h.bf16 %v359_v15  ;;  %2335 = vmatpush1.bf16.msra.mxu0 %v5277_v35  ;;  %v5286_v44 = vld [vmem:[#allocation4 + $0xe8] ss:$16 sps:$4 sm:$0xff]   ;;  %v5293_v38 = vld [vmem:[#allocation4 + $0x124] ss:$16 sps:$4 sm:$0xff]  }
  0x9b   : > { %v6286_v53 = vunpack.c.l.bf16 %v360_v55  ;;  %530 = vadd.xlane.f32.xlu1 %v529_v25  ;;  %v730_v20 = vadd.f32 %v729_v32, %v629_v49  ;;  %v6288_v12 = vunpack.c.h.bf16 %v358_v29  ;;  %v533_v42 = vadd.f32 %v532_v14, %v6267_v62  ;;  %2674 = vmatpush1.bf16.msra.mxu1 %v5280_v36  ;;  %v362_v29 = vld [vmem:[%s5990_s11 + $0xf0] sm:$0xff]  ;;  %v5290_v32 = vld [vmem:[#allocation4 + $0x10c] ss:$16 sps:$4 sm:$0xff]  }
  0x9c   : > { %8106 = vst [vmem:[#allocation31_spill] sm:$0xff] %v6280_v43  ;;  %8107 = vst [vmem:[#allocation32_spill] sm:$0xff] %v6282_v37  ;;  %v6291_v54 = vunpack.c.h.bf16 %v360_v55  ;;  %v736_v15 = vadd.f32 %v735_v63, %v634_v45  ;;  %v539_v13 = vadd.f32 %v6284_v39, %v6280_v43  ;;  %v636_v35 = vmul.f32 %v6261_v34, %v6261_v34  ;;  %v5289_v25 = vld [vmem:[#allocation4 + $0x100] ss:$16 sps:$4 sm:$0xff]   ;;  %v363_v63 = vld [vmem:[%s5990_s11 + $0xf8] sm:$0xff] }
  0x9d   : > { %8108 = vst [vmem:[#allocation33_spill] sm:$0xff] %v6284_v39  ;;  %8109 = vst [vmem:[#allocation34_spill] sm:$0xff] %v6286_v53  ;;  %v637_v49 = vmul.f32 %v6265_v28, %v6265_v28  ;;  %2336 = vmatprep.subr.bf16.mxu0 %v5281_v26  ;;  %731 = vadd.xlane.f32.xlu0 %v730_v20  ;;  %v534_v55 = vadd.f32 %v533_v42, %v6274_v50  ;;  %v6301_v36 = vunpack.c.l.bf16 %v361_v18 }
  0x9e   : > { %8110 = vst [vmem:[#allocation35_spill] sm:$0xff] %v6288_v12  ;;  %8111 = vst [vmem:[#allocation36_spill] sm:$0xff] %v6291_v54  ;;  %v6303_v14 = vunpack.c.h.bf16 %v361_v18  ;;  %v638_v45 = vmul.f32 %v6267_v62, %v6267_v62  ;;  %v737_v34 = vadd.f32 %v736_v15, %v635_v46  ;;  %v540_v28 = vadd.f32 %v539_v13, %v6286_v53 }
  0x9f   : > { %8112 = vst [vmem:[#allocation37_spill] sm:$0xff] %v6301_v36  ;;  %v639_v26 = vmul.f32 %v6274_v50, %v6274_v50  ;;  %v740_v20 = vadd.f32 %v637_v49, %v636_v35  ;;  %2337 = vmatpush1.bf16.msra.mxu0 %v5283_v1  ;;  %v535_v42 = vadd.f32 %v534_v55, %v6282_v37  ;;  %v364_v49 = vld [vmem:[%s5990_s11 + $0x100] sm:$0xff]  ;;  %v365_v55 = vld [vmem:[%s5990_s11 + $0x108] sm:$0xff] }
  0xa0   : > { %8113 = vst [vmem:[#allocation38_spill] sm:$0xff] %v6303_v14  ;;  %v642_v18 = vmul.f32 %v6280_v43, %v6280_v43  ;;  %v643_v62 = vmul.f32 %v6284_v39, %v6284_v39  ;;  %v644_v46 = vmul.f32 %v6286_v53, %v6286_v53  ;;  %2675 = vmatprep.subr.bf16.mxu1 %v5284_v7  ;;  %v6328_v53 = vunpack.c.l.bf16 %v362_v29  ;;  %v5295_v7 = vld [vmem:[#allocation4 + $0x120] ss:$16 sps:$4 sm:$0xff]  }
  0xa1   : > { %738 = vadd.xlane.f32.xlu1 %v737_v34  ;;  %v541_v15 = vadd.f32 %v540_v28, %v6291_v54  ;;  %v640_v13 = vmul.f32 %v6282_v37, %v6282_v37  ;;  %v641_v1 = vmul.f32 %v6288_v12, %v6288_v12  ;;  %v741_v35 = vadd.f32 %v740_v20, %v638_v45  ;;  %v366_v34 = vld [vmem:[%s5990_s11 + $0x110] sm:$0xff]  ;;  %v5292_v28 = vld [vmem:[#allocation4 + $0x108] ss:$16 sps:$4 sm:$0xff]  }
  0xa2   : > { %v536_v43 = vadd.f32 %v535_v42, %v6288_v12  ;;  %v645_v39 = vmul.f32 %v6291_v54, %v6291_v54  ;;  %v747_v50 = vadd.f32 %v643_v62, %v642_v18  ;;  %8114 = vst [vmem:[#allocation39_spill] sm:$0xff] %v6328_v53  ;;  %2676 = vmatpush1.bf16.msra.mxu1 %v5286_v44  ;;  %v6332_v45 = vunpack.c.h.bf16 %v362_v29  ;;  %v5296_v42 = vld [vmem:[#allocation4 + $0x12c] ss:$16 sps:$4 sm:$0xff]  }
  0xa3   : > { %2338 = vmatprep.subr.bf16.mxu0 %v5287_v48  ;;  %v542_v37 = vadd.f32 %v541_v15, %v6301_v36  ;;  %v742_v33 = vadd.f32 %v741_v35, %v639_v26  ;;  %v6334_v20 = vunpack.c.l.bf16 %v363_v63  ;;  %2677 = vmatprep.subr.bf16.mxu1 %v5290_v32  ;;  %v646_v62 = vmul.f32 %v6301_v36, %v6301_v36  ;;  %v367_v12 = vld [vmem:[%s5990_s11 + $0x118] sm:$0xff] }
  0xa4   : > { %8115 = vst [vmem:[#allocation40_spill] sm:$0xff] %v6332_v45  ;;  %2339 = vmatpush1.bf16.msra.mxu0 %v5289_v25  ;;  %537 = vadd.xlane.f32.xlu0 %v536_v43  ;;  %v647_v44 = vmul.f32 %v6303_v14, %v6303_v14  ;;  %v748_v48 = vadd.f32 %v747_v50, %v644_v46  ;;  %v6340_v18 = vunpack.c.h.bf16 %v363_v63  ;;  %v5298_v26 = vld [vmem:[#allocation4 + $0x128] ss:$16 sps:$4 sm:$0xff]   ;;  %v6346_v32 = vunpack.c.l.bf16 %v365_v55  ;;  %v5299_v43 = vld [vmem:[#allocation4 + $0x144] ss:$16 sps:$4 sm:$0xff]  }
  0xa5   : > { %8116 = vst [vmem:[#allocation41_spill] sm:$0xff] %v6334_v20  ;;  %2340 = vmatprep.subr.bf16.mxu0 %v5293_v38  ;;  %v543_v29 = vadd.f32 %v542_v37, %v6303_v14  ;;  %v743_v15 = vadd.f32 %v742_v33, %v640_v13  ;;  %v546_v25 = vadd.f32 %v6332_v45, %v6328_v53  ;;  %v6348_v36 = vunpack.c.l.bf16 %v364_v49  ;;  %v5301_v46 = vld [vmem:[#allocation4 + $0x140] ss:$16 sps:$4 sm:$0xff]  }
  0xa6   : > { %8117 = vst [vmem:[#allocation42_spill] sm:$0xff] %v6340_v18  ;;  %8118 = vst [vmem:[#allocation43_spill] sm:$0xff] %v6346_v32  ;;  %v749_v35 = vadd.f32 %v748_v48, %v645_v39  ;;  %v6350_v54 = vunpack.c.h.bf16 %v365_v55  ;;  %v6352_v50 = vunpack.c.l.bf16 %v366_v34  ;;  %2678 = vmatpush1.bf16.msra.mxu1 %v5292_v28  ;;  %v6354_v63 = vunpack.c.h.bf16 %v364_v49  ;;  %v5302_v39 = vld [vmem:[#allocation4 + $0x14c] ss:$16 sps:$4 sm:$0xff]   ;;  %v368_v49 = vld [vmem:[%s5990_s11 + $0x120] sm:$0xff] }
  0xa7   : > { %8119 = vst [vmem:[#allocation44_spill] sm:$0xff] %v6348_v36  ;;  %544 = vadd.xlane.f32.xlu1 %v543_v29  ;;  %v744_v38 = vadd.f32 %v743_v15, %v641_v1  ;;  %v547_v33 = vadd.f32 %v546_v25, %v6334_v20  ;;  %v6357_v37 = vunpack.c.h.bf16 %v366_v34  ;;  %v648_v48 = vmul.f32 %v6328_v53, %v6328_v53  ;;  %v5304_v28 = vld [vmem:[#allocation4 + $0x148] ss:$16 sps:$4 sm:$0xff]   ;;  %v5305_v29 = vld [vmem:[#allocation4 + $0x164] ss:$16 sps:$4 sm:$0xff]  }
  0xa8   : > { %8120 = vst [vmem:[#allocation45_spill] sm:$0xff] %v6350_v54  ;;  %8121 = vst [vmem:[#allocation46_spill] sm:$0xff] %v6352_v50  ;;  %2341 = vmatpush1.bf16.msra.mxu0 %v5295_v7  ;;  %v750_v13 = vadd.f32 %v749_v35, %v646_v62  ;;  %v553_v55 = vadd.f32 %v6350_v54, %v6346_v32  ;;  %v649_v1 = vmul.f32 %v6332_v45, %v6332_v45  ;;  %v369_v25 = vld [vmem:[%s5990_s11 + $0x128] sm:$0xff] }
  0xa9   : > { %8122 = vst [vmem:[#allocation47_spill] sm:$0xff] %v6354_v63  ;;  %8123 = vst [vmem:[#allocation48_spill] sm:$0xff] %v6357_v37  ;;  %2679 = vmatprep.subr.bf16.mxu1 %v5296_v42  ;;  %745 = vadd.xlane.f32.xlu0 %v744_v38  ;;  %v548_v34 = vadd.f32 %v547_v33, %v6340_v18  ;;  %v6367_v7 = vunpack.c.l.bf16 %v367_v12  ;;  %v6369_v15 = vunpack.c.h.bf16 %v367_v12  ;;  %v5308_v35 = vld [vmem:[#allocation4 + $0x16c] ss:$16 sps:$4 sm:$0xff]  }
  0xaa   : > { %v650_v62 = vmul.f32 %v6334_v20, %v6334_v20  ;;  %v751_v14 = vadd.f32 %v750_v13, %v647_v44  ;;  %v554_v53 = vadd.f32 %v553_v55, %v6352_v50  ;;  %v651_v42 = vmul.f32 %v6340_v18, %v6340_v18  ;;  %2680 = vmatpush1.bf16.msra.mxu1 %v5298_v26 }
  0xab   : > { %8124 = vst [vmem:[#allocation49_spill] sm:$0xff] %v6367_v7  ;;  %8125 = vst [vmem:[#allocation50_spill] sm:$0xff] %v6369_v15  ;;  %v754_v38 = vadd.f32 %v649_v1, %v648_v48  ;;  %v549_v33 = vadd.f32 %v548_v34, %v6348_v36  ;;  %v654_v12 = vmul.f32 %v6346_v32, %v6346_v32  ;;  %2342 = vmatprep.subr.bf16.mxu0 %v5299_v43  ;;  %v370_v1 = vld [vmem:[%s5990_s11 + $0x130] sm:$0xff]  ;;  %v371_v34 = vld [vmem:[%s5990_s11 + $0x138] sm:$0xff] }
  0xac   : > { %v655_v20 = vmul.f32 %v6350_v54, %v6350_v54  ;;  %v656_v44 = vmul.f32 %v6352_v50, %v6352_v50  ;;  %752 = vadd.xlane.f32.xlu1 %v751_v14  ;;  %v555_v13 = vadd.f32 %v554_v53, %v6357_v37  ;;  %v652_v55 = vmul.f32 %v6348_v36, %v6348_v36  ;;  %v372_v14 = vld [vmem:[%s5990_s11 + $0x140] sm:$0xff]  ;;  %v5310_v43 = vld [vmem:[#allocation4 + $0x168] ss:$16 sps:$4 sm:$0xff]  }
  0xad   : > { %v653_v26 = vmul.f32 %v6354_v63, %v6354_v63  ;;  %v755_v48 = vadd.f32 %v754_v38, %v650_v62  ;;  %v550_v32 = vadd.f32 %v549_v33, %v6354_v63  ;;  %v657_v54 = vmul.f32 %v6357_v37, %v6357_v37  ;;  %2343 = vmatpush1.bf16.msra.mxu0 %v5301_v46  ;;  %v5307_v53 = vld [vmem:[#allocation4 + $0x160] ss:$16 sps:$4 sm:$0xff]   ;;  %v5311_v33 = vld [vmem:[#allocation4 + $0x184] ss:$16 sps:$4 sm:$0xff]   ;;  %v373_v63 = vld [vmem:[%s5990_s11 + $0x148] sm:$0xff] }
  0xae   : > { %v761_v18 = vadd.f32 %v655_v20, %v654_v12  ;;  %v6394_v50 = vunpack.c.l.bf16 %v368_v49  ;;  %2681 = vmatprep.subr.bf16.mxu1 %v5302_v39  ;;  %v556_v36 = vadd.f32 %v555_v13, %v6367_v7  ;;  %v6398_v62 = vunpack.c.h.bf16 %v368_v49  ;;  %2344 = vmatprep.subr.bf16.mxu0 %v5305_v29 }
  0xaf   : > { %v756_v45 = vadd.f32 %v755_v48, %v651_v42  ;;  %v6400_v38 = vunpack.c.l.bf16 %v369_v25  ;;  %2682 = vmatpush1.bf16.msra.mxu1 %v5304_v28  ;;  %551 = vadd.xlane.f32.xlu0 %v550_v32  ;;  %v658_v20 = vmul.f32 %v6367_v7, %v6367_v7  ;;  %v659_v46 = vmul.f32 %v6369_v15, %v6369_v15  ;;  %v5313_v42 = vld [vmem:[#allocation4 + $0x180] ss:$16 sps:$4 sm:$0xff]   ;;  %v5314_v32 = vld [vmem:[#allocation4 + $0x18c] ss:$16 sps:$4 sm:$0xff]  }
  0xb0   : > { %8126 = vst [vmem:[#allocation51_spill] sm:$0xff] %v6394_v50  ;;  %8127 = vst [vmem:[#allocation52_spill] sm:$0xff] %v6398_v62  ;;  %v762_v39 = vadd.f32 %v761_v18, %v656_v44  ;;  %v6406_v12 = vunpack.c.h.bf16 %v369_v25  ;;  %2683 = vmatprep.subr.bf16.mxu1 %v5308_v35  ;;  %v557_v49 = vadd.f32 %v556_v36, %v6369_v15  ;;  %v6412_v29 = vunpack.c.l.bf16 %v371_v34  ;;  %v5316_v44 = vld [vmem:[#allocation4 + $0x188] ss:$16 sps:$4 sm:$0xff]  }
  0xb1   : > { %8128 = vst [vmem:[#allocation53_spill] sm:$0xff] %v6400_v38  ;;  %v757_v13 = vadd.f32 %v756_v45, %v652_v55  ;;  %v560_v28 = vadd.f32 %v6398_v62, %v6394_v50  ;;  %v6414_v7 = vunpack.c.l.bf16 %v370_v1  ;;  %v6416_v37 = vunpack.c.h.bf16 %v371_v34  ;;  %2345 = vmatpush1.bf16.msra.mxu0 %v5307_v53  ;;  %v5319_v53 = vld [vmem:[#allocation4 + $0x1a0] ss:$16 sps:$4 sm:$0xff]  }
  0xb2   : > { %8129 = vst [vmem:[#allocation54_spill] sm:$0xff] %v6406_v12  ;;  %8130 = vst [vmem:[#allocation55_spill] sm:$0xff] %v6412_v29  ;;  %v763_v48 = vadd.f32 %v762_v39, %v657_v54  ;;  %v6418_v18 = vunpack.c.l.bf16 %v372_v14  ;;  %558 = vadd.xlane.f32.xlu1 %v557_v49  ;;  %v6420_v35 = vunpack.c.h.bf16 %v370_v1  ;;  %v6423_v45 = vunpack.c.h.bf16 %v372_v14  ;;  %v5317_v54 = vld [vmem:[#allocation4 + $0x1a4] ss:$16 sps:$4 sm:$0xff]   ;;  %2346 = vmatprep.subr.bf16.mxu0 %v5311_v33 }
  0xb3   : > { %8131 = vst [vmem:[#allocation56_spill] sm:$0xff] %v6414_v7  ;;  %8132 = vst [vmem:[#allocation57_spill] sm:$0xff] %v6416_v37  ;;  %v758_v25 = vadd.f32 %v757_v13, %v653_v26  ;;  %v561_v36 = vadd.f32 %v560_v28, %v6400_v38  ;;  %2684 = vmatpush1.bf16.msra.mxu1 %v5310_v43  ;;  %v567_v34 = vadd.f32 %v6416_v37, %v6412_v29  ;;  %v374_v1 = vld [vmem:[%s5990_s11 + $0x150] sm:$0xff]  ;;  %v375_v13 = vld [vmem:[%s5990_s11 + $0x158] sm:$0xff] }
  0xb4   : > { %8133 = vst [vmem:[#allocation58_spill] sm:$0xff] %v6418_v18  ;;  %8134 = vst [vmem:[#allocation59_spill] sm:$0xff] %v6420_v35  ;;  %v764_v55 = vadd.f32 %v763_v48, %v658_v20  ;;  %v660_v39 = vmul.f32 %v6394_v50, %v6394_v50  ;;  %v661_v26 = vmul.f32 %v6398_v62, %v6398_v62  ;;  %v6433_v49 = vunpack.c.l.bf16 %v373_v63  ;;  %v5320_v28 = vld [vmem:[#allocation4 + $0x1ac] ss:$16 sps:$4 sm:$0xff]   ;;  %v5323_v48 = vld [vmem:[#allocation4 + $0x1c4] ss:$16 sps:$4 sm:$0xff]  }
  0xb5   : > { %759 = vadd.xlane.f32.xlu0 %v758_v25  ;;  %v562_v14 = vadd.f32 %v561_v36, %v6406_v12  ;;  %v6435_v43 = vunpack.c.h.bf16 %v373_v63  ;;  %v662_v20 = vmul.f32 %v6400_v38, %v6400_v38  ;;  %v568_v50 = vadd.f32 %v567_v34, %v6418_v18  ;;  %2347 = vmatpush1.bf16.msra.mxu0 %v5313_v42 }
  0xb6   : > { %8135 = vst [vmem:[#allocation60_spill] sm:$0xff] %v6433_v49  ;;  %v765_v15 = vadd.f32 %v764_v55, %v659_v46  ;;  %v663_v33 = vmul.f32 %v6406_v12, %v6406_v12  ;;  %v768_v25 = vadd.f32 %v661_v26, %v660_v39  ;;  %v666_v36 = vmul.f32 %v6412_v29, %v6412_v29  ;;  %v377_v26 = vld [vmem:[%s5990_s11 + $0x168] sm:$0xff] }
  0xb7   : > { %v563_v63 = vadd.f32 %v562_v14, %v6414_v7  ;;  %v667_v38 = vmul.f32 %v6416_v37, %v6416_v37  ;;  %v668_v46 = vmul.f32 %v6418_v18, %v6418_v18  ;;  %2685 = vmatprep.subr.bf16.mxu1 %v5314_v32  ;;  %v569_v55 = vadd.f32 %v568_v50, %v6423_v45  ;;  %v378_v14 = vld [vmem:[%s5990_s11 + $0x170] sm:$0xff]  ;;  %v376_v18 = vld [vmem:[%s5990_s11 + $0x160] sm:$0xff]  ;;  %v5322_v50 = vld [vmem:[#allocation4 + $0x1a8] ss:$16 sps:$4 sm:$0xff]  }
  0xb8   : > { %766 = vadd.xlane.f32.xlu1 %v765_v15  ;;  %v664_v34 = vmul.f32 %v6414_v7, %v6414_v7  ;;  %v665_v42 = vmul.f32 %v6420_v35, %v6420_v35  ;;  %v769_v39 = vadd.f32 %v768_v25, %v662_v20  ;;  %v669_v37 = vmul.f32 %v6423_v45, %v6423_v45  ;;  %v5325_v15 = vld [vmem:[#allocation4 + $0x1c0] ss:$16 sps:$4 sm:$0xff]   ;;  %v5326_v7 = vld [vmem:[#allocation4 + $0x1cc] ss:$16 sps:$4 sm:$0xff]  }
  0xb9   : > { %v564_v29 = vadd.f32 %v563_v63, %v6420_v35  ;;  %v775_v12 = vadd.f32 %v667_v38, %v666_v36  ;;  %v6461_v32 = vunpack.c.l.bf16 %v374_v1  ;;  %2686 = vmatpush1.bf16.msra.mxu1 %v5316_v44  ;;  %2348 = vmatprep.subr.bf16.mxu0 %v5317_v54  ;;  %v570_v62 = vadd.f32 %v569_v55, %v6433_v49  ;;  %v379_v44 = vld [vmem:[%s5990_s11 + $0x178] sm:$0xff] }
  0xba   : > { %v770_v20 = vadd.f32 %v769_v39, %v663_v33  ;;  %v6464_v25 = vunpack.c.h.bf16 %v374_v1  ;;  %v6466_v21 = vunpack.c.l.bf16 %v375_v13  ;;  %2349 = vmatpush1.bf16.msra.mxu0 %v5319_v53  ;;  %2687 = vmatprep.subr.bf16.mxu1 %v5320_v28  ;;  %v670_v38 = vmul.f32 %v6433_v49, %v6433_v49  ;;  %v5328_v54 = vld [vmem:[#allocation4 + $0x1c8] ss:$16 sps:$4 sm:$0xff]   ;;  %v5329_v53 = vld [vmem:[#allocation4 + $0x1e4] ss:$16 sps:$4 sm:$0xff]  }
  0xbb   : > { %8136 = vst [vmem:[#allocation61_spill] sm:$0xff] %v6461_v32  ;;  %565 = vadd.xlane.f32.xlu0 %v564_v29  ;;  %v776_v63 = vadd.f32 %v775_v12, %v668_v46  ;;  %v6470_v36 = vunpack.c.h.bf16 %v375_v13  ;;  %2350 = vmatprep.subr.bf16.mxu0 %v5323_v48  ;;  %v571_v35 = vadd.f32 %v570_v62, %v6435_v43  ;;  %v6476_v33 = vunpack.c.l.bf16 %v377_v26 }
  0xbc   : > { %v771_v55 = vadd.f32 %v770_v20, %v664_v34  ;;  %v574_v1 = vadd.f32 %v6464_v25, %v6461_v32  ;;  %v671_v29 = vmul.f32 %v6435_v43, %v6435_v43  ;;  %v6480_v39 = vunpack.c.h.bf16 %v377_v26  ;;  %v5331_v34 = vld [vmem:[#allocation4 + $0x1e0] ss:$16 sps:$4 sm:$0xff]   ;;  %v5332_v20 = vld [vmem:[#allocation4 + $0x1ec] ss:$16 sps:$4 sm:$0xff]  }
  0xbd   : > { %8137 = vst [vmem:[#allocation62_spill] sm:$0xff] %v6476_v33  ;;  %v777_v28 = vadd.f32 %v776_v63, %v669_v37  ;;  %v6482_v12 = vunpack.c.l.bf16 %v378_v14  ;;  %2688 = vmatpush1.bf16.msra.mxu1 %v5322_v50  ;;  %572 = vadd.xlane.f32.xlu1 %v571_v35  ;;  %v6484_v48 = vunpack.c.l.bf16 %v376_v18  ;;  %v6487_v46 = vunpack.c.h.bf16 %v378_v14  ;;  %v5337_v50 = vld [vmem:[#allocation4 + $0x204] ss:$16 sps:$4 sm:$0xff]  }
  0xbe   : > { %v772_v13 = vadd.f32 %v771_v55, %v665_v42  ;;  %v575_v62 = vadd.f32 %v574_v1, %v6466_v21  ;;  %2351 = vmatpush1.bf16.msra.mxu0 %v5325_v15  ;;  %v581_v37 = vadd.f32 %v6480_v39, %v6476_v33  ;;  %v672_v26 = vmul.f32 %v6461_v32, %v6461_v32  ;;  %v5334_v42 = vld [vmem:[#allocation4 + $0x1e8] ss:$16 sps:$4 sm:$0xff]  }
  0xbf   : > { %v778_v49 = vadd.f32 %v777_v28, %v670_v38  ;;  %v673_v35 = vmul.f32 %v6464_v25, %v6464_v25  ;;  %2689 = vmatprep.subr.bf16.mxu1 %v5326_v7  ;;  %v6495_v63 = vunpack.c.h.bf16 %v376_v18  ;;  %v6498_v15 = vunpack.c.l.bf16 %v379_v44  ;;  %2352 = vmatprep.subr.bf16.mxu0 %v5329_v53 }
  0xc0   : > { %773 = vadd.xlane.f32.xlu0 %v772_v13  ;;  %v576_v14 = vadd.f32 %v575_v62, %v6470_v36  ;;  %v674_v38 = vmul.f32 %v6466_v21, %v6466_v21  ;;  %v582_v1 = vadd.f32 %v581_v37, %v6482_v12  ;;  %v675_v28 = vmul.f32 %v6470_v36, %v6470_v36 }
  0xc1   : > { %8138 = vst [vmem:[#allocation63_spill] sm:$0xff] %v6498_v15  ;;  %v779_v55 = vadd.f32 %v778_v49, %v671_v29  ;;  %v782_v32 = vadd.f32 %v673_v35, %v672_v26  ;;  %2690 = vmatpush1.bf16.msra.mxu1 %v5328_v54  ;;  %v678_v18 = vmul.f32 %v6476_v33, %v6476_v33  ;;  %v5340_v49 = vld [vmem:[#allocation4 + $0x20c] ss:$16 sps:$4 sm:$0xff]   ;;  %v6512_v29 = vunpack.c.h.bf16 %v379_v44 }
  0xc2   : > { %v577_v7 = vadd.f32 %v576_v14, %v6484_v48  ;;  %v679_v13 = vmul.f32 %v6480_v39, %v6480_v39  ;;  %v680_v62 = vmul.f32 %v6482_v12, %v6482_v12  ;;  %v583_v37 = vadd.f32 %v582_v1, %v6487_v46  ;;  %2353 = vmatpush1.bf16.msra.mxu0 %v5331_v34 }
  0xc3   : > { %780 = vadd.xlane.f32.xlu1 %v779_v55  ;;  %8139 = vst [vmem:[#allocation64_spill] sm:$0xff] %v6512_v29  ;;  %v676_v54 = vmul.f32 %v6484_v48, %v6484_v48  ;;  %v783_v26 = vadd.f32 %v782_v32, %v674_v38  ;;  %v681_v14 = vmul.f32 %v6487_v46, %v6487_v46 }
  0xc4   : > { %v578_v35 = vadd.f32 %v577_v7, %v6495_v63  ;;  %v789_v33 = vadd.f32 %v679_v13, %v678_v18  ;;  %2691 = vmatprep.subr.bf16.mxu1 %v5332_v20  ;;  %v584_v53 = vadd.f32 %v583_v37, %v6498_v15  ;;  %v677_v44 = vmul.f32 %v6495_v63, %v6495_v63 }
  0xc5   : > { %v784_v55 = vadd.f32 %v783_v26, %v675_v28  ;;  %2692 = vmatpush1.bf16.msra.mxu1 %v5334_v42  ;;  %2435 = vmatprep.subr.bf16.mxu0 %v5337_v50  ;;  %v682_v32 = vmul.f32 %v6498_v15, %v6498_v15  ;;  %v683_v34 = vmul.f32 %v6512_v29, %v6512_v29 }
  0xc6   : > { %579 = vadd.xlane.f32.xlu0 %v578_v35  ;;  %v790_v38 = vadd.f32 %v789_v33, %v680_v62  ;;  %2774 = vmatprep.subr.bf16.mxu1 %v5340_v49  ;;  %v585_v1 = vadd.f32 %v584_v53, %v6512_v29  ;;  %v5338_v29 = vld [vmem:[#allocation4 + $0x208] ss:$16 sps:$4 sm:$0xff]  }
  0xc7   : > { %v785_v7 = vadd.f32 %v784_v55, %v676_v54 }
  0xc8   : > { %v791_v20 = vadd.f32 %v790_v38, %v681_v14  ;;  %586 = vadd.xlane.f32.xlu1 %v585_v1 }
  0xc9   : > { %v786_v18 = vadd.f32 %v785_v7, %v677_v44 }
  0xca   : > { %v792_v13 = vadd.f32 %v791_v20, %v682_v32 }
  0xcb   : > { %787 = vadd.xlane.f32.xlu0 %v786_v18 }
  0xcc   : > { %v793_v28 = vadd.f32 %v792_v13, %v683_v34 }
  0xce   : > { %794 = vadd.xlane.f32.xlu1 %v793_v28 }
 0x106   : > { %v482_v42 = vpop.xlane.xlu0 %481 }
 0x107   : > { %v6528_v50 = vmul.f32 0.0013717421, %v482_v42 }
 0x108   : > { %v690_v37 = vpop.xlane.xlu1 %689 }
 0x109   : > { %v812_v26 = vmul.f32 0.0013717421, %v690_v37  ;;  %v828_v33 = vmul.f32 %v6528_v50, %v6528_v50 }
 0x10a   : > { %v489_v62 = vpop.xlane.xlu0 %488 }
 0x10b   : > { %v844_v49 = vsub.f32 %v812_v26, %v828_v33  ;;  %v6532_v54 = vmul.f32 0.0013717421, %v489_v62 }
 0x10c   : > { %v697_v35 = vpop.xlane.xlu1 %696 }
 0x10d   : > { %v860_v14 = vmax.f32 %v844_v49, 0.0  ;;  %v813_v53 = vmul.f32 0.0013717421, %v697_v35  ;;  %v829_v44 = vmul.f32 %v6532_v54, %v6532_v54  ;;  %v877_v49 = vsub.f32 %v6005_v4, %v6528_v50 }
 0x10e   : > { %v876_v35 = vsub.f32 %v6003_v3, %v6528_v50  ;;  %v882_v4 = vsub.f32 %v6015_v10, %v6532_v54  ;;  %v880_v3 = vsub.f32 %v6013_v9, %v6528_v50  ;;  %v886_v10 = vsub.f32 %v6039_v24, %v6532_v54 }
 0x10f   : > { %v972_v55 = vadd.f32 1e-05, %v860_v14  ;;  %v845_v32 = vsub.f32 %v813_v53, %v829_v44  ;;  %v496_v38 = vpop.xlane.xlu0 %495  ;;  %v879_v53 = vsub.f32 %v6009_v6, %v6528_v50  ;;  %v878_v44 = vsub.f32 %v6007_v5, %v6528_v50 }
 0x110   : > { %v6536_v1 = vmul.f32 0.0013717421, %v496_v38  ;;  %v885_v5 = vsub.f32 %v6037_v23, %v6532_v54 }
 0x111   : > { %5567 = vrsqrt.f32 %v972_v55  ;;  %v861_v7 = vmax.f32 %v845_v32, 0.0  ;;  %v503_v34 = vpop.xlane.xlu1 %502  ;;  %v881_v55 = vsub.f32 %v6028_v17, %v6528_v50  ;;  %v884_v17 = vsub.f32 %v6032_v19, %v6532_v54 }
 0x112   : > { %v830_v18 = vmul.f32 %v6536_v1, %v6536_v1  ;;  %v6540_v13 = vmul.f32 0.0013717421, %v503_v34 }
 0x113   : > { %v973_v20 = vadd.f32 1e-05, %v861_v7  ;;  %v883_v7 = vsub.f32 %v6017_v11, %v6532_v54  ;;  %v887_v11 = vsub.f32 %v6049_v31, %v6532_v54 }
 0x114   : > { %v704_v28 = vpop.xlane.xlu0 %703  ;;  %v831_v33 = vmul.f32 %v6540_v13, %v6540_v13 }
 0x115   : > { %5569 = vrsqrt.f32 %v973_v20  ;;  %v814_v42 = vmul.f32 0.0013717421, %v704_v28 }
 0x117   : > { %v846_v37 = vsub.f32 %v814_v42, %v830_v18  ;;  %v711_v26 = vpop.xlane.xlu1 %710 }
 0x118   : > { %v815_v62 = vmul.f32 0.0013717421, %v711_v26 }
 0x119   : > { %v862_v14 = vmax.f32 %v846_v37, 0.0  ;;  %v510_v38 = vpop.xlane.xlu0 %509 }
 0x11a   : > { %v847_v32 = vsub.f32 %v815_v62, %v831_v33  ;;  %v6560_v6 = vmul.f32 0.0013717421, %v510_v38 }
 0x11b   : > { %v5568_v34 = vpop.eup %5567  ;;  %v974_v20 = vadd.f32 1e-05, %v862_v14 }
 0x11c   : > { %v863_v18 = vmax.f32 %v847_v32, 0.0  ;;  %v1007_v28 = vmul.f32 %v5568_v34, %v879_v53  ;;  %v517_v9 = vpop.xlane.xlu1 %516  ;;  %v832_v37 = vmul.f32 %v6560_v6, %v6560_v6  ;;  %v1006_v26 = vmul.f32 %v5568_v34, %v878_v44 }
 0x11d   : > { %5571 = vrsqrt.f32 %v974_v20  ;;  %v6580_v54 = vmul.f32 0.0013717421, %v517_v9  ;;  %v1009_v62 = vmul.f32 %v5568_v34, %v881_v55  ;;  %v1008_v14 = vmul.f32 %v5568_v34, %v880_v3  ;;  %v5335_v9 = vld [vmem:[#allocation4 + $0x200] ss:$16 sps:$4 sm:$0xff]  }
 0x11e   : > { %v975_v19 = vadd.f32 1e-05, %v863_v18  ;;  %v893_v53 = vsub.f32 %v6090_v0, %v6536_v1  ;;  %v1005_v38 = vmul.f32 %v5568_v34, %v877_v49  ;;  %v1004_v18 = vmul.f32 %v5568_v34, %v876_v35  ;;  %v5343_v35 = vld [vmem:[#allocation4 + $0x224] ss:$16 sps:$4 sm:$0xff]  }
 0x11f   : > { %v5570_v24 = vpop.eup %5569  ;;  %v718_v33 = vpop.xlane.xlu0 %717  ;;  %v892_v44 = vsub.f32 %v6082_v58, %v6536_v1  ;;  %v895_v55 = vsub.f32 %v6085_v60, %v6540_v13  ;;  %v5341_v60 = vld [vmem:[#allocation4 + $0x220] ss:$16 sps:$4 sm:$0xff]  }
 0x120   : > { %5573 = vrsqrt.f32 %v975_v19  ;;  %v816_v32 = vmul.f32 0.0013717421, %v718_v33  ;;  %v1011_v20 = vmul.f32 %v5570_v24, %v883_v7  ;;  %v1010_v42 = vmul.f32 %v5570_v24, %v882_v4  ;;  %v5346_v4 = vld [vmem:[#allocation4 + $0x22c] ss:$16 sps:$4 sm:$0xff]   ;;  %v5359_v58 = vld [vmem:[#allocation4 + $0x280] ss:$16 sps:$4 sm:$0xff]  }
 0x121   : > { %v1013_v50 = vmul.f32 %v5570_v24, %v885_v5  ;;  %v1012_v3 = vmul.f32 %v5570_v24, %v884_v17  ;;  %v833_v19 = vmul.f32 %v6580_v54, %v6580_v54  ;;  %v1015_v33 = vmul.f32 %v5570_v24, %v887_v11 }
 0x122   : > { %v848_v31 = vsub.f32 %v816_v32, %v832_v37  ;;  %v725_v23 = vpop.xlane.xlu1 %724  ;;  %v1101_v15 = vpack.c.bf16 %v1011_v20, %v1005_v38  ;;  %v1100_v7 = vpack.c.bf16 %v1010_v42, %v1004_v18  ;;  %v1014_v32 = vmul.f32 %v5570_v24, %v886_v10 }
 0x123   : > { %v817_v49 = vmul.f32 0.0013717421, %v725_v23  ;;  %v6590_v34 = vpack.c.bf16 %v1013_v50, %v1007_v28  ;;  %v6592_v37 = vpack.c.bf16 %v1012_v3, %v1006_v26  ;;  %v894_v17 = vsub.f32 %v6080_v56, %v6540_v13  ;;  %v5352_v56 = vld [vmem:[#allocation4 + $0x24c] ss:$16 sps:$4 sm:$0xff]  }
 0x124   : > { %v864_v5 = vmax.f32 %v848_v31, 0.0  ;;  %2354 = vmatprep.mubr.bf16.mxu0 %v1101_v15  ;;  %2693 = vmatprep.mubr.bf16.mxu1 %v1101_v15  ;;  %v897_v42 = vsub.f32 %v6093_v2, %v6540_v13  ;;  %v5344_v15 = vld [vmem:[#allocation4 + $0x228] ss:$16 sps:$4 sm:$0xff]   ;;  %v6600_v23 = vpack.c.bf16 %v1015_v33, %v1009_v62  ;;  %v6602_v11 = vpack.c.bf16 %v1014_v32, %v1008_v14  ;;  %v5349_v31 = vld [vmem:[#allocation4 + $0x244] ss:$16 sps:$4 sm:$0xff]  }
 0x125   : > { %v849_v38 = vsub.f32 %v817_v49, %v833_v19  ;;  %v524_v20 = vpop.xlane.xlu0 %523  ;;  %2355 = vmatmul.mubr.bf16.vlgmr.msra.gmra.mrb[0].mxu0 %v1100_v7  ;;  %2694 = vmatmul.mubr.bf16.vlgmr.msra.gmra.mrb[0].mxu1 %v1100_v7  ;;  %v896_v2 = vsub.f32 %v6087_v61, %v6540_v13  ;;  %v899_v24 = vsub.f32 %v6108_v22, %v6540_v13  ;;  %v5355_v14 = vld [vmem:[#allocation4 + $0x264] ss:$16 sps:$4 sm:$0xff]  }
 0x126   : > { %v976_v28 = vadd.f32 1e-05, %v864_v5  ;;  %v6598_v50 = vmul.f32 0.0013717421, %v524_v20  ;;  %2436 = vmatpush1.bf16.msra.mxu0 %v5335_v9  ;;  %2775 = vmatpush1.bf16.msra.mxu1 %v5338_v29  ;;  %8140 = vst [vmem:[#allocation65_spill] sm:$0xff] %v6600_v23  ;;  %8141 = vst [vmem:[#allocation66_spill] sm:$0xff] %v6602_v11  ;;  %v898_v29 = vsub.f32 %v6103_v16, %v6540_v13 }
 0x127   : > { %v6604_v10 = vpop.eup %5571  ;;  %v865_v26 = vmax.f32 %v849_v38, 0.0  ;;  %2437 = vmatprep.subr.bf16.mxu0 %v5343_v35  ;;  %2776 = vmatprep.subr.bf16.mxu1 %v5346_v4  ;;  %v903_v9 = vsub.f32 %v6142_v8, %v6560_v6  ;;  %v5347_v4 = vld [vmem:[#allocation4 + $0x240] ss:$16 sps:$4 sm:$0xff]   ;;  %v5350_v5 = vld [vmem:[#allocation4 + $0x248] ss:$16 sps:$4 sm:$0xff]   ;;  %v8142_v32 = vsub.f32 %v6075_v52, %v6536_v1  ;;  %v8143_v20 = vsub.f32 %v6069_v47, %v6536_v1 }
 0x128   : > { %5575 = vrsqrt.f32 %v976_v28  ;;  %v531_v62 = vpop.xlane.xlu1 %530  ;;  %v834_v61 = vmul.f32 %v6598_v50, %v6598_v50  ;;  %v8145_v52 = vsub.f32 %v6060_v40, %v6536_v1  ;;  %v8146_v47 = vld [vmem:[#allocation9_spill] sm:$0xff]  ;;  %v8161_v8 = vsub.f32 %v6152_v27, %v6580_v54  ;;  %v5416_v23 = vld [vmem:[#allocation4 + $0x3a8] ss:$16 sps:$4 sm:$0xff]  }
 0x129   : > { %v977_v3 = vadd.f32 1e-05, %v865_v26  ;;  %v6624_v7 = vmul.f32 0.0013717421, %v531_v62  ;;  %v1019_v38 = vmul.f32 %v6604_v10, %v8142_v32  ;;  %v1018_v28 = vmul.f32 %v6604_v10, %v8143_v20  ;;  %v5367_v13 = vld [vmem:[#allocation4 + $0x2a4] ss:$16 sps:$4 sm:$0xff]  }
 0x12a   : > { %v5574_v49 = vpop.eup %5573  ;;  %v732_v35 = vpop.xlane.xlu0 %731  ;;  %2438 = vmatpush1.bf16.msra.mxu0 %v5341_v60  ;;  %2777 = vmatpush1.bf16.msra.mxu1 %v5344_v15  ;;  %v8144_v60 = vsub.f32 %v6062_v41, %v6536_v1  ;;  %v1016_v32 = vmul.f32 %v6604_v10, %v8145_v52  ;;  %v5358_v41 = vld [vmem:[#allocation4 + $0x26c] ss:$16 sps:$4 sm:$0xff]   ;;  %v5356_v52 = vld [vmem:[#allocation4 + $0x268] ss:$16 sps:$4 sm:$0xff]  }
 0x12b   : > { %5577 = vrsqrt.f32 %v977_v3  ;;  %v818_v26 = vmul.f32 0.0013717421, %v732_v35  ;;  %v1023_v62 = vmul.f32 %v5574_v49, %v895_v55  ;;  %2439 = vmatprep.subr.bf16.mxu0 %v5349_v31  ;;  %2778 = vmatprep.subr.bf16.mxu1 %v5352_v56  ;;  %v1022_v19 = vmul.f32 %v5574_v49, %v894_v17  ;;  %v8147_v55 = vld [vmem:[#allocation12_spill] sm:$0xff]  ;;  %v5353_v17 = vld [vmem:[#allocation4 + $0x260] ss:$16 sps:$4 sm:$0xff]  }
 0x12c   : > { %v1017_v15 = vmul.f32 %v6604_v10, %v8144_v60  ;;  %v1025_v20 = vmul.f32 %v5574_v49, %v897_v42  ;;  %v1024_v22 = vmul.f32 %v5574_v49, %v896_v2  ;;  %v909_v31 = vsub.f32 %v8147_v55, %v6580_v54  ;;  %v5362_v1 = vld [vmem:[#allocation4 + $0x288] ss:$16 sps:$4 sm:$0xff]  }
 0x12d   : > { %v850_v3 = vsub.f32 %v818_v26, %v834_v61  ;;  %v835_v56 = vmul.f32 %v6624_v7, %v6624_v7  ;;  %v1106_v60 = vpack.c.bf16 %v1022_v19, %v1016_v32  ;;  %v5361_v61 = vld [vmem:[#allocation4 + $0x284] ss:$16 sps:$4 sm:$0xff]   ;;  %v5364_v26 = vld [vmem:[#allocation4 + $0x28c] ss:$16 sps:$4 sm:$0xff]   ;;  %v1021_v19 = vmul.f32 %v6604_v10, %v893_v53 }
 0x12e   : > { %v739_v35 = vpop.xlane.xlu1 %738  ;;  %v1107_v33 = vpack.c.bf16 %v1023_v62, %v1017_v15  ;;  %2440 = vmatpush1.bf16.msra.mxu0 %v5347_v4  ;;  %2779 = vmatpush1.bf16.msra.mxu1 %v5350_v5  ;;  %v6650_v18 = vpack.c.bf16 %v1025_v20, %v1019_v38  ;;  %v6652_v2 = vpack.c.bf16 %v1024_v22, %v1018_v28  ;;  %v8148_v15 = vld [vmem:[#allocation11_spill] sm:$0xff]  ;;  %v8149_v53 = vld [vmem:[#allocation14_spill] sm:$0xff] }
 0x12f   : > { %v819_v40 = vmul.f32 0.0013717421, %v739_v35  ;;  %v866_v42 = vmax.f32 %v850_v3, 0.0  ;;  %v908_v62 = vsub.f32 %v8148_v15, %v6580_v54  ;;  %v1027_v38 = vmul.f32 %v5574_v49, %v899_v24  ;;  %2441 = vmatprep.subr.bf16.mxu0 %v5355_v14  ;;  %2780 = vmatprep.subr.bf16.mxu1 %v5358_v41  ;;  %v8152_v3 = vld [vmem:[#allocation13_spill] sm:$0xff]  ;;  %v8159_v41 = vld [vmem:[#allocation24_spill] sm:$0xff]  ;;  %v8165_v14 = vld [vmem:[#allocation22_spill] sm:$0xff] }
 0x130   : > { %2364 = vmatprep.mubr.bf16.mxu0 %v1107_v33  ;;  %2703 = vmatprep.mubr.bf16.mxu1 %v1107_v33  ;;  %v6664_v33 = vmul.f32 %v6604_v10, %v892_v44  ;;  %v1026_v0 = vmul.f32 %v5574_v49, %v898_v29  ;;  %v911_v32 = vsub.f32 %v8149_v53, %v6580_v54  ;;  %v8151_v10 = vld [vmem:[#allocation10_spill] sm:$0xff]  ;;  %v8153_v49 = vld [vmem:[#allocation16_spill] sm:$0xff]  ;;  %v8156_v15 = vld [vmem:[#allocation21_spill] sm:$0xff] }
 0x131   : > { %v851_v4 = vsub.f32 %v819_v40, %v835_v56  ;;  %v538_v5 = vpop.xlane.xlu0 %537  ;;  %2365 = vmatmul.mubr.bf16.gmra.mrb[4].mxu0 %v1106_v60  ;;  %2704 = vmatmul.mubr.bf16.gmra.mrb[4].mxu1 %v1106_v60  ;;  %v978_v22 = vadd.f32 1e-05, %v866_v42  ;;  %v6675_v44 = vpack.c.bf16 %v1027_v38, %v1021_v19  ;;  %v5370_v29 = vld [vmem:[#allocation4 + $0x2ac] ss:$16 sps:$4 sm:$0xff]   ;;  %v8154_v56 = vld [vmem:[#allocation15_spill] sm:$0xff] }
 0x132   : > { %v6666_v28 = vmul.f32 0.0013717421, %v538_v5  ;;  %v6673_v20 = vpop.eup %5575  ;;  %2442 = vmatpush1.bf16.msra.mxu0 %v5353_v17  ;;  %2781 = vmatpush1.bf16.msra.mxu1 %v5356_v52  ;;  %v8155_v60 = vld [vmem:[#allocation18_spill] sm:$0xff]  ;;  %v6733_v55 = vpack.c.bf16 %v1026_v0, %v6664_v33  ;;  %v8168_v0 = vsub.f32 %v8151_v10, %v6560_v6  ;;  %v5379_v53 = vld [vmem:[#allocation4 + $0x2e4] ss:$16 sps:$4 sm:$0xff]  }
 0x133   : > { %v867_v24 = vmax.f32 %v851_v4, 0.0  ;;  %8150 = vst [vmem:[#allocation9_spill] sm:$0xff] %v6675_v44  ;;  %5579 = vrsqrt.f32 %v978_v22  ;;  %2443 = vmatprep.subr.bf16.mxu0 %v5361_v61  ;;  %2782 = vmatprep.subr.bf16.mxu1 %v5364_v26  ;;  %v8157_v61 = vld [vmem:[#allocation19_spill] sm:$0xff]  ;;  %v1031_v22 = vmul.f32 %v6673_v20, %v903_v9  ;;  %v5374_v33 = vld [vmem:[#allocation4 + $0x2c8] ss:$16 sps:$4 sm:$0xff]  }
 0x134   : > { %v545_v16 = vpop.xlane.xlu1 %544  ;;  %v836_v42 = vmul.f32 %v6666_v28, %v6666_v28  ;;  %8166 = vst [vmem:[#allocation12_spill] sm:$0xff] %v6733_v55 }
 0x135   : > { %v979_v52 = vadd.f32 1e-05, %v867_v24  ;;  %v5578_v4 = vpop.eup %5577  ;;  %v6693_v5 = vmul.f32 0.0013717421, %v545_v16  ;;  %v8158_v24 = vsub.f32 %v6136_v59, %v6560_v6  ;;  %v8160_v16 = vsub.f32 %v6134_v57, %v6560_v6  ;;  %v8164_v57 = vld [vmem:[#allocation17_spill] sm:$0xff] }
 0x136   : > { %v746_v38 = vpop.xlane.xlu0 %745  ;;  %v1035_v35 = vmul.f32 %v5578_v4, %v8161_v8  ;;  %2444 = vmatpush1.bf16.msra.mxu0 %v5359_v58  ;;  %2783 = vmatpush1.bf16.msra.mxu1 %v5362_v1  ;;  %v8162_v59 = vsub.f32 %v6131_v51, %v6560_v6  ;;  %v5365_v8 = vld [vmem:[#allocation4 + $0x2a0] ss:$16 sps:$4 sm:$0xff]   ;;  %v5368_v58 = vld [vmem:[#allocation4 + $0x2a8] ss:$16 sps:$4 sm:$0xff]   ;;  %v1037_v51 = vmul.f32 %v5578_v4, %v909_v31 }
 0x137   : > { %v1030_v40 = vmul.f32 %v6673_v20, %v8158_v24  ;;  %5581 = vrsqrt.f32 %v979_v52  ;;  %v820_v17 = vmul.f32 0.0013717421, %v746_v38  ;;  %v1029_v26 = vmul.f32 %v6673_v20, %v8160_v16  ;;  %2445 = vmatprep.subr.bf16.mxu0 %v5367_v13  ;;  %2784 = vmatprep.subr.bf16.mxu1 %v5370_v29  ;;  %v5373_v13 = vld [vmem:[#allocation4 + $0x2c4] ss:$16 sps:$4 sm:$0xff]   ;;  %v5376_v29 = vld [vmem:[#allocation4 + $0x2cc] ss:$16 sps:$4 sm:$0xff]  }
 0x138   : > { %v1028_v9 = vmul.f32 %v6673_v20, %v8162_v59  ;;  %v8163_v52 = vsub.f32 %v8146_v47, %v6580_v54  ;;  %v914_v24 = vsub.f32 %v8164_v57, %v6598_v50  ;;  %v1036_v1 = vmul.f32 %v5578_v4, %v908_v62  ;;  %v5388_v57 = vld [vmem:[#allocation4 + $0x30c] ss:$16 sps:$4 sm:$0xff]  }
 0x139   : > { %v852_v16 = vsub.f32 %v820_v17, %v836_v42  ;;  %v753_v19 = vpop.xlane.xlu1 %752  ;;  %v1113_v27 = vpack.c.bf16 %v1035_v35, %v1029_v26  ;;  %v837_v59 = vmul.f32 %v6693_v5, %v6693_v5  ;;  %v6728_v35 = vpack.c.bf16 %v1037_v51, %v1031_v22 }
 0x13a   : > { %v1034_v38 = vmul.f32 %v5578_v4, %v8163_v52  ;;  %v821_v47 = vmul.f32 0.0013717421, %v753_v19  ;;  %v6730_v42 = vpack.c.bf16 %v1036_v1, %v1030_v40  ;;  %v5371_v19 = vld [vmem:[#allocation4 + $0x2c0] ss:$16 sps:$4 sm:$0xff]   ;;  %v8167_v26 = vsub.f32 %v6156_v30, %v6560_v6  ;;  %2446 = vmatpush1.bf16.msra.mxu0 %v5365_v8  ;;  %2785 = vmatpush1.bf16.msra.mxu1 %v5368_v58  ;;  %v8172_v6 = vld [vmem:[#allocation26_spill] sm:$0xff] }
 0x13b   : > { %v868_v17 = vmax.f32 %v852_v16, 0.0  ;;  %2374 = vmatprep.mubr.bf16.mxu0 %v1113_v27  ;;  %2713 = vmatprep.mubr.bf16.mxu1 %v1113_v27  ;;  %v1039_v22 = vmul.f32 %v5578_v4, %v911_v32  ;;  %v1032_v16 = vmul.f32 %v6673_v20, %v8168_v0  ;;  %v8169_v30 = vsub.f32 %v8152_v3, %v6580_v54  ;;  %v5382_v32 = vld [vmem:[#allocation4 + $0x2ec] ss:$16 sps:$4 sm:$0xff]   ;;  %v8171_v8 = vld [vmem:[#allocation23_spill] sm:$0xff] }
 0x13c   : > { %v1112_v52 = vpack.c.bf16 %v1034_v38, %v1028_v9  ;;  %v853_v31 = vsub.f32 %v821_v47, %v837_v59  ;;  %v552_v62 = vpop.xlane.xlu0 %551  ;;  %v1033_v9 = vmul.f32 %v6673_v20, %v8167_v26  ;;  %2447 = vmatprep.subr.bf16.mxu0 %v5373_v13  ;;  %2786 = vmatprep.subr.bf16.mxu1 %v5376_v29  ;;  %v8173_v54 = vld [vmem:[#allocation28_spill] sm:$0xff]  ;;  %v8177_v26 = vld [vmem:[#allocation29_spill] sm:$0xff] }
 0x13d   : > { %v980_v38 = vadd.f32 1e-05, %v868_v17  ;;  %v6742_v40 = vmul.f32 0.0013717421, %v552_v62  ;;  %v1038_v27 = vmul.f32 %v5578_v4, %v8169_v30  ;;  %v6751_v51 = vpop.eup %5579  ;;  %v917_v58 = vsub.f32 %v8171_v8, %v6598_v50  ;;  %v8174_v4 = vld [vmem:[#allocation27_spill] sm:$0xff] }
 0x13e   : > { %2375 = vmatmul.mubr.bf16.gmra.mrb[8].mxu0 %v1112_v52  ;;  %2714 = vmatmul.mubr.bf16.gmra.mrb[8].mxu1 %v1112_v52  ;;  %v869_v1 = vmax.f32 %v853_v31, 0.0  ;;  %v6753_v59 = vpack.c.bf16 %v1039_v22, %v1033_v9  ;;  %v923_v10 = vsub.f32 %v8172_v6, %v6624_v7  ;;  %v8175_v52 = vld [vmem:[#allocation20_spill] sm:$0xff]  ;;  %v8176_v31 = vld [vmem:[#allocation30_spill] sm:$0xff]  ;;  %v5377_v30 = vld [vmem:[#allocation4 + $0x2e0] ss:$16 sps:$4 sm:$0xff]   ;;  %v1042_v3 = vmul.f32 %v6751_v51, %v914_v24 }
 0x13f   : > { %5583 = vrsqrt.f32 %v980_v38  ;;  %v559_v20 = vpop.xlane.xlu1 %558  ;;  %v916_v13 = vsub.f32 %v8175_v52, %v6598_v50  ;;  %v838_v17 = vmul.f32 %v6742_v40, %v6742_v40  ;;  %2448 = vmatpush1.bf16.msra.mxu0 %v5371_v19  ;;  %2787 = vmatpush1.bf16.msra.mxu1 %v5374_v33  ;;  %v5380_v8 = vld [vmem:[#allocation4 + $0x2e8] ss:$16 sps:$4 sm:$0xff]   ;;  %v8178_v6 = vld [vmem:[#allocation33_spill] sm:$0xff]  ;;  %v8179_v52 = vsub.f32 %v8155_v60, %v6598_v50 }
 0x140   : > { %8170 = vst [vmem:[#allocation11_spill] sm:$0xff] %v6753_v59  ;;  %v981_v29 = vadd.f32 1e-05, %v869_v1  ;;  %v6771_v38 = vmul.f32 0.0013717421, %v559_v20  ;;  %v8180_v20 = vsub.f32 %v8153_v49, %v6598_v50  ;;  %v8181_v33 = vsub.f32 %v8156_v15, %v6624_v7  ;;  %2449 = vmatprep.subr.bf16.mxu0 %v5379_v53  ;;  %2788 = vmatprep.subr.bf16.mxu1 %v5382_v32 }
 0x141   : > { %v5582_v22 = vpop.eup %5581  ;;  %v1043_v47 = vmul.f32 %v6751_v51, %v8179_v52  ;;  %v8182_v60 = vsub.f32 %v8154_v56, %v6598_v50  ;;  %v8183_v24 = vsub.f32 %v8157_v61, %v6624_v7  ;;  %v5385_v32 = vld [vmem:[#allocation4 + $0x304] ss:$16 sps:$4 sm:$0xff]   ;;  %v8186_v50 = vsub.f32 %v8165_v14, %v6624_v7  ;;  %v5394_v14 = vld [vmem:[#allocation4 + $0x32c] ss:$16 sps:$4 sm:$0xff]  }
 0x142   : > { %v760_v0 = vpop.xlane.xlu0 %759  ;;  %5585 = vrsqrt.f32 %v981_v29  ;;  %v1041_v19 = vmul.f32 %v6751_v51, %v8180_v20  ;;  %v1047_v62 = vmul.f32 %v5582_v22, %v8181_v33  ;;  %v8185_v20 = vsub.f32 %v8159_v41, %v6624_v7  ;;  %v5383_v41 = vld [vmem:[#allocation4 + $0x300] ss:$16 sps:$4 sm:$0xff]  }
 0x143   : > { %v822_v9 = vmul.f32 0.0013717421, %v760_v0  ;;  %v1040_v52 = vmul.f32 %v6751_v51, %v8182_v60  ;;  %v1046_v29 = vmul.f32 %v5582_v22, %v8183_v24  ;;  %v8184_v0 = vld [vmem:[#allocation31_spill] sm:$0xff]  ;;  %v1048_v56 = vmul.f32 %v5582_v22, %v8186_v50  ;;  %v8187_v60 = vld [vmem:[#allocation36_spill] sm:$0xff]  ;;  %2450 = vmatpush1.bf16.msra.mxu0 %v5377_v30  ;;  %2789 = vmatpush1.bf16.msra.mxu1 %v5380_v8  ;;  %v8189_v61 = vld [vmem:[#allocation25_spill] sm:$0xff] }
 0x144   : > { %v1049_v1 = vmul.f32 %v5582_v22, %v8185_v20  ;;  %v1119_v53 = vpack.c.bf16 %v1047_v62, %v1041_v19  ;;  %v839_v24 = vmul.f32 %v6771_v38, %v6771_v38  ;;  %v5391_v19 = vld [vmem:[#allocation4 + $0x324] ss:$16 sps:$4 sm:$0xff]   ;;  %v6810_v50 = vpack.c.bf16 %v1038_v27, %v1032_v16  ;;  %2451 = vmatprep.subr.bf16.mxu0 %v5385_v32  ;;  %v8200_v32 = vld [vmem:[#allocation48_spill] sm:$0xff] }
 0x145   : > { %v854_v15 = vsub.f32 %v822_v9, %v838_v17  ;;  %v767_v33 = vpop.xlane.xlu1 %766  ;;  %v1118_v59 = vpack.c.bf16 %v1046_v29, %v1040_v52  ;;  %v5386_v17 = vld [vmem:[#allocation4 + $0x308] ss:$16 sps:$4 sm:$0xff]   ;;  %v6808_v20 = vpack.c.bf16 %v1048_v56, %v1042_v3  ;;  %v922_v55 = vsub.f32 %v8189_v61, %v6624_v7  ;;  %2790 = vmatprep.subr.bf16.mxu1 %v5388_v57  ;;  %v5389_v7 = vld [vmem:[#allocation4 + $0x320] ss:$16 sps:$4 sm:$0xff]   ;;  %v5400_v56 = vld [vmem:[#allocation4 + $0x34c] ss:$16 sps:$4 sm:$0xff]  }
 0x146   : > { %v823_v49 = vmul.f32 0.0013717421, %v767_v33  ;;  %v6806_v9 = vpack.c.bf16 %v1049_v1, %v1043_v47  ;;  %2384 = vmatprep.mubr.bf16.mxu0 %v1119_v53  ;;  %2723 = vmatprep.mubr.bf16.mxu1 %v1119_v53  ;;  %8188 = vst [vmem:[#allocation14_spill] sm:$0xff] %v6810_v50  ;;  %v1045_v30 = vmul.f32 %v6751_v51, %v917_v58  ;;  %v8195_v61 = vld [vmem:[#allocation42_spill] sm:$0xff] }
 0x147   : > { %v870_v62 = vmax.f32 %v854_v15, 0.0  ;;  %2385 = vmatmul.mubr.bf16.gmra.mrb[12].mxu0 %v1118_v59  ;;  %2724 = vmatmul.mubr.bf16.gmra.mrb[12].mxu1 %v1118_v59  ;;  %v1051_v47 = vmul.f32 %v5582_v22, %v923_v10  ;;  %v1044_v3 = vmul.f32 %v6751_v51, %v916_v13  ;;  %v1050_v29 = vmul.f32 %v5582_v22, %v922_v55  ;;  %v8190_v59 = vld [vmem:[#allocation34_spill] sm:$0xff]  ;;  %v8192_v10 = vld [vmem:[#allocation35_spill] sm:$0xff]  ;;  %v8193_v55 = vld [vmem:[#allocation40_spill] sm:$0xff] }
 0x148   : > { %v855_v33 = vsub.f32 %v823_v49, %v839_v24  ;;  %v566_v52 = vpop.xlane.xlu0 %565  ;;  %2452 = vmatpush1.bf16.msra.mxu0 %v5383_v41  ;;  %2791 = vmatpush1.bf16.msra.mxu1 %v5386_v17  ;;  %v5392_v49 = vld [vmem:[#allocation4 + $0x328] ss:$16 sps:$4 sm:$0xff]   ;;  %v932_v15 = vsub.f32 %v8190_v59, %v6693_v5  ;;  %v929_v53 = vsub.f32 %v8192_v10, %v6666_v28  ;;  %v5397_v13 = vld [vmem:[#allocation4 + $0x344] ss:$16 sps:$4 sm:$0xff]  }
 0x149   : > { %v982_v8 = vadd.f32 1e-05, %v870_v62  ;;  %v6815_v1 = vmul.f32 0.0013717421, %v566_v52  ;;  %v6818_v16 = vpop.eup %5583  ;;  %v6822_v58 = vpack.c.bf16 %v1051_v47, %v1045_v30  ;;  %2453 = vmatprep.subr.bf16.mxu0 %v5391_v19  ;;  %2792 = vmatprep.subr.bf16.mxu1 %v5394_v14  ;;  %v8194_v22 = vld [vmem:[#allocation39_spill] sm:$0xff]  ;;  %v8196_v62 = vld [vmem:[#allocation45_spill] sm:$0xff] }
 0x14a   : > { %v871_v27 = vmax.f32 %v855_v33, 0.0  ;;  %v573_v57 = vpop.xlane.xlu1 %572  ;;  %v8197_v19 = vld [vmem:[#allocation43_spill] sm:$0xff] }
 0x14b   : > { %8191 = vst [vmem:[#allocation10_spill] sm:$0xff] %v6822_v58  ;;  %5587 = vrsqrt.f32 %v982_v8  ;;  %v840_v17 = vmul.f32 %v6815_v1, %v6815_v1  ;;  %v6840_v30 = vmul.f32 0.0013717421, %v573_v57  ;;  %v8198_v8 = vsub.f32 %v8176_v31, %v6666_v28  ;;  %v5406_v58 = vld [vmem:[#allocation4 + $0x36c] ss:$16 sps:$4 sm:$0xff]  }
 0x14c   : > { %v983_v41 = vadd.f32 1e-05, %v871_v27  ;;  %v6838_v52 = vpop.eup %5585  ;;  %v8199_v27 = vsub.f32 %v8177_v26, %v6666_v28  ;;  %v8201_v57 = vsub.f32 %v8173_v54, %v6666_v28  ;;  %v8202_v31 = vsub.f32 %v8178_v6, %v6693_v5  ;;  %2454 = vmatpush1.bf16.msra.mxu0 %v5389_v7  ;;  %2793 = vmatpush1.bf16.msra.mxu1 %v5392_v49  ;;  %v8205_v54 = vld [vmem:[#allocation38_spill] sm:$0xff]  ;;  %v5395_v7 = vld [vmem:[#allocation4 + $0x340] ss:$16 sps:$4 sm:$0xff]  }
 0x14d   : > { %v774_v47 = vpop.xlane.xlu0 %773  ;;  %v1055_v59 = vmul.f32 %v6818_v16, %v8198_v8  ;;  %v8203_v26 = vsub.f32 %v8174_v4, %v6666_v28  ;;  %2455 = vmatprep.subr.bf16.mxu0 %v5397_v13  ;;  %2794 = vmatprep.subr.bf16.mxu1 %v5400_v56  ;;  %v5398_v49 = vld [vmem:[#allocation4 + $0x348] ss:$16 sps:$4 sm:$0xff]   ;;  %v8206_v4 = vsub.f32 %v8187_v60, %v6693_v5 }
 0x14e   : > { %v1054_v10 = vmul.f32 %v6818_v16, %v8199_v27  ;;  %5589 = vrsqrt.f32 %v983_v41  ;;  %v824_v14 = vmul.f32 0.0013717421, %v774_v47  ;;  %v1053_v51 = vmul.f32 %v6818_v16, %v8201_v57 }
 0x14f   : > { %v1059_v8 = vmul.f32 %v6838_v52, %v8202_v31  ;;  %v1052_v27 = vmul.f32 %v6818_v16, %v8203_v26  ;;  %v8204_v41 = vsub.f32 %v8184_v0, %v6693_v5  ;;  %v935_v57 = vsub.f32 %v8205_v54, %v6693_v5 }
 0x150   : > { %v856_v6 = vsub.f32 %v824_v14, %v840_v17  ;;  %v781_v33 = vpop.xlane.xlu1 %780  ;;  %v1061_v26 = vmul.f32 %v6838_v52, %v8206_v4  ;;  %v1060_v24 = vmul.f32 %v6838_v52, %v932_v15  ;;  %v841_v0 = vmul.f32 %v6840_v30, %v6840_v30  ;;  %v8207_v17 = vld [vmem:[#allocation32_spill] sm:$0xff]  ;;  %2456 = vmatpush1.bf16.msra.mxu0 %v5395_v7  ;;  %v8211_v7 = vld [vmem:[#allocation46_spill] sm:$0xff] }
 0x151   : > { %v1058_v47 = vmul.f32 %v6838_v52, %v8204_v41  ;;  %v1125_v31 = vpack.c.bf16 %v1059_v8, %v1053_v51  ;;  %v825_v13 = vmul.f32 0.0013717421, %v781_v33  ;;  %v5403_v41 = vld [vmem:[#allocation4 + $0x364] ss:$16 sps:$4 sm:$0xff]   ;;  %v928_v14 = vsub.f32 %v8207_v17, %v6666_v28  ;;  %v5401_v33 = vld [vmem:[#allocation4 + $0x360] ss:$16 sps:$4 sm:$0xff]   ;;  %2795 = vmatpush1.bf16.msra.mxu1 %v5398_v49 }
 0x152   : > { %v872_v51 = vmax.f32 %v856_v6, 0.0  ;;  %v6879_v8 = vpack.c.bf16 %v1061_v26, %v1055_v59  ;;  %v6881_v60 = vpack.c.bf16 %v1060_v24, %v1054_v10  ;;  %v6883_v54 = vpack.c.bf16 %v1050_v29, %v1044_v3  ;;  %v5404_v59 = vld [vmem:[#allocation4 + $0x368] ss:$16 sps:$4 sm:$0xff]   ;;  %v8209_v24 = vld [vmem:[#allocation41_spill] sm:$0xff]  ;;  %2457 = vmatprep.subr.bf16.mxu0 %v5403_v41  ;;  %2796 = vmatprep.subr.bf16.mxu1 %v5406_v58  ;;  %v5412_v26 = vld [vmem:[#allocation4 + $0x38c] ss:$16 sps:$4 sm:$0xff]  }
 0x153   : > { %v1124_v56 = vpack.c.bf16 %v1058_v47, %v1052_v27  ;;  %2394 = vmatprep.mubr.bf16.mxu0 %v1125_v31  ;;  %2733 = vmatprep.mubr.bf16.mxu1 %v1125_v31  ;;  %v857_v15 = vsub.f32 %v825_v13, %v841_v0  ;;  %v580_v4 = vpop.xlane.xlu0 %579  ;;  %v1057_v27 = vmul.f32 %v6818_v16, %v929_v53  ;;  %v8210_v53 = vld [vmem:[#allocation52_spill] sm:$0xff]  ;;  %v5409_v31 = vld [vmem:[#allocation4 + $0x384] ss:$16 sps:$4 sm:$0xff]   ;;  %v8214_v17 = vld [vmem:[#allocation54_spill] sm:$0xff] }
 0x154   : > { %8208 = vst [vmem:[#allocation13_spill] sm:$0xff] %v6883_v54  ;;  %v1063_v47 = vmul.f32 %v6838_v52, %v935_v57  ;;  %v984_v50 = vadd.f32 1e-05, %v872_v51  ;;  %v6887_v28 = vmul.f32 0.0013717421, %v580_v4  ;;  %v938_v10 = vsub.f32 %v8209_v24, %v6742_v40  ;;  %v8215_v58 = vld [vmem:[#allocation53_spill] sm:$0xff]  ;;  %2458 = vmatpush1.bf16.msra.mxu0 %v5401_v33 }
 0x155   : > { %2395 = vmatmul.mubr.bf16.gmra.mrb[16].mxu0 %v1124_v56  ;;  %2734 = vmatmul.mubr.bf16.gmra.mrb[16].mxu1 %v1124_v56  ;;  %v6892_v3 = vmul.f32 %v6818_v16, %v928_v14  ;;  %v6894_v29 = vpop.eup %5587  ;;  %v873_v6 = vmax.f32 %v857_v15, 0.0  ;;  %v944_v49 = vsub.f32 %v8211_v7, %v6771_v38  ;;  %v587_v13 = vpop.xlane.xlu1 %586  ;;  %v8213_v16 = vld [vmem:[#allocation51_spill] sm:$0xff]  ;;  %v8216_v4 = vld [vmem:[#allocation57_spill] sm:$0xff]  ;;  %v5410_v57 = vld [vmem:[#allocation4 + $0x388] ss:$16 sps:$4 sm:$0xff]  }
 0x156   : > { %v6900_v0 = vpack.c.bf16 %v1063_v47, %v1057_v27  ;;  %5591 = vrsqrt.f32 %v984_v50  ;;  %v842_v15 = vmul.f32 %v6887_v28, %v6887_v28  ;;  %v8217_v27 = vld [vmem:[#allocation55_spill] sm:$0xff]  ;;  %v6916_v7 = vmul.f32 0.0013717421, %v587_v13  ;;  %2797 = vmatpush1.bf16.msra.mxu1 %v5404_v59  ;;  %v8219_v24 = vld [vmem:[#allocation37_spill] sm:$0xff]  ;;  %2459 = vmatprep.subr.bf16.mxu0 %v5409_v31 }
 0x157   : > { %v985_v51 = vadd.f32 1e-05, %v873_v6  ;;  %v5407_v14 = vld [vmem:[#allocation4 + $0x380] ss:$16 sps:$4 sm:$0xff]   ;;  %v8218_v6 = vsub.f32 %v8195_v61, %v6742_v40  ;;  %v934_v54 = vsub.f32 %v8219_v24, %v6693_v5  ;;  %v8220_v13 = vsub.f32 %v8193_v55, %v6742_v40  ;;  %2798 = vmatprep.subr.bf16.mxu1 %v5412_v26 }
 0x158   : > { %8212 = vst [vmem:[#allocation16_spill] sm:$0xff] %v6900_v0  ;;  %v6914_v47 = vpop.eup %5589  ;;  %v788_v56 = vpop.xlane.xlu0 %787  ;;  %v1066_v0 = vmul.f32 %v6894_v29, %v938_v10  ;;  %v8221_v59 = vsub.f32 %v8196_v62, %v6771_v38  ;;  %v8222_v61 = vsub.f32 %v8194_v22, %v6742_v40  ;;  %v8223_v5 = vsub.f32 %v8197_v19, %v6771_v38  ;;  %v8225_v62 = vld [vmem:[#allocation47_spill] sm:$0xff]  ;;  %v5418_v22 = vld [vmem:[#allocation4 + $0x3ac] ss:$16 sps:$4 sm:$0xff]  }
 0x159   : > { %v1067_v41 = vmul.f32 %v6894_v29, %v8218_v6  ;;  %5593 = vrsqrt.f32 %v985_v51  ;;  %v826_v50 = vmul.f32 0.0013717421, %v788_v56  ;;  %v1065_v33 = vmul.f32 %v6894_v29, %v8220_v13  ;;  %v5415_v13 = vld [vmem:[#allocation4 + $0x3a4] ss:$16 sps:$4 sm:$0xff]   ;;  %2460 = vmatpush1.bf16.msra.mxu0 %v5407_v14 }
 0x15a   : > { %v1071_v44 = vmul.f32 %v6914_v47, %v8221_v59  ;;  %v1064_v10 = vmul.f32 %v6894_v29, %v8222_v61  ;;  %v1070_v56 = vmul.f32 %v6914_v47, %v8223_v5  ;;  %v8224_v55 = vsub.f32 %v8200_v32, %v6771_v38  ;;  %v8226_v61 = vld [vmem:[#allocation50_spill] sm:$0xff]  ;;  %2799 = vmatpush1.bf16.msra.mxu1 %v5410_v57 }
 0x15b   : > { %v941_v24 = vsub.f32 %v8225_v62, %v6742_v40  ;;  %v858_v31 = vsub.f32 %v826_v50, %v842_v15  ;;  %v795_v26 = vpop.xlane.xlu1 %794  ;;  %v1072_v59 = vmul.f32 %v6914_v47, %v944_v49  ;;  %v947_v19 = vsub.f32 %v8226_v61, %v6771_v38  ;;  %v5424_v50 = vld [vmem:[#allocation4 + $0x3cc] ss:$16 sps:$4 sm:$0xff]   ;;  %2461 = vmatprep.subr.bf16.mxu0 %v5415_v13 }
 0x15c   : > { %v1073_v51 = vmul.f32 %v6914_v47, %v8224_v55  ;;  %v1131_v6 = vpack.c.bf16 %v1071_v44, %v1065_v33  ;;  %v843_v5 = vmul.f32 %v6916_v7, %v6916_v7  ;;  %v827_v11 = vmul.f32 0.0013717421, %v795_v26  ;;  %v5413_v55 = vld [vmem:[#allocation4 + $0x3a0] ss:$16 sps:$4 sm:$0xff]   ;;  %v5421_v44 = vld [vmem:[#allocation4 + $0x3c4] ss:$16 sps:$4 sm:$0xff]   ;;  %2800 = vmatprep.subr.bf16.mxu1 %v5418_v22 }
 0x15d   : > { %v1130_v32 = vpack.c.bf16 %v1070_v56, %v1064_v10  ;;  %v874_v15 = vmax.f32 %v858_v31, 0.0  ;;  %v6954_v49 = vpack.c.bf16 %v1072_v59, %v1066_v0  ;;  %v957_v33 = vsub.f32 %v6423_v45, %v6840_v30  ;;  %v8227_v10 = vld [vmem:[#allocation58_spill] sm:$0xff]  ;;  %v8228_v45 = vld [vmem:[#allocation44_spill] sm:$0xff]  ;;  %2462 = vmatpush1.bf16.msra.mxu0 %v5413_v55  ;;  %v8230_v22 = vld [vmem:[#allocation59_spill] sm:$0xff] }
 0x15e   : > { %v6952_v62 = vpack.c.bf16 %v1073_v51, %v1067_v41  ;;  %2404 = vmatprep.mubr.bf16.mxu0 %v1131_v6  ;;  %2743 = vmatprep.mubr.bf16.mxu1 %v1131_v6  ;;  %v1062_v61 = vmul.f32 %v6838_v52, %v934_v54  ;;  %v859_v26 = vsub.f32 %v827_v11, %v843_v5  ;;  %v5419_v54 = vld [vmem:[#allocation4 + $0x3c0] ss:$16 sps:$4 sm:$0xff]   ;;  %v5430_v5 = vld [vmem:[#allocation4 + $0x3ec] ss:$16 sps:$4 sm:$0xff]  }
 0x15f   : > { %2405 = vmatmul.mubr.bf16.gmra.mrb[20].mxu0 %v1130_v32  ;;  %2744 = vmatmul.mubr.bf16.gmra.mrb[20].mxu1 %v1130_v32  ;;  %v1069_v57 = vmul.f32 %v6894_v29, %v941_v24  ;;  %v1075_v14 = vmul.f32 %v6914_v47, %v947_v19  ;;  %v986_v41 = vadd.f32 1e-05, %v874_v15  ;;  %v956_v56 = vsub.f32 %v8227_v10, %v6840_v30  ;;  %v5422_v24 = vld [vmem:[#allocation4 + $0x3c8] ss:$16 sps:$4 sm:$0xff]   ;;  %v8229_v6 = vld [vmem:[#allocation49_spill] sm:$0xff] }
 0x160   : > { %v6964_v0 = vpack.c.bf16 %v1062_v61, %v6892_v3  ;;  %v940_v51 = vsub.f32 %v8228_v45, %v6742_v40  ;;  %v5592_v52 = vpop.eup %5591  ;;  %v875_v11 = vmax.f32 %v859_v26, 0.0  ;;  %2801 = vmatpush1.bf16.msra.mxu1 %v5416_v23  ;;  %v946_v13 = vsub.f32 %v8229_v6, %v6771_v38  ;;  %2463 = vmatprep.subr.bf16.mxu0 %v5421_v44  ;;  %v5427_v40 = vld [vmem:[#allocation4 + $0x3e4] ss:$16 sps:$4 sm:$0xff]  }
 0x161   : > { %v6968_v31 = vpack.c.bf16 %v1075_v14, %v1069_v57  ;;  %v953_v59 = vsub.f32 %v8230_v22, %v6815_v1  ;;  %5595 = vrsqrt.f32 %v986_v41  ;;  %v8231_v3 = vsub.f32 %v8210_v53, %v6815_v1  ;;  %2802 = vmatprep.subr.bf16.mxu1 %v5424_v50  ;;  %2464 = vmatpush1.bf16.msra.mxu0 %v5419_v54  ;;  %v5425_v22 = vld [vmem:[#allocation4 + $0x3e0] ss:$16 sps:$4 sm:$0xff]  }
 0x162   : > { %v8232_v23 = vsub.f32 %v8214_v17, %v6815_v1  ;;  %v959_v55 = vsub.f32 %v6435_v43, %v6840_v30  ;;  %v987_v38 = vadd.f32 1e-05, %v875_v11  ;;  %v8233_v15 = vsub.f32 %v8215_v58, %v6815_v1  ;;  %v8235_v17 = vld [vmem:[#allocation56_spill] sm:$0xff]  ;;  %2465 = vmatprep.subr.bf16.mxu0 %v5427_v40  ;;  %v8239_v40 = vld [vmem:[#allocation61_spill] sm:$0xff] }
 0x163   : > { %v1077_v19 = vmul.f32 %v5592_v52, %v8231_v3  ;;  %v1068_v26 = vmul.f32 %v6894_v29, %v940_v51  ;;  %v1074_v53 = vmul.f32 %v6914_v47, %v946_v13  ;;  %v5594_v44 = vpop.eup %5593  ;;  %v8234_v50 = vsub.f32 %v8213_v16, %v6815_v1  ;;  %v8236_v43 = vld [vmem:[#allocation60_spill] sm:$0xff] }
 0x164   : > { %v1079_v32 = vmul.f32 %v5592_v52, %v8232_v23  ;;  %v1078_v61 = vmul.f32 %v5592_v52, %v8233_v15  ;;  %v1081_v14 = vmul.f32 %v5592_v52, %v953_v59  ;;  %v952_v41 = vsub.f32 %v8235_v17, %v6815_v1  ;;  %2803 = vmatpush1.bf16.msra.mxu1 %v5422_v24  ;;  %v5428_v59 = vld [vmem:[#allocation4 + $0x3e8] ss:$16 sps:$4 sm:$0xff]   ;;  %v5433_v23 = vld [vmem:[#allocation4 + $0x404] ss:$16 sps:$4 sm:$0xff]  }
 0x165   : > { %v1076_v57 = vmul.f32 %v5592_v52, %v8234_v50  ;;  %v958_v10 = vsub.f32 %v8236_v43, %v6840_v30  ;;  %5597 = vrsqrt.f32 %v987_v38  ;;  %v8237_v58 = vsub.f32 %v8216_v4, %v6840_v30  ;;  %2804 = vmatprep.subr.bf16.mxu1 %v5430_v5  ;;  %v5436_v38 = vld [vmem:[#allocation4 + $0x40c] ss:$16 sps:$4 sm:$0xff]   ;;  %2466 = vmatpush1.bf16.msra.mxu0 %v5425_v22 }
 0x166   : > { %v8238_v29 = vsub.f32 %v8217_v27, %v6840_v30  ;;  %v1085_v16 = vmul.f32 %v5594_v44, %v957_v33  ;;  %v1084_v51 = vmul.f32 %v5594_v44, %v956_v56  ;;  %v7000_v11 = vpack.c.bf16 %v1074_v53, %v1068_v26  ;;  %2548 = vmatprep.subr.bf16.mxu0 %v5433_v23  ;;  %v5442_v22 = vld [vmem:[#allocation4 + $0x42c] ss:$16 sps:$4 sm:$0xff]   ;;  %v5445_v23 = vld [vmem:[#allocation4 + $0x444] ss:$16 sps:$4 sm:$0xff]  }
 0x167   : > { %v1083_v45 = vmul.f32 %v5594_v44, %v8237_v58  ;;  %v1087_v1 = vmul.f32 %v5594_v44, %v959_v55  ;;  %v1080_v4 = vmul.f32 %v5592_v52, %v952_v41  ;;  %v1086_v33 = vmul.f32 %v5594_v44, %v958_v10 }
 0x168   : > { %v1082_v47 = vmul.f32 %v5594_v44, %v8238_v29  ;;  %v7002_v3 = vpack.c.bf16 %v1085_v16, %v1079_v32  ;;  %v7004_v30 = vpack.c.bf16 %v1084_v51, %v1078_v61  ;;  %v961_v54 = vsub.f32 %v6464_v25, %v6887_v28  ;;  %2805 = vmatpush1.bf16.msra.mxu1 %v5428_v59  ;;  %v5437_v59 = vld [vmem:[#allocation4 + $0x420] ss:$16 sps:$4 sm:$0xff]  }
 0x169   : > { %v1137_v6 = vpack.c.bf16 %v1083_v45, %v1077_v19  ;;  %v7006_v27 = vpack.c.bf16 %v1087_v1, %v1081_v14  ;;  %v7008_v56 = vpack.c.bf16 %v1086_v33, %v1080_v4  ;;  %v963_v52 = vsub.f32 %v6470_v36, %v6887_v28  ;;  %2887 = vmatprep.subr.bf16.mxu1 %v5436_v38  ;;  %v8240_v36 = vld [vmem:[#allocation62_spill] sm:$0xff]  ;;  %v5443_v38 = vld [vmem:[#allocation4 + $0x440] ss:$16 sps:$4 sm:$0xff]  }
 0x16a   : > { %v1136_v13 = vpack.c.bf16 %v1082_v47, %v1076_v57  ;;  %v962_v24 = vsub.f32 %v6466_v21, %v6887_v28  ;;  %v960_v5 = vsub.f32 %v8239_v40, %v6887_v28  ;;  %v965_v32 = vsub.f32 %v6495_v63, %v6887_v28  ;;  %v5440_v4 = vld [vmem:[#allocation4 + $0x428] ss:$16 sps:$4 sm:$0xff]   ;;  %v5455_v40 = vld [vmem:[#allocation4 + $0x480] ss:$16 sps:$4 sm:$0xff]  }
 0x16b   : > { %2414 = vmatprep.mubr.bf16.mxu0 %v1137_v6  ;;  %2753 = vmatprep.mubr.bf16.mxu1 %v1137_v6  ;;  %v5596_v19 = vpop.eup %5595  ;;  %v964_v25 = vsub.f32 %v6484_v48, %v6887_v28  ;;  %v967_v55 = vsub.f32 %v6480_v39, %v6916_v7  ;;  %v966_v15 = vsub.f32 %v8240_v36, %v6916_v7  ;;  %v8241_v48 = vld [vmem:[#allocation64_spill] sm:$0xff]  ;;  %v8242_v39 = vld [vmem:[#allocation63_spill] sm:$0xff] }
 0x16c   : > { %2415 = vmatmul.mubr.bf16.gmra.mrb[24].mxu0 %v1136_v13  ;;  %2754 = vmatmul.mubr.bf16.gmra.mrb[24].mxu1 %v1136_v13  ;;  %v1091_v61 = vmul.f32 %v5596_v19, %v963_v52  ;;  %v1090_v21 = vmul.f32 %v5596_v19, %v962_v24  ;;  %v969_v26 = vsub.f32 %v6487_v46, %v6916_v7  ;;  %v5434_v6 = vld [vmem:[#allocation4 + $0x408] ss:$16 sps:$4 sm:$0xff]   ;;  %v5439_v13 = vld [vmem:[#allocation4 + $0x424] ss:$16 sps:$4 sm:$0xff]   ;;  %v5472_v36 = vld [vmem:[#allocation4 + $0x4cc] ss:$16 sps:$4 sm:$0xff]  }
 0x16d   : > { %v968_v53 = vsub.f32 %v6482_v12, %v6916_v7  ;;  %v1093_v44 = vmul.f32 %v5596_v19, %v965_v32  ;;  %v1092_v50 = vmul.f32 %v5596_v19, %v964_v25  ;;  %v1089_v57 = vmul.f32 %v5596_v19, %v961_v54  ;;  %v5446_v33 = vld [vmem:[#allocation4 + $0x448] ss:$16 sps:$4 sm:$0xff]   ;;  %v5451_v54 = vld [vmem:[#allocation4 + $0x464] ss:$16 sps:$4 sm:$0xff]  }
 0x16e   : > { %v1088_v14 = vmul.f32 %v5596_v19, %v960_v5  ;;  %v971_v28 = vsub.f32 %v8241_v48, %v6916_v7  ;;  %v970_v17 = vsub.f32 %v8242_v39, %v6916_v7  ;;  %v5431_v7 = vld [vmem:[#allocation4 + $0x400] ss:$16 sps:$4 sm:$0xff]   ;;  %v5452_v52 = vld [vmem:[#allocation4 + $0x468] ss:$16 sps:$4 sm:$0xff]   ;;  %v5457_v24 = vld [vmem:[#allocation4 + $0x484] ss:$16 sps:$4 sm:$0xff]  }
 0x16f   : > { %v5598_v63 = vpop.eup %5597  ;;  %v5460_v19 = vld [vmem:[#allocation4 + $0x48c] ss:$16 sps:$4 sm:$0xff]   ;;  %v5458_v5 = vld [vmem:[#allocation4 + $0x488] ss:$16 sps:$4 sm:$0xff]   ;;  %v5463_v32 = vld [vmem:[#allocation4 + $0x4a4] ss:$16 sps:$4 sm:$0xff]  }
 0x170   : > { %v1095_v41 = vmul.f32 %v5598_v63, %v967_v55  ;;  %v1094_v43 = vmul.f32 %v5598_v63, %v966_v15  ;;  %v1097_v10 = vmul.f32 %v5598_v63, %v969_v26  ;;  %v1096_v58 = vmul.f32 %v5598_v63, %v968_v53  ;;  %v5464_v25 = vld [vmem:[#allocation4 + $0x4a8] ss:$16 sps:$4 sm:$0xff]   ;;  %v5469_v55 = vld [vmem:[#allocation4 + $0x4c4] ss:$16 sps:$4 sm:$0xff]   ;;  %v5467_v15 = vld [vmem:[#allocation4 + $0x4c0] ss:$16 sps:$4 sm:$0xff]  }
 0x171   : > { %v1099_v45 = vmul.f32 %v5598_v63, %v971_v28  ;;  %v1098_v46 = vmul.f32 %v5598_v63, %v970_v17  ;;  %v5476_v26 = vld [vmem:[#allocation4 + $0x4e8] ss:$16 sps:$4 sm:$0xff]   ;;  %v5481_v53 = vld [vmem:[#allocation4 + $0x504] ss:$16 sps:$4 sm:$0xff]   ;;  %v5496_v28 = vld [vmem:[#allocation4 + $0x54c] ss:$16 sps:$4 sm:$0xff]  }
 0x172   : > { %v1143_v29 = vpack.c.bf16 %v1095_v41, %v1089_v57  ;;  %v1142_v47 = vpack.c.bf16 %v1094_v43, %v1088_v14  ;;  %v7034_v12 = vpack.c.bf16 %v1097_v10, %v1091_v61  ;;  %v7036_v16 = vpack.c.bf16 %v1096_v58, %v1090_v21  ;;  %v5470_v61 = vld [vmem:[#allocation4 + $0x4c8] ss:$16 sps:$4 sm:$0xff]   ;;  %v5475_v21 = vld [vmem:[#allocation4 + $0x4e4] ss:$16 sps:$4 sm:$0xff]   ;;  %v5491_v39 = vld [vmem:[#allocation4 + $0x540] ss:$16 sps:$4 sm:$0xff]  }
 0x173   : > { %v7038_v51 = vpack.c.bf16 %v1099_v45, %v1093_v44  ;;  %v7040_v1 = vpack.c.bf16 %v1098_v46, %v1092_v50  ;;  %v5484_v44 = vld [vmem:[#allocation4 + $0x50c] ss:$16 sps:$4 sm:$0xff]   ;;  %v5479_v50 = vld [vmem:[#allocation4 + $0x500] ss:$16 sps:$4 sm:$0xff]   ;;  %v5482_v63 = vld [vmem:[#allocation4 + $0x508] ss:$16 sps:$4 sm:$0xff]  }
 0x174   : > { %2424 = vmatprep.mubr.bf16.mxu0 %v1143_v29  ;;  %2763 = vmatprep.mubr.bf16.mxu1 %v1143_v29  ;;  %v5487_v57 = vld [vmem:[#allocation4 + $0x524] ss:$16 sps:$4 sm:$0xff]   ;;  %v5488_v14 = vld [vmem:[#allocation4 + $0x528] ss:$16 sps:$4 sm:$0xff]   ;;  %v5508_v58 = vld [vmem:[#allocation4 + $0x58c] ss:$16 sps:$4 sm:$0xff]  }
 0x175   : > { %2425 = vmatmul.mubr.bf16.gmra.mrb[28].mxu0 %v1142_v47  ;;  %2764 = vmatmul.mubr.bf16.gmra.mrb[28].mxu1 %v1142_v47  ;;  %v5493_v48 = vld [vmem:[#allocation4 + $0x544] ss:$16 sps:$4 sm:$0xff]   ;;  %v5494_v17 = vld [vmem:[#allocation4 + $0x548] ss:$16 sps:$4 sm:$0xff]   ;;  %v5503_v45 = vld [vmem:[#allocation4 + $0x580] ss:$16 sps:$4 sm:$0xff]  }
 0x176   : > { %2467 = vmatprep.mubr.bf16.mxu0 %v6590_v34  ;;  %2806 = vmatprep.mubr.bf16.mxu1 %v6590_v34  ;;  %v5448_v34 = vld [vmem:[#allocation4 + $0x44c] ss:$16 sps:$4 sm:$0xff]   ;;  %v5499_v41 = vld [vmem:[#allocation4 + $0x564] ss:$16 sps:$4 sm:$0xff]   ;;  %v5500_v43 = vld [vmem:[#allocation4 + $0x568] ss:$16 sps:$4 sm:$0xff]  }
 0x177   : > { %v5505_v10 = vld [vmem:[#allocation4 + $0x584] ss:$16 sps:$4 sm:$0xff]   ;;  %v5506_v46 = vld [vmem:[#allocation4 + $0x588] ss:$16 sps:$4 sm:$0xff]  }
 0x178   : > { %v5511_v29 = vld [vmem:[#allocation4 + $0x5a4] ss:$16 sps:$4 sm:$0xff]   ;;  %v5512_v47 = vld [vmem:[#allocation4 + $0x5a8] ss:$16 sps:$4 sm:$0xff]  }
 0x17d   : > { %2468 = vmatmul.mubr.bf16.vlgmr.msra.gmra.mrb[0].mxu0 %v6592_v37  ;;  %2807 = vmatmul.mubr.bf16.vlgmr.msra.gmra.mrb[0].mxu1 %v6592_v37  ;;  %v5454_v37 = vld [vmem:[#allocation4 + $0x46c] ss:$16 sps:$4 sm:$0xff]  }
 0x17e   : > { %2549 = vmatpush1.bf16.msra.mxu0 %v5431_v7  ;;  %2477 = vmatprep.mubr.bf16.mxu0 %v6650_v18  ;;  %v5517_v7 = vld [vmem:[#allocation4 + $0x5c4] ss:$16 sps:$4 sm:$0xff]  }
 0x17f   : > { %2816 = vmatprep.mubr.bf16.mxu1 %v6650_v18  ;;  %2888 = vmatpush1.bf16.msra.mxu1 %v5434_v6  ;;  %v5449_v18 = vld [vmem:[#allocation4 + $0x460] ss:$16 sps:$4 sm:$0xff]   ;;  %v5520_v6 = vld [vmem:[#allocation4 + $0x5cc] ss:$16 sps:$4 sm:$0xff]  }
 0x180   : > { %2550 = vmatprep.subr.bf16.mxu0 %v5439_v13  ;;  %2889 = vmatprep.subr.bf16.mxu1 %v5442_v22  ;;  %v5515_v13 = vld [vmem:[#allocation4 + $0x5c0] ss:$16 sps:$4 sm:$0xff]   ;;  %v5518_v22 = vld [vmem:[#allocation4 + $0x5c8] ss:$16 sps:$4 sm:$0xff]  }
 0x182   : > { %2551 = vmatpush1.bf16.msra.mxu0 %v5437_v59  ;;  %v5523_v59 = vld [vmem:[#allocation4 + $0x5e4] ss:$16 sps:$4 sm:$0xff]  }
 0x183   : > { %2890 = vmatpush1.bf16.msra.mxu1 %v5440_v4  ;;  %2552 = vmatprep.subr.bf16.mxu0 %v5445_v23  ;;  %v5521_v4 = vld [vmem:[#allocation4 + $0x5e0] ss:$16 sps:$4 sm:$0xff]   ;;  %v5524_v23 = vld [vmem:[#allocation4 + $0x5e8] ss:$16 sps:$4 sm:$0xff]  }
 0x184   : > { %2891 = vmatprep.subr.bf16.mxu1 %v5448_v34  ;;  %v8244_v34 = vld [vmem:[#allocation66_spill] sm:$0xff] }
 0x185   : > { %2478 = vmatmul.mubr.bf16.gmra.mrb[4].mxu0 %v6652_v2  ;;  %2817 = vmatmul.mubr.bf16.gmra.mrb[4].mxu1 %v6652_v2  ;;  %v5466_v2 = vld [vmem:[#allocation4 + $0x4ac] ss:$16 sps:$4 sm:$0xff]  }
 0x186   : > { %2553 = vmatpush1.bf16.msra.mxu0 %v5443_v38  ;;  %2487 = vmatprep.mubr.bf16.mxu0 %v6728_v35  ;;  %v8245_v38 = vld [vmem:[#allocation9_spill] sm:$0xff] }
 0x187   : > { %2826 = vmatprep.mubr.bf16.mxu1 %v6728_v35  ;;  %2892 = vmatpush1.bf16.msra.mxu1 %v5446_v33  ;;  %v5461_v35 = vld [vmem:[#allocation4 + $0x4a0] ss:$16 sps:$4 sm:$0xff]  }
 0x188   : > { %2554 = vmatprep.subr.bf16.mxu0 %v5451_v54  ;;  %2893 = vmatprep.subr.bf16.mxu1 %v5454_v37  ;;  %v8247_v33 = vld [vmem:[#allocation11_spill] sm:$0xff]  ;;  %v8248_v54 = vld [vmem:[#allocation14_spill] sm:$0xff] }
 0x189   : > { %v8249_v37 = vld [vmem:[#allocation10_spill] sm:$0xff] }
 0x18a   : > { %2555 = vmatpush1.bf16.msra.mxu0 %v5449_v18  ;;  %v8250_v18 = vld [vmem:[#allocation13_spill] sm:$0xff] }
 0x18b   : > { %2894 = vmatpush1.bf16.msra.mxu1 %v5452_v52  ;;  %2556 = vmatprep.subr.bf16.mxu0 %v5457_v24  ;;  %v8251_v52 = vld [vmem:[#allocation16_spill] sm:$0xff]  ;;  %v5529_v24 = vld [vmem:[#allocation6 + $0xc0] sm:$0xff]  }
 0x18c   : > { %2895 = vmatprep.subr.bf16.mxu1 %v5460_v19  ;;  %v5531_v19 = vld [vmem:[#allocation6 + $0x48] sm:$0xff]  }
 0x18d   : > { %2488 = vmatmul.mubr.bf16.gmra.mrb[8].mxu0 %v6730_v42  ;;  %2827 = vmatmul.mubr.bf16.gmra.mrb[8].mxu1 %v6730_v42  ;;  %v5478_v42 = vld [vmem:[#allocation4 + $0x4ec] ss:$16 sps:$4 sm:$0xff]  }
 0x18e   : > { %2557 = vmatpush1.bf16.msra.mxu0 %v5455_v40  ;;  %2497 = vmatprep.mubr.bf16.mxu0 %v6806_v9  ;;  %v5532_v40 = vld [vmem:[#allocation6 + $0x8] sm:$0xff]  }
 0x18f   : > { %2836 = vmatprep.mubr.bf16.mxu1 %v6806_v9  ;;  %2896 = vmatpush1.bf16.msra.mxu1 %v5458_v5  ;;  %v5473_v9 = vld [vmem:[#allocation4 + $0x4e0] ss:$16 sps:$4 sm:$0xff]  }
 0x190   : > { %2558 = vmatprep.subr.bf16.mxu0 %v5463_v32  ;;  %2897 = vmatprep.subr.bf16.mxu1 %v5466_v2  ;;  %v5535_v5 = vld [vmem:[#allocation6 + $0x50] sm:$0xff]   ;;  %v5539_v2 = vld [vmem:[#allocation6 + $0x58] sm:$0xff]  }
 0x191   : > { %v5536_v32 = vld [vmem:[#allocation6 + $0x10] sm:$0xff]  }
 0x192   : > { %2559 = vmatpush1.bf16.msra.mxu0 %v5461_v35  ;;  %v5541_v35 = vld [vmem:[#allocation6 + $0xd8] sm:$0xff]  }
 0x193   : > { %2898 = vmatpush1.bf16.msra.mxu1 %v5464_v25  ;;  %2560 = vmatprep.subr.bf16.mxu0 %v5469_v55  ;;  %v5540_v25 = vld [vmem:[#allocation6 + $0x18] sm:$0xff]  }
 0x194   : > { %2899 = vmatprep.subr.bf16.mxu1 %v5472_v36  ;;  %v5542_v55 = vld [vmem:[#allocation6 + $0x98] sm:$0xff]   ;;  %v5543_v36 = vld [vmem:[#allocation6 + $0x60] sm:$0xff]  }
 0x195   : > { %2498 = vmatmul.mubr.bf16.gmra.mrb[12].mxu0 %v6808_v20  ;;  %2837 = vmatmul.mubr.bf16.gmra.mrb[12].mxu1 %v6808_v20  ;;  %v5490_v20 = vld [vmem:[#allocation4 + $0x52c] ss:$16 sps:$4 sm:$0xff]  }
 0x196   : > { %2561 = vmatpush1.bf16.msra.mxu0 %v5467_v15  ;;  %2507 = vmatprep.mubr.bf16.mxu0 %v6879_v8  ;;  %v5545_v15 = vld [vmem:[#allocation6 + $0xe0] sm:$0xff]  }
 0x197   : > { %2846 = vmatprep.mubr.bf16.mxu1 %v6879_v8  ;;  %2900 = vmatpush1.bf16.msra.mxu1 %v5470_v61  ;;  %v5485_v8 = vld [vmem:[#allocation4 + $0x520] ss:$16 sps:$4 sm:$0xff]  }
 0x198   : > { %2562 = vmatprep.subr.bf16.mxu0 %v5475_v21  ;;  %2901 = vmatprep.subr.bf16.mxu1 %v5478_v42  ;;  %v5544_v61 = vld [vmem:[#allocation6 + $0x20] sm:$0xff]   ;;  %v1342_v21 = vlaneseq }
 0x19a   : > { %2563 = vmatpush1.bf16.msra.mxu0 %v5473_v9  ;;  %v1343_v42 = vshrl.u32 %v1342_v21, 7 }
 0x19b   : > { %2902 = vmatpush1.bf16.msra.mxu1 %v5476_v26  ;;  %2564 = vmatprep.subr.bf16.mxu0 %v5481_v53  ;;  %v1340_v26 = vld [vmem:[%s7941_s2] sm:$0xf] }
 0x19c   : > { %2903 = vmatprep.subr.bf16.mxu1 %v5484_v44  ;;  %v1344_v9 = vsub.s32 0, %v1343_v42  ;;  %v1352_v53 = vsub.s32 2, %v1343_v42  ;;  %v1348_v44 = vsub.s32 1, %v1343_v42 }
 0x19d   : > { %2508 = vmatmul.mubr.bf16.gmra.mrb[16].mxu0 %v6881_v60  ;;  %2847 = vmatmul.mubr.bf16.gmra.mrb[16].mxu1 %v6881_v60  ;;  %v5502_v60 = vld [vmem:[#allocation4 + $0x56c] ss:$16 sps:$4 sm:$0xff]  }
 0x19e   : > { %2565 = vmatpush1.bf16.msra.mxu0 %v5479_v50  ;;  %2517 = vmatprep.mubr.bf16.mxu0 %v6952_v62  ;;  %v1356_v50 = vsub.s32 3, %v1343_v42 }
 0x19f   : > { %2856 = vmatprep.mubr.bf16.mxu1 %v6952_v62  ;;  %2904 = vmatpush1.bf16.msra.mxu1 %v5482_v63  ;;  %v5497_v62 = vld [vmem:[#allocation4 + $0x560] ss:$16 sps:$4 sm:$0xff]   ;;  %v7109_v63 = vrot.slane %v1340_v26, %v1344_v9 }
 0x1a0   : > { %2566 = vmatprep.subr.bf16.mxu0 %v5487_v57  ;;  %2905 = vmatprep.subr.bf16.mxu1 %v5490_v20  ;;  %v7111_v57 = vrot.slane %v1340_v26, %v1352_v53  ;;  %v7113_v20 = vrot.slane %v1340_v26, %v1348_v44 }
 0x1a2   : > { %2567 = vmatpush1.bf16.msra.mxu0 %v5485_v8  ;;  %v7115_v8 = vrot.slane %v1340_v26, %v1356_v50 }
 0x1a3   : > { %2906 = vmatpush1.bf16.msra.mxu1 %v5488_v14  ;;  %2568 = vmatprep.subr.bf16.mxu0 %v5493_v48 }
 0x1a4   : > { %2907 = vmatprep.subr.bf16.mxu1 %v5496_v28 }
 0x1a5   : > { %2518 = vmatmul.mubr.bf16.gmra.mrb[20].mxu0 %v6954_v49  ;;  %2857 = vmatmul.mubr.bf16.gmra.mrb[20].mxu1 %v6954_v49  ;;  %v5514_v49 = vld [vmem:[#allocation4 + $0x5ac] ss:$16 sps:$4 sm:$0xff]  }
 0x1a6   : > { %2569 = vmatpush1.bf16.msra.mxu0 %v5491_v39  ;;  %2527 = vmatprep.mubr.bf16.mxu0 %v7002_v3 }
 0x1a7   : > { %2866 = vmatprep.mubr.bf16.mxu1 %v7002_v3  ;;  %2908 = vmatpush1.bf16.msra.mxu1 %v5494_v17  ;;  %v5509_v3 = vld [vmem:[#allocation4 + $0x5a0] ss:$16 sps:$4 sm:$0xff]  }
 0x1a8   : > { %2570 = vmatprep.subr.bf16.mxu0 %v5499_v41  ;;  %2909 = vmatprep.subr.bf16.mxu1 %v5502_v60 }
 0x1aa   : > { %2571 = vmatpush1.bf16.msra.mxu0 %v5497_v62 }
 0x1ab   : > { %2910 = vmatpush1.bf16.msra.mxu1 %v5500_v43  ;;  %2572 = vmatprep.subr.bf16.mxu0 %v5505_v10 }
 0x1ac   : > { %2911 = vmatprep.subr.bf16.mxu1 %v5508_v58 }
 0x1ad   : > { %2528 = vmatmul.mubr.bf16.gmra.mrb[24].mxu0 %v7004_v30  ;;  %2867 = vmatmul.mubr.bf16.gmra.mrb[24].mxu1 %v7004_v30  ;;  %v5526_v30 = vld [vmem:[#allocation4 + $0x5ec] ss:$16 sps:$4 sm:$0xff]  }
 0x1ae   : > { %2573 = vmatpush1.bf16.msra.mxu0 %v5503_v45  ;;  %2537 = vmatprep.mubr.bf16.mxu0 %v7034_v12 }
 0x1af   : > { %2876 = vmatprep.mubr.bf16.mxu1 %v7034_v12  ;;  %2912 = vmatpush1.bf16.msra.mxu1 %v5506_v46  ;;  %v8243_v12 = vld [vmem:[#allocation65_spill] sm:$0xff] }
 0x1b0   : > { %2574 = vmatprep.subr.bf16.mxu0 %v5511_v29  ;;  %2913 = vmatprep.subr.bf16.mxu1 %v5514_v49 }
 0x1b2   : > { %2575 = vmatpush1.bf16.msra.mxu0 %v5509_v3 }
 0x1b3   : > { %2914 = vmatpush1.bf16.msra.mxu1 %v5512_v47  ;;  %2576 = vmatprep.subr.bf16.mxu0 %v5517_v7 }
 0x1b4   : > { %2915 = vmatprep.subr.bf16.mxu1 %v5520_v6 }
 0x1b5   : > { %2538 = vmatmul.mubr.bf16.gmra.mrb[28].mxu0 %v7036_v16  ;;  %2877 = vmatmul.mubr.bf16.gmra.mrb[28].mxu1 %v7036_v16  ;;  %v8246_v16 = vld [vmem:[#allocation12_spill] sm:$0xff] }
 0x1b6   : > { %2577 = vmatpush1.bf16.msra.mxu0 %v5515_v13  ;;  %2580 = vmatprep.mubr.bf16.mxu0 %v8243_v12 }
 0x1b7   : > { %2916 = vmatpush1.bf16.msra.mxu1 %v5518_v22  ;;  %2919 = vmatprep.mubr.bf16.mxu1 %v8243_v12 }
 0x1b8   : > { %2578 = vmatprep.subr.bf16.mxu0 %v5523_v59  ;;  %2917 = vmatprep.subr.bf16.mxu1 %v5526_v30 }
 0x1ba   : > { %2579 = vmatpush1.bf16.msra.mxu0 %v5521_v4 }
 0x1bb   : > { %2918 = vmatpush1.bf16.msra.mxu1 %v5524_v23 }
 0x1bc   : > { %4850 = vmatprep.subr.bf16.mxu1 %v5529_v24 }
 0x1bd   : > { %2581 = vmatmul.mubr.bf16.vlgmr.msra.gmra.mrb[0].mxu0 %v8244_v34 }
 0x1be   : > { %2920 = vmatmul.mubr.bf16.vlgmr.msra.gmra.mrb[0].mxu1 %v8244_v34  ;;  %2590 = vmatprep.mubr.bf16.mxu0 %v8245_v38 }
 0x1bf   : > { %2929 = vmatprep.mubr.bf16.mxu1 %v8245_v38 }
 0x1c5   : > { %2591 = vmatmul.mubr.bf16.gmra.mrb[4].mxu0 %v8246_v16 }
 0x1c6   : > { %2930 = vmatmul.mubr.bf16.gmra.mrb[4].mxu1 %v8246_v16  ;;  %2600 = vmatprep.mubr.bf16.mxu0 %v8247_v33 }
 0x1c7   : > { %2939 = vmatprep.mubr.bf16.mxu1 %v8247_v33 }
 0x1cd   : > { %2601 = vmatmul.mubr.bf16.gmra.mrb[8].mxu0 %v8248_v54 }
 0x1ce   : > { %2940 = vmatmul.mubr.bf16.gmra.mrb[8].mxu1 %v8248_v54  ;;  %2610 = vmatprep.mubr.bf16.mxu0 %v8249_v37 }
 0x1cf   : > { %2949 = vmatprep.mubr.bf16.mxu1 %v8249_v37 }
 0x1d5   : > { %2611 = vmatmul.mubr.bf16.gmra.mrb[12].mxu0 %v8250_v18 }
 0x1d6   : > { %2950 = vmatmul.mubr.bf16.gmra.mrb[12].mxu1 %v8250_v18  ;;  %2620 = vmatprep.mubr.bf16.mxu0 %v8251_v52 }
 0x1d7   : > { %2959 = vmatprep.mubr.bf16.mxu1 %v8251_v52 }
 0x1dd   : > { %2621 = vmatmul.mubr.bf16.gmra.mrb[16].mxu0 %v6964_v0 }
 0x1de   : > { %2960 = vmatmul.mubr.bf16.gmra.mrb[16].mxu1 %v6964_v0  ;;  %2630 = vmatprep.mubr.bf16.mxu0 %v6968_v31  ;;  %v5527_v0 = vld [vmem:[#allocation6 + $0x40] sm:$0xff]  }
 0x1df   : > { %2969 = vmatprep.mubr.bf16.mxu1 %v6968_v31  ;;  %v5528_v31 = vld [vmem:[#allocation6] sm:$0xff]   ;;  %4786 = vmatprep.subr.bf16.mxu0 %v5527_v0 }
 0x1e0   : > { %4787 = vmatpush3.bf16.msra.mxu0 %v5528_v31 }
 0x1e1   : > { %4788 = vmatprep.subr.bf16.mxu0 %v5531_v19 }
 0x1e4   : > { %4789 = vmatpush3.bf16.msra.mxu0 %v5532_v40 }
 0x1e5   : > { %2631 = vmatmul.mubr.bf16.gmra.mrb[20].mxu0 %v7000_v11  ;;  %4790 = vmatprep.subr.bf16.mxu0 %v5535_v5 }
 0x1e6   : > { %2970 = vmatmul.mubr.bf16.gmra.mrb[20].mxu1 %v7000_v11  ;;  %2640 = vmatprep.mubr.bf16.mxu0 %v7006_v27  ;;  %v5530_v11 = vld [vmem:[#allocation6 + $0x80] sm:$0xff]  }
 0x1e7   : > { %2979 = vmatprep.mubr.bf16.mxu1 %v7006_v27  ;;  %v5533_v27 = vld [vmem:[#allocation6 + $0xc8] sm:$0xff]   ;;  %4851 = vmatpush3.bf16.msra.mxu1 %v5530_v11 }
 0x1e8   : > { %4852 = vmatprep.subr.bf16.mxu1 %v5533_v27  ;;  %4791 = vmatpush3.bf16.msra.mxu0 %v5536_v32 }
 0x1e9   : > { %4792 = vmatprep.subr.bf16.mxu0 %v5539_v2 }
 0x1ec   : > { %4793 = vmatpush3.bf16.msra.mxu0 %v5540_v25 }
 0x1ed   : > { %2641 = vmatmul.mubr.bf16.gmra.mrb[24].mxu0 %v7008_v56  ;;  %4794 = vmatprep.subr.bf16.mxu0 %v5543_v36 }
 0x1ee   : > { %2980 = vmatmul.mubr.bf16.gmra.mrb[24].mxu1 %v7008_v56  ;;  %2650 = vmatprep.mubr.bf16.mxu0 %v7038_v51  ;;  %v5534_v56 = vld [vmem:[#allocation6 + $0x88] sm:$0xff]  }
 0x1ef   : > { %2989 = vmatprep.mubr.bf16.mxu1 %v7038_v51  ;;  %v5537_v51 = vld [vmem:[#allocation6 + $0xd0] sm:$0xff]   ;;  %4853 = vmatpush3.bf16.msra.mxu1 %v5534_v56 }
 0x1f0   : > { %4854 = vmatprep.subr.bf16.mxu1 %v5537_v51  ;;  %4795 = vmatpush3.bf16.msra.mxu0 %v5544_v61 }
 0x1f5   : > { %2651 = vmatmul.mubr.bf16.gmra.mrb[28].mxu0 %v7040_v1 }
 0x1f6   : > { %2990 = vmatmul.mubr.bf16.gmra.mrb[28].mxu1 %v7040_v1  ;;  %v5538_v1 = vld [vmem:[#allocation6 + $0x90] sm:$0xff]  }
 0x1f7   : > { %4855 = vmatpush3.bf16.msra.mxu1 %v5538_v1 }
 0x1f8   : > { %4856 = vmatprep.subr.bf16.mxu1 %v5541_v35 }
 0x1fb   : > { %4857 = vmatpush3.bf16.msra.mxu1 %v5542_v55 }
 0x1fc   : > { %4858 = vmatprep.subr.bf16.mxu1 %v5545_v15 }
 0x290   : > { %v2582_v14 = vpop.f32.mrb[0].mxu0 }
 0x291   : > { %v4978_v48 = vadd.f32 %v2582_v14, %v7109_v63  ;;  %v2921_v28 = vpop.f32.mrb[0].mxu1  ;;  %v2584_v39 = vpop.f32.mrb[1].mxu0 }
 0x292   : > { %v5010_v17 = vadd.f32 %v2921_v28, %v7111_v57  ;;  %v4979_v41 = vadd.f32 %v2584_v39, %v7113_v20  ;;  %v2923_v60 = vpop.f32.mrb[1].mxu1  ;;  %v2586_v62 = vpop.f32.mrb[2].mxu0 }
 0x293   : > { %v7120_v43 = vmax.f32 %v4978_v48, 0.0  ;;  %v5011_v10 = vadd.f32 %v2923_v60, %v7115_v8  ;;  %v4980_v58 = vadd.f32 %v2586_v62, %v7109_v63  ;;  %v2925_v45 = vpop.f32.mrb[2].mxu1  ;;  %v2588_v46 = vpop.f32.mrb[3].mxu0 }
 0x294   : > { %v7124_v29 = vmax.f32 %v4979_v41, 0.0  ;;  %v5012_v49 = vadd.f32 %v2925_v45, %v7111_v57  ;;  %v4981_v3 = vadd.f32 %v2588_v46, %v7113_v20  ;;  %v2927_v47 = vpop.f32.mrb[3].mxu1  ;;  %v7130_v6 = vmax.f32 %v5010_v17, 0.0 }
 0x295   : > { %v3144_v7 = vmul.f32 %v7120_v43, %v7120_v43  ;;  %v7132_v13 = vmax.f32 %v4980_v58, 0.0  ;;  %v5013_v30 = vadd.f32 %v2927_v47, %v7115_v8  ;;  %v7141_v4 = vmax.f32 %v5011_v10, 0.0 }
 0x296   : > { %v3145_v22 = vmul.f32 %v7124_v29, %v7124_v29  ;;  %v7136_v59 = vmax.f32 %v4981_v3, 0.0  ;;  %v3064_v12 = vadd.f32 %v7124_v29, %v7120_v43  ;;  %v7143_v23 = vmax.f32 %v5012_v49, 0.0 }
 0x297   : > { %v3148_v54 = vmul.f32 %v7132_v13, %v7132_v13  ;;  %v3146_v0 = vmul.f32 %v7130_v6, %v7130_v6  ;;  %v7153_v31 = vmax.f32 %v5013_v30, 0.0  ;;  %v3147_v42 = vmul.f32 %v7141_v4, %v7141_v4 }
 0x298   : > { %v2592_v34 = vpop.f32.mrb[4].mxu0  ;;  %v3065_v38 = vadd.f32 %v3064_v12, %v7130_v6  ;;  %v3069_v16 = vadd.f32 %v7136_v59, %v7132_v13  ;;  %v3208_v33 = vadd.f32 %v3145_v22, %v3144_v7  ;;  %v3149_v56 = vmul.f32 %v7136_v59, %v7136_v59 }
 0x299   : > { %v4982_v37 = vadd.f32 %v2592_v34, %v7109_v63  ;;  %v2931_v18 = vpop.f32.mrb[4].mxu1  ;;  %v2594_v52 = vpop.f32.mrb[5].mxu0  ;;  %v3150_v53 = vmul.f32 %v7143_v23, %v7143_v23  ;;  %v3151_v44 = vmul.f32 %v7153_v31, %v7153_v31 }
 0x29a   : > { %v4983_v24 = vadd.f32 %v2594_v52, %v7113_v20  ;;  %v2933_v11 = vpop.f32.mrb[5].mxu1  ;;  %v2596_v19 = vpop.f32.mrb[6].mxu0  ;;  %v3066_v27 = vadd.f32 %v3065_v38, %v7141_v4  ;;  %v3070_v40 = vadd.f32 %v3069_v16, %v7143_v23  ;;  %v3209_v2 = vadd.f32 %v3208_v33, %v3146_v0 }
 0x29b   : > { %v7160_v5 = vmax.f32 %v4982_v37, 0.0  ;;  %v4984_v51 = vadd.f32 %v2596_v19, %v7109_v63  ;;  %v2935_v32 = vpop.f32.mrb[6].mxu1  ;;  %v2598_v1 = vpop.f32.mrb[7].mxu0  ;;  %v5014_v35 = vadd.f32 %v2931_v18, %v7111_v57  ;;  %v5015_v55 = vadd.f32 %v2933_v11, %v7115_v8 }
 0x29c   : > { %v7164_v25 = vmax.f32 %v4983_v24, 0.0  ;;  %v4985_v36 = vadd.f32 %v2598_v1, %v7113_v20  ;;  %v2937_v15 = vpop.f32.mrb[7].mxu1  ;;  %3067 = vadd.xlane.f32.xlu0 %v3066_v27  ;;  %v5016_v21 = vadd.f32 %v2935_v32, %v7111_v57  ;;  %v3071_v26 = vadd.f32 %v3070_v40, %v7153_v31 }
 0x29d   : > { %v7168_v61 = vmax.f32 %v4984_v51, 0.0  ;;  %v3152_v50 = vmul.f32 %v7160_v5, %v7160_v5  ;;  %v3210_v48 = vadd.f32 %v3209_v2, %v3147_v42  ;;  %v3213_v28 = vadd.f32 %v3149_v56, %v3148_v54 }
 0x29e   : > { %v7173_v9 = vmax.f32 %v4985_v36, 0.0  ;;  %v3153_v14 = vmul.f32 %v7164_v25, %v7164_v25  ;;  %v7184_v39 = vmax.f32 %v5014_v35, 0.0  ;;  %v7186_v17 = vmax.f32 %v5015_v55, 0.0  ;;  %3072 = vadd.xlane.f32.xlu1 %v3071_v26 }
 0x29f   : > { %v3074_v60 = vadd.f32 %v7164_v25, %v7160_v5  ;;  %v7192_v10 = vmax.f32 %v5016_v21, 0.0  ;;  %v5017_v58 = vadd.f32 %v2937_v15, %v7115_v8  ;;  %v3214_v3 = vadd.f32 %v3213_v28, %v3150_v53 }
 0x2a0   : > { %v2602_v41 = vpop.f32.mrb[8].mxu0  ;;  %v3079_v62 = vadd.f32 %v7173_v9, %v7168_v61  ;;  %3211 = vadd.xlane.f32.xlu0 %v3210_v48  ;;  %v3156_v47 = vmul.f32 %v7168_v61, %v7168_v61  ;;  %v3218_v18 = vadd.f32 %v3153_v14, %v3152_v50  ;;  %v3157_v52 = vmul.f32 %v7173_v9, %v7173_v9 }
 0x2a1   : > { %v4986_v45 = vadd.f32 %v2602_v41, %v7109_v63  ;;  %v2941_v46 = vpop.f32.mrb[8].mxu1  ;;  %v2604_v49 = vpop.f32.mrb[9].mxu0  ;;  %v3075_v34 = vadd.f32 %v3074_v60, %v7184_v39  ;;  %v3215_v33 = vadd.f32 %v3214_v3, %v3151_v44  ;;  %v7209_v27 = vmax.f32 %v5017_v58, 0.0 }
 0x2a2   : > { %v5018_v7 = vadd.f32 %v2941_v46, %v7111_v57  ;;  %v4987_v22 = vadd.f32 %v2604_v49, %v7113_v20  ;;  %v2943_v30 = vpop.f32.mrb[9].mxu1  ;;  %v2606_v12 = vpop.f32.mrb[10].mxu0  ;;  %v3080_v37 = vadd.f32 %v3079_v62, %v7192_v10  ;;  %v3154_v56 = vmul.f32 %v7184_v39, %v7184_v39 }
 0x2a3   : > { %v4988_v38 = vadd.f32 %v2606_v12, %v7109_v63  ;;  %v2945_v16 = vpop.f32.mrb[10].mxu1  ;;  %v2608_v54 = vpop.f32.mrb[11].mxu0  ;;  %v7205_v0 = vmax.f32 %v4986_v45, 0.0  ;;  %v5019_v24 = vadd.f32 %v2943_v30, %v7115_v8  ;;  %3216 = vadd.xlane.f32.xlu1 %v3215_v33  ;;  %v3076_v1 = vadd.f32 %v3075_v34, %v7186_v17 }
 0x2a4   : > { %v4989_v11 = vadd.f32 %v2608_v54, %v7113_v20  ;;  %v2947_v19 = vpop.f32.mrb[11].mxu1  ;;  %v7211_v40 = vmax.f32 %v4987_v22, 0.0  ;;  %v7215_v51 = vmax.f32 %v5018_v7, 0.0  ;;  %v5020_v32 = vadd.f32 %v2945_v16, %v7111_v57 }
 0x2a5   : > { %v3155_v2 = vmul.f32 %v7186_v17, %v7186_v17  ;;  %v7221_v35 = vmax.f32 %v4988_v38, 0.0  ;;  %v3081_v36 = vadd.f32 %v3080_v37, %v7209_v27  ;;  %v3219_v15 = vadd.f32 %v3218_v18, %v3154_v56  ;;  %3077 = vadd.xlane.f32.xlu0 %v3076_v1  ;;  %v5546_v18 = vld [vmem:[#allocation6 + $0xa0] sm:$0xff]  }
 0x2a6   : > { %8252 = vst [vmem:[#allocation15_spill] sm:$0xff] %v7215_v51  ;;  %v7223_v55 = vmax.f32 %v4989_v11, 0.0  ;;  %v3160_v21 = vmul.f32 %v7205_v0, %v7205_v0  ;;  %v7228_v42 = vmax.f32 %v5019_v24, 0.0  ;;  %v3158_v53 = vmul.f32 %v7192_v10, %v7192_v10  ;;  %4859 = vmatpush3.bf16.msra.mxu1 %v5546_v18 }
 0x2a7   : > { %8253 = vst [vmem:[#allocation18_spill] sm:$0xff] %v7221_v35  ;;  %v3223_v44 = vadd.f32 %v3157_v52, %v3156_v47  ;;  %v5021_v50 = vadd.f32 %v2947_v19, %v7115_v8  ;;  %3082 = vadd.xlane.f32.xlu1 %v3081_v36  ;;  %v3159_v41 = vmul.f32 %v7209_v27, %v7209_v27  ;;  %v7248_v16 = vmax.f32 %v5020_v32, 0.0 }
 0x2a8   : > { %v2612_v26 = vpop.f32.mrb[12].mxu0  ;;  %v3084_v60 = vadd.f32 %v7211_v40, %v7205_v0  ;;  %v3220_v58 = vadd.f32 %v3219_v15, %v3155_v2  ;;  %v3089_v34 = vadd.f32 %v7223_v55, %v7221_v35  ;;  %v3161_v38 = vmul.f32 %v7211_v40, %v7211_v40 }
 0x2a9   : > { %v4990_v14 = vadd.f32 %v2612_v26, %v7109_v63  ;;  %v2951_v48 = vpop.f32.mrb[12].mxu1  ;;  %v2614_v28 = vpop.f32.mrb[13].mxu0  ;;  %v3224_v3 = vadd.f32 %v3223_v44, %v3158_v53  ;;  %8255 = vst [vmem:[#allocation19_spill] sm:$0xff] %v7248_v16  ;;  %v3164_v52 = vmul.f32 %v7221_v35, %v7221_v35  ;;  %v3165_v24 = vmul.f32 %v7223_v55, %v7223_v55  ;;  %v5557_v35 = vld [vmem:[#allocation6 + $0xf8] sm:$0xff]  }
 0x2aa   : > { %v5022_v62 = vadd.f32 %v2951_v48, %v7111_v57  ;;  %v4991_v45 = vadd.f32 %v2614_v28, %v7113_v20  ;;  %v2953_v46 = vpop.f32.mrb[13].mxu1  ;;  %v2616_v49 = vpop.f32.mrb[14].mxu0  ;;  %v3085_v12 = vadd.f32 %v3084_v60, %v7215_v51  ;;  %3221 = vadd.xlane.f32.xlu0 %v3220_v58  ;;  %v7255_v11 = vmax.f32 %v5021_v50, 0.0 }
 0x2ab   : > { %v7240_v47 = vmax.f32 %v4990_v14, 0.0  ;;  %v5023_v7 = vadd.f32 %v2953_v46, %v7115_v8  ;;  %v2955_v22 = vpop.f32.mrb[14].mxu1  ;;  %v2618_v30 = vpop.f32.mrb[15].mxu0  ;;  %v4992_v33 = vadd.f32 %v2616_v49, %v7109_v63  ;;  %v3225_v54 = vadd.f32 %v3224_v3, %v3159_v41 }
 0x2ac   : > { %v2957_v37 = vpop.f32.mrb[15].mxu1  ;;  %8256 = vst [vmem:[#allocation24_spill] sm:$0xff] %v7255_v11  ;;  %v4993_v19 = vadd.f32 %v2618_v30, %v7113_v20  ;;  %v7258_v56 = vmax.f32 %v5022_v62, 0.0  ;;  %v7260_v32 = vmax.f32 %v4991_v45, 0.0  ;;  %v3086_v1 = vadd.f32 %v3085_v12, %v7228_v42 }
 0x2ad   : > { %8254 = vst [vmem:[#allocation21_spill] sm:$0xff] %v7240_v47  ;;  %3226 = vadd.xlane.f32.xlu1 %v3225_v54  ;;  %v3162_v2 = vmul.f32 %v7215_v51, %v7215_v51  ;;  %v3168_v36 = vmul.f32 %v7240_v47, %v7240_v47  ;;  %v7267_v15 = vmax.f32 %v5023_v7, 0.0  ;;  %v5024_v26 = vadd.f32 %v2955_v22, %v7111_v57 }
 0x2ae   : > { %8257 = vst [vmem:[#allocation17_spill] sm:$0xff] %v7258_v56  ;;  %8258 = vst [vmem:[#allocation22_spill] sm:$0xff] %v7260_v32  ;;  %v3090_v53 = vadd.f32 %v3089_v34, %v7248_v16  ;;  %v7271_v44 = vmax.f32 %v4992_v33, 0.0  ;;  %v7273_v50 = vmax.f32 %v4993_v19, 0.0  ;;  %v5025_v14 = vadd.f32 %v2957_v37, %v7115_v8  ;;  %3087 = vadd.xlane.f32.xlu0 %v3086_v1 }
 0x2af   : > { %8259 = vst [vmem:[#allocation23_spill] sm:$0xff] %v7267_v15  ;;  %v3228_v28 = vadd.f32 %v3161_v38, %v3160_v21  ;;  %v3166_v45 = vmul.f32 %v7248_v16, %v7248_v16  ;;  %v3233_v46 = vadd.f32 %v3165_v24, %v3164_v52  ;;  %v3163_v3 = vmul.f32 %v7228_v42, %v7228_v42 }
 0x2b0   : > { %8260 = vst [vmem:[#allocation26_spill] sm:$0xff] %v7271_v44  ;;  %8261 = vst [vmem:[#allocation28_spill] sm:$0xff] %v7273_v50  ;;  %v2622_v48 = vpop.f32.mrb[16].mxu0  ;;  %v3091_v41 = vadd.f32 %v3090_v53, %v7255_v11  ;;  %v3167_v38 = vmul.f32 %v7255_v11, %v7255_v11  ;;  %v3094_v37 = vadd.f32 %v7260_v32, %v7240_v47  ;;  %v7292_v52 = vmax.f32 %v5024_v26, 0.0  ;;  %v5558_v11 = vld [vmem:[#allocation6 + $0xb8] sm:$0xff]  }
 0x2b1   : > { %v4994_v60 = vadd.f32 %v2622_v48, %v7109_v63  ;;  %v2961_v62 = vpop.f32.mrb[16].mxu1  ;;  %v2624_v58 = vpop.f32.mrb[17].mxu0  ;;  %v3229_v7 = vadd.f32 %v3228_v28, %v3162_v2  ;;  %v3234_v33 = vadd.f32 %v3233_v46, %v3166_v45  ;;  %v3169_v18 = vmul.f32 %v7260_v32, %v7260_v32 }
 0x2b2   : > { %v5026_v49 = vadd.f32 %v2961_v62, %v7111_v57  ;;  %v4995_v22 = vadd.f32 %v2624_v58, %v7113_v20  ;;  %v2963_v30 = vpop.f32.mrb[17].mxu1  ;;  %v2626_v21 = vpop.f32.mrb[18].mxu0  ;;  %3092 = vadd.xlane.f32.xlu1 %v3091_v41  ;;  %8263 = vst [vmem:[#allocation20_spill] sm:$0xff] %v7292_v52  ;;  %v3172_v2 = vmul.f32 %v7271_v44, %v7271_v44  ;;  %v7299_v48 = vmax.f32 %v5025_v14, 0.0 }
 0x2b3   : > { %v7284_v12 = vmax.f32 %v4994_v60, 0.0  ;;  %v2965_v34 = vpop.f32.mrb[18].mxu1  ;;  %v2628_v54 = vpop.f32.mrb[19].mxu0  ;;  %v3230_v24 = vadd.f32 %v3229_v7, %v3163_v3  ;;  %v4996_v19 = vadd.f32 %v2626_v21, %v7109_v63  ;;  %v3173_v53 = vmul.f32 %v7273_v50, %v7273_v50 }
 0x2b4   : > { %v2967_v1 = vpop.f32.mrb[19].mxu1  ;;  %8264 = vst [vmem:[#allocation30_spill] sm:$0xff] %v7299_v48  ;;  %v3235_v28 = vadd.f32 %v3234_v33, %v3167_v38  ;;  %v7301_v41 = vmax.f32 %v5026_v49, 0.0  ;;  %v7303_v60 = vmax.f32 %v4995_v22, 0.0  ;;  %v5027_v26 = vadd.f32 %v2963_v30, %v7115_v8  ;;  %v5547_v49 = vld [vmem:[#allocation6 + $0x68] sm:$0xff]  }
 0x2b5   : > { %8262 = vst [vmem:[#allocation27_spill] sm:$0xff] %v7284_v12  ;;  %3231 = vadd.xlane.f32.xlu0 %v3230_v24  ;;  %v4997_v62 = vadd.f32 %v2628_v54, %v7113_v20  ;;  %v7309_v58 = vmul.f32 %v7284_v12, %v7284_v12  ;;  %v5028_v45 = vadd.f32 %v2965_v34, %v7111_v57  ;;  %v7315_v3 = vmax.f32 %v4996_v19, 0.0 }
 0x2b6   : > { %8265 = vst [vmem:[#allocation29_spill] sm:$0xff] %v7301_v41  ;;  %8266 = vst [vmem:[#allocation33_spill] sm:$0xff] %v7303_v60  ;;  %3236 = vadd.xlane.f32.xlu1 %v3235_v28  ;;  %v3095_v14 = vadd.f32 %v3094_v37, %v7258_v56  ;;  %v3099_v46 = vadd.f32 %v7273_v50, %v7271_v44  ;;  %v5029_v7 = vadd.f32 %v2967_v1, %v7115_v8 }
 0x2b7   : > { %8267 = vst [vmem:[#allocation31_spill] sm:$0xff] %v7315_v3  ;;  %v3170_v30 = vmul.f32 %v7258_v56, %v7258_v56  ;;  %v3238_v21 = vadd.f32 %v3169_v18, %v3168_v36  ;;  %v7320_v38 = vmax.f32 %v4997_v62, 0.0  ;;  %4796 = vmatprep.subr.bf16.mxu0 %v5547_v49  ;;  %v7325_v19 = vmax.f32 %v5027_v26, 0.0 }
 0x2b8   : > { %v2632_v22 = vpop.f32.mrb[20].mxu0  ;;  %v3096_v34 = vadd.f32 %v3095_v14, %v7267_v15  ;;  %v3100_v33 = vadd.f32 %v3099_v46, %v7292_v52  ;;  %v3177_v18 = vmul.f32 %v7303_v60, %v7303_v60  ;;  %v3171_v46 = vmul.f32 %v7267_v15, %v7267_v15 }
 0x2b9   : > { %8268 = vst [vmem:[#allocation36_spill] sm:$0xff] %v7320_v38  ;;  %v4998_v54 = vadd.f32 %v2632_v22, %v7109_v63  ;;  %v2971_v37 = vpop.f32.mrb[20].mxu1  ;;  %v2634_v24 = vpop.f32.mrb[21].mxu0  ;;  %8269 = vst [vmem:[#allocation25_spill] sm:$0xff] %v7325_v19  ;;  %v3239_v28 = vadd.f32 %v3238_v21, %v3170_v30  ;;  %v5548_v22 = vld [vmem:[#allocation6 + $0x28] sm:$0xff]   ;;  %v7338_v30 = vmul.f32 %v7315_v3, %v7315_v3  ;;  %v7340_v21 = vmax.f32 %v5028_v45, 0.0 }
 0x2ba   : > { %v5030_v1 = vadd.f32 %v2971_v37, %v7111_v57  ;;  %v4999_v44 = vadd.f32 %v2634_v24, %v7113_v20  ;;  %v2973_v56 = vpop.f32.mrb[21].mxu1  ;;  %v2636_v36 = vpop.f32.mrb[22].mxu0  ;;  %3097 = vadd.xlane.f32.xlu0 %v3096_v34  ;;  %v3101_v62 = vadd.f32 %v3100_v33, %v7299_v48  ;;  %v5549_v37 = vld [vmem:[#allocation6 + $0xe8] sm:$0xff]   ;;  %v3174_v34 = vmul.f32 %v7292_v52, %v7292_v52 }
 0x2bb   : > { %v7332_v14 = vmax.f32 %v4998_v54, 0.0  ;;  %v2975_v26 = vpop.f32.mrb[22].mxu1  ;;  %v2638_v49 = vpop.f32.mrb[23].mxu0  ;;  %8271 = vst [vmem:[#allocation35_spill] sm:$0xff] %v7340_v21  ;;  %v5000_v24 = vadd.f32 %v2636_v36, %v7109_v63  ;;  %v5550_v54 = vld [vmem:[#allocation6 + $0xa8] sm:$0xff]   ;;  %v7347_v50 = vmul.f32 %v7320_v38, %v7320_v38  ;;  %v7349_v47 = vmax.f32 %v5029_v7, 0.0  ;;  %4797 = vmatpush3.bf16.msra.mxu0 %v5548_v22  ;;  %4860 = vmatprep.subr.bf16.mxu1 %v5549_v37 }
 0x2bc   : > { %v2977_v33 = vpop.f32.mrb[23].mxu1  ;;  %3102 = vadd.xlane.f32.xlu1 %v3101_v62  ;;  %v3240_v15 = vadd.f32 %v3239_v28, %v3171_v46  ;;  %v5031_v32 = vadd.f32 %v2973_v56, %v7115_v8  ;;  %v7352_v45 = vmax.f32 %v5030_v1, 0.0  ;;  %v7354_v16 = vmax.f32 %v4999_v44, 0.0  ;;  %4861 = vmatpush3.bf16.msra.mxu1 %v5550_v54 }
 0x2bd   : > { %8270 = vst [vmem:[#allocation34_spill] sm:$0xff] %v7332_v14  ;;  %8272 = vst [vmem:[#allocation40_spill] sm:$0xff] %v7349_v47  ;;  %v3243_v36 = vadd.f32 %v3173_v53, %v3172_v2  ;;  %v5001_v52 = vadd.f32 %v2638_v49, %v7113_v20  ;;  %v7359_v51 = vmul.f32 %v7332_v14, %v7332_v14  ;;  %v7366_v1 = vmax.f32 %v5000_v24, 0.0 }
 0x2be   : > { %8273 = vst [vmem:[#allocation39_spill] sm:$0xff] %v7352_v45  ;;  %8274 = vst [vmem:[#allocation42_spill] sm:$0xff] %v7354_v16  ;;  %3241 = vadd.xlane.f32.xlu0 %v3240_v15  ;;  %v5032_v7 = vadd.f32 %v2975_v26, %v7111_v57  ;;  %v3104_v28 = vadd.f32 %v7303_v60, %v7284_v12  ;;  %v3109_v56 = vadd.f32 %v7320_v38, %v7315_v3  ;;  %v5552_v60 = vld [vmem:[#allocation6 + $0x30] sm:$0xff]  }
 0x2bf   : > { %8275 = vst [vmem:[#allocation45_spill] sm:$0xff] %v7366_v1  ;;  %v3175_v44 = vmul.f32 %v7299_v48, %v7299_v48  ;;  %v3244_v2 = vadd.f32 %v3243_v36, %v3174_v34  ;;  %v5033_v53 = vadd.f32 %v2977_v33, %v7115_v8  ;;  %v7371_v46 = vmax.f32 %v5001_v52, 0.0  ;;  %v5551_v52 = vld [vmem:[#allocation6 + $0x70] sm:$0xff]  }
 0x2c0   : > { %v2642_v62 = vpop.f32.mrb[24].mxu0  ;;  %v3105_v15 = vadd.f32 %v3104_v28, %v7301_v41  ;;  %v3110_v26 = vadd.f32 %v3109_v56, %v7340_v21  ;;  %v3178_v34 = vmul.f32 %v7301_v41, %v7301_v41  ;;  %v3248_v33 = vadd.f32 %v3177_v18, %v7309_v58  ;;  %4798 = vmatprep.subr.bf16.mxu0 %v5551_v52  ;;  %v5553_v48 = vld [vmem:[#allocation6 + $0xf0] sm:$0xff]  }
 0x2c1   : > { %8276 = vst [vmem:[#allocation43_spill] sm:$0xff] %v7371_v46  ;;  %v5002_v49 = vadd.f32 %v2642_v62, %v7109_v63  ;;  %v2981_v22 = vpop.f32.mrb[24].mxu1  ;;  %v2644_v37 = vpop.f32.mrb[25].mxu0  ;;  %v3245_v24 = vadd.f32 %v3244_v2, %v3175_v44  ;;  %v3185_v28 = vmul.f32 %v7354_v16, %v7354_v16  ;;  %v7382_v38 = vmax.f32 %v5031_v32, 0.0  ;;  %v5554_v32 = vld [vmem:[#allocation6 + $0xb0] sm:$0xff]   ;;  %4799 = vmatpush3.bf16.msra.mxu0 %v5552_v60 }
 0x2c2   : > { %v5034_v3 = vadd.f32 %v2981_v22, %v7111_v57  ;;  %v2983_v36 = vpop.f32.mrb[25].mxu1  ;;  %v2646_v54 = vpop.f32.mrb[26].mxu0  ;;  %v3106_v56 = vadd.f32 %v3105_v15, %v7325_v19  ;;  %v5003_v62 = vadd.f32 %v2644_v37, %v7113_v20  ;;  %v7386_v22 = vmax.f32 %v5032_v7, 0.0  ;;  %4862 = vmatprep.subr.bf16.mxu1 %v5553_v48 }
 0x2c3   : > { %v2985_v44 = vpop.f32.mrb[26].mxu1  ;;  %v2648_v2 = vpop.f32.mrb[27].mxu0  ;;  %3246 = vadd.xlane.f32.xlu1 %v3245_v24  ;;  %v3111_v41 = vadd.f32 %v3110_v26, %v7349_v47  ;;  %v7389_v58 = vmax.f32 %v5002_v49, 0.0  ;;  %v3249_v18 = vadd.f32 %v3248_v33, %v3178_v34  ;;  %v7393_v15 = vmul.f32 %v7366_v1, %v7366_v1  ;;  %4863 = vmatpush3.bf16.msra.mxu1 %v5554_v32 }
 0x2c4   : > { %v2987_v12 = vpop.f32.mrb[27].mxu1  ;;  %v7395_v37 = vmax.f32 %v5033_v53, 0.0  ;;  %3107 = vadd.xlane.f32.xlu0 %v3106_v56  ;;  %v3179_v7 = vmul.f32 %v7325_v19, %v7325_v19  ;;  %v5035_v26 = vadd.f32 %v2983_v36, %v7115_v8  ;;  %v3189_v49 = vmul.f32 %v7371_v46, %v7371_v46  ;;  %v5555_v19 = vld [vmem:[#allocation6 + $0x78] sm:$0xff]   ;;  %4864 = vmatprep.subr.bf16.mxu1 %v5557_v35 }
 0x2c5   : > { %v7402_v24 = vmax.f32 %v5034_v3, 0.0  ;;  %v7404_v34 = vmax.f32 %v5003_v62, 0.0  ;;  %v5004_v33 = vadd.f32 %v2646_v54, %v7109_v63  ;;  %v5036_v53 = vadd.f32 %v2985_v44, %v7111_v57  ;;  %4800 = vmatprep.subr.bf16.mxu0 %v5555_v19 }
 0x2c6   : > { %v3250_v52 = vadd.f32 %v3249_v18, %v3179_v7  ;;  %v3182_v56 = vmul.f32 %v7340_v21, %v7340_v21  ;;  %v3253_v36 = vadd.f32 %v7347_v50, %v7338_v30  ;;  %v7414_v3 = vmul.f32 %v7389_v58, %v7389_v58 }
 0x2c7   : > { %3112 = vadd.xlane.f32.xlu1 %v3111_v41  ;;  %v5005_v62 = vadd.f32 %v2648_v2, %v7113_v20  ;;  %v3114_v48 = vadd.f32 %v7354_v16, %v7332_v14  ;;  %v3119_v60 = vadd.f32 %v7371_v46, %v7366_v1  ;;  %v7421_v44 = vmax.f32 %v5035_v26, 0.0  ;;  %4865 = vmatpush3.bf16.msra.mxu1 %v5558_v11 }
 0x2c8   : > { %v2652_v54 = vpop.f32.mrb[28].mxu0  ;;  %3251 = vadd.xlane.f32.xlu0 %v3250_v52  ;;  %v3183_v50 = vmul.f32 %v7349_v47, %v7349_v47  ;;  %v3254_v41 = vadd.f32 %v3253_v36, %v3182_v56  ;;  %v7426_v7 = vmax.f32 %v5004_v33, 0.0  ;;  %v3193_v26 = vmul.f32 %v7404_v34, %v7404_v34 }
 0x2c9   : > { %v5006_v30 = vadd.f32 %v2652_v54, %v7109_v63  ;;  %v2991_v18 = vpop.f32.mrb[28].mxu1  ;;  %v2654_v32 = vpop.f32.mrb[29].mxu0  ;;  %v3115_v2 = vadd.f32 %v3114_v48, %v7352_v45  ;;  %v3120_v14 = vadd.f32 %v3119_v60, %v7386_v22  ;;  %v7433_v16 = vmax.f32 %v5036_v53, 0.0 }
 0x2ca   : > { %v5038_v1 = vadd.f32 %v2991_v18, %v7111_v57  ;;  %v2993_v46 = vpop.f32.mrb[29].mxu1  ;;  %v2656_v52 = vpop.f32.mrb[30].mxu0  ;;  %v3255_v56 = vadd.f32 %v3254_v41, %v3183_v50  ;;  %v5037_v36 = vadd.f32 %v2987_v12, %v7115_v8  ;;  %v7436_v33 = vmax.f32 %v5005_v62, 0.0  ;;  %v5556_v62 = vld [vmem:[#allocation6 + $0x38] sm:$0xff]  }
 0x2cb   : > { %v2995_v54 = vpop.f32.mrb[30].mxu1  ;;  %v2658_v21 = vpop.f32.mrb[31].mxu0  ;;  %v3116_v48 = vadd.f32 %v3115_v2, %v7382_v38  ;;  %v3186_v60 = vmul.f32 %v7352_v45, %v7352_v45  ;;  %v3258_v18 = vadd.f32 %v3185_v28, %v7359_v51  ;;  %v3121_v53 = vadd.f32 %v3120_v14, %v7395_v37  ;;  %4801 = vmatpush3.bf16.msra.mxu0 %v5556_v62 }
 0x2cc   : > { %v2997_v47 = vpop.f32.mrb[31].mxu1  ;;  %3256 = vadd.xlane.f32.xlu1 %v3255_v56  ;;  %v5007_v50 = vadd.f32 %v2654_v32, %v7113_v20  ;;  %v5039_v12 = vadd.f32 %v2993_v46, %v7115_v8  ;;  %v5008_v41 = vadd.f32 %v2656_v52, %v7109_v63  ;;  %v3196_v2 = vmul.f32 %v7426_v7, %v7426_v7 }
 0x2cd   : > { %3117 = vadd.xlane.f32.xlu0 %v3116_v48  ;;  %v3187_v51 = vmul.f32 %v7382_v38, %v7382_v38  ;;  %v3259_v28 = vadd.f32 %v3258_v18, %v3186_v60  ;;  %v5040_v56 = vadd.f32 %v2995_v54, %v7111_v57  ;;  %v7451_v14 = vmax.f32 %v5037_v36, 0.0 }
 0x2ce   : > { %v7453_v32 = vmax.f32 %v5006_v30, 0.0  ;;  %v3190_v63 = vmul.f32 %v7386_v22, %v7386_v22  ;;  %v3263_v46 = vadd.f32 %v3189_v49, %v7393_v15  ;;  %v7458_v45 = vmax.f32 %v5007_v50, 0.0 }
 0x2cf   : > { %v3260_v52 = vadd.f32 %v3259_v28, %v3187_v51  ;;  %v5009_v48 = vadd.f32 %v2658_v21, %v7113_v20  ;;  %v5041_v60 = vadd.f32 %v2997_v47, %v7115_v8  ;;  %v3197_v57 = vmul.f32 %v7436_v33, %v7436_v33 }
 0x2d0   : > { %3122 = vadd.xlane.f32.xlu1 %v3121_v53  ;;  %v3191_v30 = vmul.f32 %v7395_v37, %v7395_v37  ;;  %v3264_v36 = vadd.f32 %v3263_v46, %v3190_v63  ;;  %v3124_v35 = vadd.f32 %v7404_v34, %v7389_v58  ;;  %v7468_v19 = vmax.f32 %v5038_v1, 0.0 }
 0x2d1   : > { %3261 = vadd.xlane.f32.xlu0 %v3260_v52  ;;  %v7470_v15 = vmax.f32 %v5008_v41, 0.0  ;;  %v7472_v20 = vmax.f32 %v5009_v48, 0.0  ;;  %v3129_v8 = vadd.f32 %v7436_v33, %v7426_v7  ;;  %v3194_v21 = vmul.f32 %v7402_v24, %v7402_v24 }
 0x2d2   : > { %v3265_v47 = vadd.f32 %v3264_v36, %v3191_v30  ;;  %v3125_v11 = vadd.f32 %v3124_v35, %v7402_v24  ;;  %v3268_v49 = vadd.f32 %v3193_v26, %v7414_v3  ;;  %v3200_v1 = vmul.f32 %v7453_v32, %v7453_v32 }
 0x2d3   : > { %8277 = vst [vmem:[#allocation48_spill] sm:$0xff] %v7470_v15  ;;  %8278 = vst [vmem:[#allocation38_spill] sm:$0xff] %v7472_v20  ;;  %v3201_v54 = vmul.f32 %v7458_v45, %v7458_v45  ;;  %v3130_v18 = vadd.f32 %v3129_v8, %v7433_v16  ;;  %v3198_v53 = vmul.f32 %v7433_v16, %v7433_v16  ;;  %v7492_v26 = vmax.f32 %v5040_v56, 0.0 }
 0x2d4   : > { %3266 = vadd.xlane.f32.xlu1 %v3265_v47  ;;  %v3126_v50 = vadd.f32 %v3125_v11, %v7421_v44  ;;  %v3269_v41 = vadd.f32 %v3268_v49, %v3194_v21  ;;  %v3273_v62 = vadd.f32 %v3197_v57, %v3196_v2  ;;  %v3134_v51 = vadd.f32 %v7458_v45, %v7453_v32 }
 0x2d5   : > { %v3204_v3 = vmul.f32 %v7470_v15, %v7470_v15  ;;  %8279 = vst [vmem:[#allocation32_spill] sm:$0xff] %v7492_v26  ;;  %v3131_v28 = vadd.f32 %v3130_v18, %v7451_v14  ;;  %v3139_v63 = vadd.f32 %v7472_v20, %v7470_v15  ;;  %v3205_v46 = vmul.f32 %v7472_v20, %v7472_v20 }
 0x2d6   : > { %3127 = vadd.xlane.f32.xlu0 %v3126_v50  ;;  %v3195_v2 = vmul.f32 %v7421_v44, %v7421_v44  ;;  %v3274_v52 = vadd.f32 %v3273_v62, %v3198_v53  ;;  %v3135_v48 = vadd.f32 %v3134_v51, %v7468_v19  ;;  %v7502_v57 = vmax.f32 %v5039_v12, 0.0 }
 0x2d7   : > { %v3199_v30 = vmul.f32 %v7451_v14, %v7451_v14  ;;  %v3140_v36 = vadd.f32 %v3139_v63, %v7492_v26  ;;  %v3278_v35 = vadd.f32 %v3201_v54, %v3200_v1  ;;  %v7507_v8 = vmax.f32 %v5041_v60, 0.0 }
 0x2d8   : > { %3132 = vadd.xlane.f32.xlu1 %v3131_v28  ;;  %v3270_v56 = vadd.f32 %v3269_v41, %v3195_v2  ;;  %v3136_v11 = vadd.f32 %v3135_v48, %v7502_v57  ;;  %v3202_v21 = vmul.f32 %v7468_v19, %v7468_v19  ;;  %v3283_v49 = vadd.f32 %v3205_v46, %v3204_v3 }
 0x2d9   : > { %8280 = vst [vmem:[#allocation41_spill] sm:$0xff] %v7507_v8  ;;  %v3275_v47 = vadd.f32 %v3274_v52, %v3199_v30  ;;  %v3141_v12 = vadd.f32 %v3140_v36, %v7507_v8  ;;  %v3206_v53 = vmul.f32 %v7492_v26, %v7492_v26  ;;  %v3203_v60 = vmul.f32 %v7502_v57, %v7502_v57 }
 0x2da   : > { %3271 = vadd.xlane.f32.xlu0 %v3270_v56  ;;  %v3279_v18 = vadd.f32 %v3278_v35, %v3202_v21  ;;  %v3207_v50 = vmul.f32 %v7507_v8, %v7507_v8 }
 0x2db   : > { %v3284_v1 = vadd.f32 %v3283_v49, %v3206_v53 }
 0x2dc   : > { %3276 = vadd.xlane.f32.xlu1 %v3275_v47  ;;  %v3280_v54 = vadd.f32 %v3279_v18, %v3203_v60 }
 0x2dd   : > { %v3285_v41 = vadd.f32 %v3284_v1, %v3207_v50 }
 0x2de   : > { %3137 = vadd.xlane.f32.xlu0 %v3136_v11 }
 0x2e0   : > { %3142 = vadd.xlane.f32.xlu1 %v3141_v12 }
 0x2e2   : > { %3281 = vadd.xlane.f32.xlu0 %v3280_v54 }
 0x2e4   : > { %3286 = vadd.xlane.f32.xlu1 %v3285_v41 }
 0x329   : > { %v3068_v62 = vpop.xlane.xlu0 %3067 }
 0x32a   : > { %v7519_v51 = vmul.f32 0.001953125, %v3068_v62 }
 0x32b   : > { %v3073_v3 = vpop.xlane.xlu1 %3072 }
 0x32c   : > { %v3289_v63 = vmul.f32 0.001953125, %v3073_v3  ;;  %v3320_v46 = vmul.f32 %v7519_v51, %v7519_v51 }
 0x32d   : > { %v3212_v28 = vpop.xlane.xlu0 %3211 }
 0x32e   : > { %v3304_v2 = vmul.f32 0.001953125, %v3212_v28  ;;  %v3321_v30 = vmul.f32 %v3289_v63, %v3289_v63 }
 0x330   : > { %v3336_v52 = vsub.f32 %v3304_v2, %v3320_v46  ;;  %v3217_v48 = vpop.xlane.xlu1 %3216 }
 0x331   : > { %v3305_v36 = vmul.f32 0.001953125, %v3217_v48 }
 0x332   : > { %v3352_v56 = vmax.f32 %v3336_v52, 0.0  ;;  %v3078_v11 = vpop.xlane.xlu0 %3077 }
 0x333   : > { %v3337_v47 = vsub.f32 %v3305_v36, %v3321_v30  ;;  %v7523_v21 = vmul.f32 0.001953125, %v3078_v11 }
 0x334   : > { %v3432_v35 = vadd.f32 1e-05, %v3352_v56  ;;  %v3083_v49 = vpop.xlane.xlu1 %3082 }
 0x335   : > { %v3353_v12 = vmax.f32 %v3337_v47, 0.0  ;;  %v7525_v18 = vmul.f32 0.001953125, %v3083_v49  ;;  %v3322_v1 = vmul.f32 %v7523_v21, %v7523_v21  ;;  %v3370_v47 = vsub.f32 %v7130_v6, %v7519_v51 }
 0x336   : > { %5599 = vrsqrt.f32 %v3432_v35  ;;  %v3368_v35 = vsub.f32 %v7120_v43, %v7519_v51  ;;  %v3373_v43 = vsub.f32 %v7136_v59, %v3289_v63 }
 0x337   : > { %v3433_v53 = vadd.f32 1e-05, %v3353_v12  ;;  %v3222_v60 = vpop.xlane.xlu0 %3221  ;;  %v3323_v62 = vmul.f32 %v7525_v18, %v7525_v18  ;;  %v3369_v12 = vsub.f32 %v7124_v29, %v7519_v51 }
 0x338   : > { %v3306_v54 = vmul.f32 0.001953125, %v3222_v60  ;;  %v3372_v60 = vsub.f32 %v7132_v13, %v3289_v63 }
 0x339   : > { %5601 = vrsqrt.f32 %v3433_v53  ;;  %v3371_v53 = vsub.f32 %v7141_v4, %v7519_v51 }
 0x33a   : > { %v3227_v50 = vpop.xlane.xlu1 %3226  ;;  %v3338_v41 = vsub.f32 %v3306_v54, %v3322_v1  ;;  %v3374_v1 = vsub.f32 %v7143_v23, %v3289_v63 }
 0x33b   : > { %v3307_v3 = vmul.f32 0.001953125, %v3227_v50  ;;  %v3088_v28 = vpop.xlane.xlu0 %3087  ;;  %v3375_v50 = vsub.f32 %v7153_v31, %v3289_v63 }
 0x33c   : > { %v3354_v46 = vmax.f32 %v3338_v41, 0.0  ;;  %v7531_v56 = vmul.f32 0.001953125, %v3088_v28 }
 0x33d   : > { %v3339_v2 = vsub.f32 %v3307_v3, %v3323_v62 }
 0x33e   : > { %v3434_v52 = vadd.f32 1e-05, %v3354_v46  ;;  %v3324_v6 = vmul.f32 %v7531_v56, %v7531_v56 }
 0x33f   : > { %v3355_v48 = vmax.f32 %v3339_v2, 0.0  ;;  %v3093_v30 = vpop.xlane.xlu1 %3092 }
 0x340   : > { %v5600_v36 = vpop.eup %5599  ;;  %v7537_v11 = vmul.f32 0.001953125, %v3093_v30  ;;  %5603 = vrsqrt.f32 %v3434_v52 }
 0x341   : > { %v3435_v49 = vadd.f32 1e-05, %v3355_v48  ;;  %v3465_v3 = vmul.f32 %v5600_v36, %v3369_v12  ;;  %v3467_v13 = vmul.f32 %v5600_v36, %v3371_v53  ;;  %v3464_v28 = vmul.f32 %v5600_v36, %v3368_v35 }
 0x342   : > { %v3232_v54 = vpop.xlane.xlu0 %3231  ;;  %v3325_v4 = vmul.f32 %v7537_v11, %v7537_v11  ;;  %v3466_v31 = vmul.f32 %v5600_v36, %v3370_v47  ;;  %v3377_v35 = vsub.f32 %v7164_v25, %v7523_v21  ;;  %v3381_v36 = vsub.f32 %v7173_v9, %v7525_v18 }
 0x343   : > { %5605 = vrsqrt.f32 %v3435_v49  ;;  %v3308_v41 = vmul.f32 0.001953125, %v3232_v54  ;;  %v3237_v62 = vpop.xlane.xlu1 %3236  ;;  %v5602_v29 = vpop.eup %5601  ;;  %v3379_v47 = vsub.f32 %v7186_v17, %v7523_v21  ;;  %v3380_v25 = vsub.f32 %v7168_v61, %v7525_v18 }
 0x344   : > { %v3309_v51 = vmul.f32 0.001953125, %v3237_v62  ;;  %v3469_v46 = vmul.f32 %v5602_v29, %v3373_v43  ;;  %v3471_v2 = vmul.f32 %v5602_v29, %v3375_v50  ;;  %v3468_v59 = vmul.f32 %v5602_v29, %v3372_v60 }
 0x345   : > { %v3340_v23 = vsub.f32 %v3308_v41, %v3324_v6  ;;  %v3470_v63 = vmul.f32 %v5602_v29, %v3374_v1  ;;  %v3376_v1 = vsub.f32 %v7160_v5, %v7523_v21  ;;  %v3383_v6 = vsub.f32 %v7209_v27, %v7525_v18 }
 0x346   : > { %v3341_v52 = vsub.f32 %v3309_v51, %v3325_v4  ;;  %v3529_v49 = vpack.c.bf16 %v3469_v46, %v3465_v3  ;;  %v3531_v54 = vpack.c.bf16 %v3471_v2, %v3467_v13  ;;  %v3528_v26 = vpack.c.bf16 %v3468_v59, %v3464_v28 }
 0x347   : > { %v3356_v48 = vmax.f32 %v3340_v23, 0.0  ;;  %v3098_v30 = vpop.xlane.xlu0 %3097  ;;  %v3530_v8 = vpack.c.bf16 %v3470_v63, %v3466_v31  ;;  %v3382_v5 = vsub.f32 %v7192_v10, %v7525_v18  ;;  %v3385_v63 = vsub.f32 %v7211_v40, %v7531_v56  ;;  %v8283_v40 = vld [vmem:[#allocation15_spill] sm:$0xff] }
 0x348   : > { %v3357_v12 = vmax.f32 %v3341_v52, 0.0  ;;  %v7551_v15 = vmul.f32 0.001953125, %v3098_v30  ;;  %3855 = vmatprep.mubr.bf16.mxu0 %v3529_v49  ;;  %3952 = vmatprep.mubr.bf16.mxu1 %v3531_v54  ;;  %v3387_v30 = vsub.f32 %v7228_v42, %v7531_v56  ;;  %v3384_v49 = vsub.f32 %v7205_v0, %v7531_v56  ;;  %v8284_v0 = vld [vmem:[#allocation19_spill] sm:$0xff] }
 0x349   : > { %v3436_v20 = vadd.f32 1e-05, %v3356_v48  ;;  %v3103_v60 = vpop.xlane.xlu1 %3102  ;;  %3856 = vmatmul.mubr.bf16.vlgmr.msra.gmra.mrb[32].mxu0 %v3528_v26  ;;  %3953 = vmatmul.mubr.bf16.vlgmr.msra.gmra.mrb[32].mxu1 %v3530_v8  ;;  %v3378_v26 = vsub.f32 %v7184_v39, %v7523_v21 }
 0x34a   : > { %v3437_v53 = vadd.f32 1e-05, %v3357_v12  ;;  %v5604_v43 = vpop.eup %5603  ;;  %v3326_v9 = vmul.f32 %v7551_v15, %v7551_v15  ;;  %v3389_v12 = vsub.f32 %v7223_v55, %v7537_v11 }
 0x34b   : > { %5607 = vrsqrt.f32 %v3436_v20  ;;  %v3242_v50 = vpop.xlane.xlu0 %3241  ;;  %v7571_v20 = vmul.f32 0.001953125, %v3103_v60  ;;  %v3473_v41 = vmul.f32 %v5604_v43, %v3377_v35  ;;  %v3475_v62 = vmul.f32 %v5604_v43, %v3379_v47  ;;  %v8281_v35 = vld [vmem:[#allocation24_spill] sm:$0xff]  ;;  %v8282_v60 = vld [vmem:[#allocation18_spill] sm:$0xff] }
 0x34c   : > { %5609 = vrsqrt.f32 %v3437_v53  ;;  %v3310_v17 = vmul.f32 0.001953125, %v3242_v50  ;;  %v3472_v27 = vmul.f32 %v5604_v43, %v3376_v1  ;;  %v3474_v51 = vmul.f32 %v5604_v43, %v3378_v26 }
 0x34d   : > { %v5606_v8 = vpop.eup %5605  ;;  %v3327_v10 = vmul.f32 %v7571_v20, %v7571_v20  ;;  %v3391_v53 = vsub.f32 %v8281_v35, %v7537_v11  ;;  %v3386_v47 = vsub.f32 %v8283_v40, %v7531_v56  ;;  %v8288_v40 = vld [vmem:[#allocation28_spill] sm:$0xff] }
 0x34e   : > { %v3342_v3 = vsub.f32 %v3310_v17, %v3326_v9  ;;  %v3477_v29 = vmul.f32 %v5606_v8, %v3381_v36  ;;  %v3479_v61 = vmul.f32 %v5606_v8, %v3383_v6  ;;  %v3476_v4 = vmul.f32 %v5606_v8, %v3380_v25 }
 0x34f   : > { %v3478_v39 = vmul.f32 %v5606_v8, %v3382_v5  ;;  %v3388_v36 = vsub.f32 %v8282_v60, %v7537_v11  ;;  %v3390_v6 = vsub.f32 %v8284_v0, %v7537_v11  ;;  %v8290_v0 = vld [vmem:[#allocation30_spill] sm:$0xff] }
 0x350   : > { %v3358_v21 = vmax.f32 %v3342_v3, 0.0  ;;  %v3247_v13 = vpop.xlane.xlu1 %3246  ;;  %v3533_v28 = vpack.c.bf16 %v3477_v29, %v3473_v41  ;;  %v3535_v23 = vpack.c.bf16 %v3479_v61, %v3475_v62  ;;  %v3532_v46 = vpack.c.bf16 %v3476_v4, %v3472_v27 }
 0x351   : > { %v3311_v18 = vmul.f32 0.001953125, %v3247_v13  ;;  %v3108_v2 = vpop.xlane.xlu0 %3107  ;;  %v3534_v59 = vpack.c.bf16 %v3478_v39, %v3474_v51 }
 0x352   : > { %v3438_v52 = vadd.f32 1e-05, %v3358_v21  ;;  %v7575_v31 = vmul.f32 0.001953125, %v3108_v2  ;;  %3863 = vmatprep.mubr.bf16.mxu0 %v3533_v28  ;;  %3960 = vmatprep.mubr.bf16.mxu1 %v3535_v23 }
 0x353   : > { %v3343_v48 = vsub.f32 %v3311_v18, %v3327_v10  ;;  %3864 = vmatmul.mubr.bf16.gmra.mrb[36].mxu0 %v3532_v46  ;;  %3961 = vmatmul.mubr.bf16.gmra.mrb[36].mxu1 %v3534_v59  ;;  %v8285_v59 = vld [vmem:[#allocation22_spill] sm:$0xff] }
 0x354   : > { %v3113_v54 = vpop.xlane.xlu1 %3112  ;;  %5611 = vrsqrt.f32 %v3438_v52  ;;  %v3328_v55 = vmul.f32 %v7575_v31, %v7575_v31  ;;  %v3393_v52 = vsub.f32 %v8285_v59, %v7551_v15 }
 0x355   : > { %v5608_v1 = vpop.eup %5607  ;;  %v3359_v43 = vmax.f32 %v3343_v48, 0.0  ;;  %v7591_v42 = vmul.f32 0.001953125, %v3113_v54  ;;  %v3252_v50 = vpop.xlane.xlu0 %3251 }
 0x356   : > { %v5610_v25 = vpop.eup %5609  ;;  %v3312_v26 = vmul.f32 0.001953125, %v3252_v50  ;;  %v3481_v9 = vmul.f32 %v5608_v1, %v3385_v63  ;;  %v3483_v17 = vmul.f32 %v5608_v1, %v3387_v30  ;;  %v3480_v56 = vmul.f32 %v5608_v1, %v3384_v49  ;;  %v8286_v63 = vld [vmem:[#allocation23_spill] sm:$0xff] }
 0x357   : > { %v3439_v5 = vadd.f32 1e-05, %v3359_v43  ;;  %v3485_v8 = vmul.f32 %v5610_v25, %v3389_v12  ;;  %v3487_v41 = vmul.f32 %v5610_v25, %v3391_v53  ;;  %v3484_v27 = vmul.f32 %v5610_v25, %v3388_v36  ;;  %v8287_v12 = vld [vmem:[#allocation21_spill] sm:$0xff] }
 0x358   : > { %v3344_v62 = vsub.f32 %v3312_v26, %v3328_v55  ;;  %v3482_v3 = vmul.f32 %v5608_v1, %v3386_v47  ;;  %v3486_v29 = vmul.f32 %v5610_v25, %v3390_v6  ;;  %v3329_v61 = vmul.f32 %v7591_v42, %v7591_v42  ;;  %v8289_v1 = vld [vmem:[#allocation17_spill] sm:$0xff]  ;;  %v8291_v25 = vld [vmem:[#allocation26_spill] sm:$0xff]  ;;  %v8292_v26 = vld [vmem:[#allocation20_spill] sm:$0xff] }
 0x359   : > { %5613 = vrsqrt.f32 %v3439_v5  ;;  %v3257_v11 = vpop.xlane.xlu1 %3256  ;;  %v3537_v4 = vpack.c.bf16 %v3485_v8, %v3481_v9  ;;  %v3539_v51 = vpack.c.bf16 %v3487_v41, %v3483_v17  ;;  %v3536_v28 = vpack.c.bf16 %v3484_v27, %v3480_v56  ;;  %v8293_v8 = vld [vmem:[#allocation33_spill] sm:$0xff] }
 0x35a   : > { %v3360_v39 = vmax.f32 %v3344_v62, 0.0  ;;  %v3313_v21 = vmul.f32 0.001953125, %v3257_v11  ;;  %v3118_v13 = vpop.xlane.xlu0 %3117  ;;  %v3538_v23 = vpack.c.bf16 %v3486_v29, %v3482_v3  ;;  %v3395_v48 = vsub.f32 %v8286_v63, %v7551_v15  ;;  %v8294_v56 = vld [vmem:[#allocation25_spill] sm:$0xff] }
 0x35b   : > { %v7599_v46 = vmul.f32 0.001953125, %v3118_v13  ;;  %3871 = vmatprep.mubr.bf16.mxu0 %v3537_v4  ;;  %3968 = vmatprep.mubr.bf16.mxu1 %v3539_v51  ;;  %v3392_v35 = vsub.f32 %v8287_v12, %v7551_v15  ;;  %v3397_v47 = vsub.f32 %v8288_v40, %v7571_v20  ;;  %v3394_v43 = vsub.f32 %v8289_v1, %v7551_v15  ;;  %v8295_v15 = vld [vmem:[#allocation27_spill] sm:$0xff] }
 0x35c   : > { %v3440_v10 = vadd.f32 1e-05, %v3360_v39  ;;  %v3345_v18 = vsub.f32 %v3313_v21, %v3329_v61  ;;  %3872 = vmatmul.mubr.bf16.gmra.mrb[40].mxu0 %v3536_v28  ;;  %3969 = vmatmul.mubr.bf16.gmra.mrb[40].mxu1 %v3538_v23  ;;  %v3399_v6 = vsub.f32 %v8290_v0, %v7571_v20  ;;  %v3396_v55 = vsub.f32 %v8291_v25, %v7571_v20  ;;  %v8296_v61 = vld [vmem:[#allocation29_spill] sm:$0xff] }
 0x35d   : > { %v3123_v2 = vpop.xlane.xlu1 %3122  ;;  %v3330_v60 = vmul.f32 %v7599_v46, %v7599_v46  ;;  %v3398_v9 = vsub.f32 %v8292_v26, %v7571_v20  ;;  %v3401_v41 = vsub.f32 %v8293_v8, %v7575_v31  ;;  %v3403_v62 = vsub.f32 %v8294_v56, %v7575_v31 }
 0x35e   : > { %5615 = vrsqrt.f32 %v3440_v10  ;;  %v3361_v30 = vmax.f32 %v3345_v18, 0.0  ;;  %v7605_v49 = vmul.f32 0.001953125, %v3123_v2  ;;  %v3262_v54 = vpop.xlane.xlu0 %3261  ;;  %v5612_v53 = vpop.eup %5611  ;;  %v3400_v27 = vsub.f32 %v8295_v15, %v7575_v31 }
 0x35f   : > { %v3314_v36 = vmul.f32 0.001953125, %v3262_v54  ;;  %v3402_v11 = vsub.f32 %v8296_v61, %v7575_v31  ;;  %v3489_v39 = vmul.f32 %v5612_v53, %v3393_v52  ;;  %v3491_v21 = vmul.f32 %v5612_v53, %v3395_v48 }
 0x360   : > { %v3441_v50 = vadd.f32 1e-05, %v3361_v30  ;;  %v3331_v3 = vmul.f32 %v7605_v49, %v7605_v49  ;;  %v3488_v13 = vmul.f32 %v5612_v53, %v3392_v35  ;;  %v3490_v30 = vmul.f32 %v5612_v53, %v3394_v43  ;;  %v8298_v53 = vld [vmem:[#allocation40_spill] sm:$0xff] }
 0x361   : > { %v3346_v17 = vsub.f32 %v3314_v36, %v3330_v60  ;;  %v3267_v5 = vpop.xlane.xlu1 %3266  ;;  %v8297_v36 = vld [vmem:[#allocation36_spill] sm:$0xff]  ;;  %v3407_v43 = vsub.f32 %v8298_v53, %v7591_v42 }
 0x362   : > { %5617 = vrsqrt.f32 %v3441_v50  ;;  %v3315_v29 = vmul.f32 0.001953125, %v3267_v5  ;;  %v3405_v40 = vsub.f32 %v8297_v36, %v7591_v42  ;;  %v8301_v5 = vld [vmem:[#allocation42_spill] sm:$0xff] }
 0x363   : > { %v5614_v20 = vpop.eup %5613  ;;  %v3362_v4 = vmax.f32 %v3346_v17, 0.0  ;;  %v3128_v51 = vpop.xlane.xlu0 %3127  ;;  %v3409_v8 = vsub.f32 %v8301_v5, %v7599_v46 }
 0x364   : > { %v3347_v28 = vsub.f32 %v3315_v29, %v3331_v3  ;;  %v7631_v23 = vmul.f32 0.001953125, %v3128_v51  ;;  %v3493_v10 = vmul.f32 %v5614_v20, %v3397_v47  ;;  %v3495_v18 = vmul.f32 %v5614_v20, %v3399_v6 }
 0x365   : > { %v3442_v2 = vadd.f32 1e-05, %v3362_v4  ;;  %v3133_v59 = vpop.xlane.xlu1 %3132  ;;  %v3492_v63 = vmul.f32 %v5614_v20, %v3396_v55  ;;  %v3494_v54 = vmul.f32 %v5614_v20, %v3398_v9  ;;  %v8299_v55 = vld [vmem:[#allocation31_spill] sm:$0xff]  ;;  %v3411_v51 = vsub.f32 %v7382_v38, %v7599_v46 }
 0x366   : > { %v3363_v12 = vmax.f32 %v3347_v28, 0.0  ;;  %v7633_v60 = vmul.f32 0.001953125, %v3133_v59  ;;  %v3541_v31 = vpack.c.bf16 %v3493_v10, %v3489_v39  ;;  %v3543_v48 = vpack.c.bf16 %v3495_v18, %v3491_v21  ;;  %v8300_v9 = vld [vmem:[#allocation35_spill] sm:$0xff] }
 0x367   : > { %5619 = vrsqrt.f32 %v3442_v2  ;;  %v3272_v52 = vpop.xlane.xlu0 %3271  ;;  %v3540_v35 = vpack.c.bf16 %v3492_v63, %v3488_v13  ;;  %v3542_v1 = vpack.c.bf16 %v3494_v54, %v3490_v30  ;;  %v3332_v0 = vmul.f32 %v7631_v23, %v7631_v23 }
 0x368   : > { %v5616_v50 = vpop.eup %5615  ;;  %v3443_v47 = vadd.f32 1e-05, %v3363_v12  ;;  %v3316_v6 = vmul.f32 0.001953125, %v3272_v52  ;;  %3879 = vmatprep.mubr.bf16.mxu0 %v3541_v31  ;;  %3976 = vmatprep.mubr.bf16.mxu1 %v3543_v48  ;;  %v3404_v26 = vsub.f32 %v8299_v55, %v7591_v42  ;;  %v3406_v17 = vsub.f32 %v8300_v9, %v7591_v42 }
 0x369   : > { %v3277_v25 = vpop.xlane.xlu1 %3276  ;;  %3880 = vmatmul.mubr.bf16.gmra.mrb[44].mxu0 %v3540_v35  ;;  %v3333_v15 = vmul.f32 %v7633_v60, %v7633_v60  ;;  %3977 = vmatmul.mubr.bf16.gmra.mrb[44].mxu1 %v3542_v1  ;;  %v3497_v61 = vmul.f32 %v5616_v50, %v3401_v41  ;;  %v3499_v20 = vmul.f32 %v5616_v50, %v3403_v62  ;;  %v8302_v41 = vld [vmem:[#allocation34_spill] sm:$0xff] }
 0x36a   : > { %5621 = vrsqrt.f32 %v3443_v47  ;;  %v3348_v56 = vsub.f32 %v3316_v6, %v3332_v0  ;;  %v3317_v3 = vmul.f32 0.001953125, %v3277_v25  ;;  %v3496_v4 = vmul.f32 %v5616_v50, %v3400_v27  ;;  %v8304_v6 = vld [vmem:[#allocation39_spill] sm:$0xff] }
 0x36b   : > { %v3138_v29 = vpop.xlane.xlu0 %3137  ;;  %v3498_v28 = vmul.f32 %v5616_v50, %v3402_v11  ;;  %v3408_v62 = vsub.f32 %v8302_v41, %v7599_v46  ;;  %v8303_v50 = vld [vmem:[#allocation43_spill] sm:$0xff]  ;;  %v3415_v0 = vsub.f32 %v7395_v37, %v7605_v49  ;;  %v3410_v53 = vsub.f32 %v8304_v6, %v7599_v46  ;;  %v8309_v6 = vld [vmem:[#allocation32_spill] sm:$0xff] }
 0x36c   : > { %v5618_v39 = vpop.eup %5617  ;;  %v3364_v21 = vmax.f32 %v3348_v56, 0.0  ;;  %v3349_v42 = vsub.f32 %v3317_v3, %v3333_v15  ;;  %v7651_v13 = vmul.f32 0.001953125, %v3138_v29  ;;  %v3413_v47 = vsub.f32 %v8303_v50, %v7605_v49  ;;  %v8307_v50 = vld [vmem:[#allocation41_spill] sm:$0xff] }
 0x36d   : > { %v3143_v10 = vpop.xlane.xlu1 %3142  ;;  %v3501_v18 = vmul.f32 %v5618_v39, %v3405_v40  ;;  %v3503_v2 = vmul.f32 %v5618_v39, %v3407_v43  ;;  %v3500_v59 = vmul.f32 %v5618_v39, %v3404_v26  ;;  %v3502_v63 = vmul.f32 %v5618_v39, %v3406_v17  ;;  %v8305_v17 = vld [vmem:[#allocation45_spill] sm:$0xff] }
 0x36e   : > { %v3444_v30 = vadd.f32 1e-05, %v3364_v21  ;;  %v3365_v54 = vmax.f32 %v3349_v42, 0.0  ;;  %v7653_v12 = vmul.f32 0.001953125, %v3143_v10  ;;  %v3334_v11 = vmul.f32 %v7651_v13, %v7651_v13 }
 0x36f   : > { %v3282_v27 = vpop.xlane.xlu0 %3281  ;;  %v3545_v38 = vpack.c.bf16 %v3501_v18, %v3497_v61  ;;  %v3547_v31 = vpack.c.bf16 %v3503_v2, %v3499_v20  ;;  %v3544_v36 = vpack.c.bf16 %v3500_v59, %v3496_v4  ;;  %v3546_v52 = vpack.c.bf16 %v3502_v63, %v3498_v28 }
 0x370   : > { %5623 = vrsqrt.f32 %v3444_v30  ;;  %v3445_v48 = vadd.f32 1e-05, %v3365_v54  ;;  %v3318_v40 = vmul.f32 0.001953125, %v3282_v27  ;;  %v3335_v25 = vmul.f32 %v7653_v12, %v7653_v12 }
 0x371   : > { %v5620_v35 = vpop.eup %5619  ;;  %v3287_v1 = vpop.xlane.xlu1 %3286  ;;  %3887 = vmatprep.mubr.bf16.mxu0 %v3545_v38  ;;  %3984 = vmatprep.mubr.bf16.mxu1 %v3547_v31  ;;  %v3412_v5 = vsub.f32 %v8305_v17, %v7605_v49  ;;  %v3414_v56 = vsub.f32 %v7386_v22, %v7605_v49  ;;  %v3417_v22 = vsub.f32 %v7404_v34, %v7631_v23 }
 0x372   : > { %5625 = vrsqrt.f32 %v3445_v48  ;;  %v3350_v43 = vsub.f32 %v3318_v40, %v3334_v11  ;;  %v3319_v55 = vmul.f32 0.001953125, %v3287_v1  ;;  %3888 = vmatmul.mubr.bf16.gmra.mrb[48].mxu0 %v3544_v36  ;;  %3985 = vmatmul.mubr.bf16.gmra.mrb[48].mxu1 %v3546_v52  ;;  %v3505_v26 = vmul.f32 %v5620_v35, %v3409_v8 }
 0x373   : > { %v3507_v9 = vmul.f32 %v5620_v35, %v3411_v51  ;;  %v3504_v46 = vmul.f32 %v5620_v35, %v3408_v62  ;;  %v3506_v29 = vmul.f32 %v5620_v35, %v3410_v53  ;;  %v3419_v2 = vsub.f32 %v7421_v44, %v7631_v23  ;;  %v8306_v35 = vld [vmem:[#allocation38_spill] sm:$0xff] }
 0x374   : > { %v5622_v37 = vpop.eup %5621  ;;  %v3366_v15 = vmax.f32 %v3350_v43, 0.0  ;;  %v3351_v3 = vsub.f32 %v3319_v55, %v3335_v25  ;;  %v3416_v59 = vsub.f32 %v7389_v58, %v7631_v23  ;;  %v3418_v63 = vsub.f32 %v7402_v24, %v7631_v23 }
 0x375   : > { %v3509_v61 = vmul.f32 %v5622_v37, %v3413_v47  ;;  %v3511_v20 = vmul.f32 %v5622_v37, %v3415_v0  ;;  %v3508_v4 = vmul.f32 %v5622_v37, %v3412_v5  ;;  %v3510_v39 = vmul.f32 %v5622_v37, %v3414_v56 }
 0x376   : > { %v3446_v21 = vadd.f32 1e-05, %v3366_v15  ;;  %v3367_v42 = vmax.f32 %v3351_v3, 0.0  ;;  %v3421_v30 = vsub.f32 %v7436_v33, %v7633_v60  ;;  %v3423_v54 = vsub.f32 %v7451_v14, %v7633_v60 }
 0x377   : > { %v3549_v28 = vpack.c.bf16 %v3509_v61, %v3505_v26  ;;  %v3551_v8 = vpack.c.bf16 %v3511_v20, %v3507_v9  ;;  %v3548_v51 = vpack.c.bf16 %v3508_v4, %v3504_v46  ;;  %v3550_v10 = vpack.c.bf16 %v3510_v39, %v3506_v29 }
 0x378   : > { %5627 = vrsqrt.f32 %v3446_v21  ;;  %v3447_v18 = vadd.f32 1e-05, %v3367_v42  ;;  %v3420_v34 = vsub.f32 %v7426_v7, %v7633_v60  ;;  %v3422_v41 = vsub.f32 %v7433_v16, %v7633_v60 }
 0x379   : > { %3895 = vmatprep.mubr.bf16.mxu0 %v3549_v28  ;;  %3992 = vmatprep.mubr.bf16.mxu1 %v3551_v8  ;;  %v3425_v7 = vsub.f32 %v7458_v45, %v7651_v13  ;;  %v3427_v16 = vsub.f32 %v7502_v57, %v7651_v13  ;;  %v3424_v60 = vsub.f32 %v7453_v32, %v7651_v13  ;;  %v8308_v45 = vld [vmem:[#allocation48_spill] sm:$0xff] }
 0x37a   : > { %v5624_v49 = vpop.eup %5623  ;;  %5629 = vrsqrt.f32 %v3447_v18  ;;  %3896 = vmatmul.mubr.bf16.gmra.mrb[52].mxu0 %v3548_v51  ;;  %3993 = vmatmul.mubr.bf16.gmra.mrb[52].mxu1 %v3550_v10  ;;  %v3426_v40 = vsub.f32 %v7468_v19, %v7651_v13  ;;  %v3429_v1 = vsub.f32 %v8306_v35, %v7653_v12  ;;  %v3431_v47 = vsub.f32 %v8307_v50, %v7653_v12 }
 0x37b   : > { %v3513_v44 = vmul.f32 %v5624_v49, %v3417_v22  ;;  %v3515_v27 = vmul.f32 %v5624_v49, %v3419_v2  ;;  %v3512_v38 = vmul.f32 %v5624_v49, %v3416_v59  ;;  %v3514_v58 = vmul.f32 %v5624_v49, %v3418_v63 }
 0x37c   : > { %v5626_v62 = vpop.eup %5625  ;;  %v3428_v0 = vsub.f32 %v8308_v45, %v7653_v12  ;;  %v3430_v53 = vsub.f32 %v8309_v6, %v7653_v12  ;;  %v7706_v12 = vld [vmem:[%s7943_s4] ss:$0 sm:$0xff] }
 0x37d   : > { %v3517_v31 = vmul.f32 %v5626_v62, %v3421_v30  ;;  %v3519_v36 = vmul.f32 %v5626_v62, %v3423_v54  ;;  %v3516_v24 = vmul.f32 %v5626_v62, %v3420_v34  ;;  %v3518_v23 = vmul.f32 %v5626_v62, %v3422_v41 }
 0x37f   : > { %v3553_v52 = vpack.c.bf16 %v3517_v31, %v3513_v44  ;;  %v3555_v33 = vpack.c.bf16 %v3519_v36, %v3515_v27  ;;  %v3552_v48 = vpack.c.bf16 %v3516_v24, %v3512_v38  ;;  %v3554_v11 = vpack.c.bf16 %v3518_v23, %v3514_v58 }
 0x381   : > { %3903 = vmatprep.mubr.bf16.mxu0 %v3553_v52  ;;  %4000 = vmatprep.mubr.bf16.mxu1 %v3555_v33 }
 0x382   : > { %v5628_v14 = vpop.eup %5627  ;;  %3904 = vmatmul.mubr.bf16.gmra.mrb[56].mxu0 %v3552_v48  ;;  %4001 = vmatmul.mubr.bf16.gmra.mrb[56].mxu1 %v3554_v11 }
 0x383   : > { %v3521_v57 = vmul.f32 %v5628_v14, %v3425_v7  ;;  %v3523_v25 = vmul.f32 %v5628_v14, %v3427_v16  ;;  %v3520_v55 = vmul.f32 %v5628_v14, %v3424_v60  ;;  %v3522_v32 = vmul.f32 %v5628_v14, %v3426_v40 }
 0x384   : > { %v5630_v43 = vpop.eup %5629 }
 0x385   : > { %v3525_v26 = vmul.f32 %v5630_v43, %v3429_v1  ;;  %v3527_v9 = vmul.f32 %v5630_v43, %v3431_v47  ;;  %v3524_v19 = vmul.f32 %v5630_v43, %v3428_v0  ;;  %v3526_v13 = vmul.f32 %v5630_v43, %v3430_v53 }
 0x387   : > { %v3557_v17 = vpack.c.bf16 %v3525_v26, %v3521_v57  ;;  %v3559_v5 = vpack.c.bf16 %v3527_v9, %v3523_v25  ;;  %v3556_v56 = vpack.c.bf16 %v3524_v19, %v3520_v55  ;;  %v3558_v37 = vpack.c.bf16 %v3526_v13, %v3522_v32 }
 0x389   : > { %3911 = vmatprep.mubr.bf16.mxu0 %v3557_v17  ;;  %4008 = vmatprep.mubr.bf16.mxu1 %v3559_v5 }
 0x38a   : > { %3912 = vmatmul.mubr.bf16.gmra.mrb[60].mxu0 %v3556_v56  ;;  %4009 = vmatmul.mubr.bf16.gmra.mrb[60].mxu1 %v3558_v37 }
 0x41c   : > { %v4802_v15 = vpop.f32.mrb[32].mxu0  ;;  %v4866_v3 = vpop.f32.mrb[32].mxu1 }
 0x41d   : > { %v4803_v46 = vpop.f32.mrb[33].mxu0  ;;  %v4867_v29 = vpop.f32.mrb[33].mxu1 }
 0x41e   : > { %v4804_v61 = vadd.f32 %v4803_v46, %v4802_v15  ;;  %v4868_v20 = vadd.f32 %v4867_v29, %v4866_v3  ;;  %v4805_v4 = vpop.f32.mrb[34].mxu0  ;;  %v4869_v39 = vpop.f32.mrb[34].mxu1 }
 0x41f   : > { %v4806_v21 = vpop.f32.mrb[35].mxu0  ;;  %v4870_v42 = vpop.f32.mrb[35].mxu1 }
 0x420   : > { %v3858_v28 = vadd.f32 %v4804_v61, %v7706_v12  ;;  %v4807_v8 = vadd.f32 %v4806_v21, %v4805_v4  ;;  %v4871_v51 = vadd.f32 %v4870_v42, %v4869_v39 }
 0x422   : > { %v3955_v10 = vadd.f32 %v4868_v20, %v3858_v28  ;;  %v3861_v18 = vadd.f32 %v4807_v8, %v7706_v12  ;;  %v5559_v28 = vld [vmem:[%s7944_s5] sm:$0xff]  }
 0x423   : > { %4930 = vmatprep.subr.bf16.mxu0 %v5559_v28  ;;  %4962 = vmatprep.subr.bf16.mxu1 %v5559_v28 }
 0x424   : > { %v7710_v22 = vmax.f32 %v3955_v10, 0.0  ;;  %v3958_v49 = vadd.f32 %v4871_v51, %v3861_v18  ;;  %v5560_v10 = vld [vmem:[%s7944_s5 + $0x8] sm:$0xff]   ;;  %4931 = vmatpush3.bf16.msra.mxu0 %v5559_v28  ;;  %4970 = vmatpush3.bf16.msra.mxu1 %v5559_v28 }
 0x425   : > { %4932 = vmatprep.subr.bf16.mxu0 %v5560_v10  ;;  %4963 = vmatprep.subr.bf16.mxu1 %v5560_v10 }
 0x426   : > { %v4808_v2 = vpop.f32.mrb[36].mxu0  ;;  %v4872_v59 = vpop.f32.mrb[36].mxu1  ;;  %v7712_v63 = vmax.f32 %v3958_v49, 0.0  ;;  %4033 = vadd.xlane.f32.xlu0 %v7710_v22  ;;  %v4065_v58 = vmul.f32 %v7710_v22, %v7710_v22 }
 0x427   : > { %v4809_v30 = vpop.f32.mrb[37].mxu0  ;;  %v4873_v54 = vpop.f32.mrb[37].mxu1 }
 0x428   : > { %v4810_v34 = vadd.f32 %v4809_v30, %v4808_v2  ;;  %v4874_v41 = vadd.f32 %v4873_v54, %v4872_v59  ;;  %v4811_v62 = vpop.f32.mrb[38].mxu0  ;;  %v4875_v44 = vpop.f32.mrb[38].mxu1  ;;  %4035 = vadd.xlane.f32.xlu1 %v7712_v63  ;;  %v4066_v23 = vmul.f32 %v7712_v63, %v7712_v63  ;;  %4933 = vmatpush3.bf16.msra.mxu0 %v5560_v10 }
 0x429   : > { %v4812_v27 = vpop.f32.mrb[39].mxu0  ;;  %v4876_v38 = vpop.f32.mrb[39].mxu1  ;;  %4971 = vmatpush3.bf16.msra.mxu1 %v5560_v10 }
 0x42a   : > { %v3866_v31 = vadd.f32 %v4810_v34, %v7706_v12  ;;  %v4813_v36 = vadd.f32 %v4812_v27, %v4811_v62  ;;  %v4877_v24 = vadd.f32 %v4876_v38, %v4875_v44  ;;  %4081 = vadd.xlane.f32.xlu0 %v4065_v58 }
 0x42c   : > { %v3963_v52 = vadd.f32 %v4874_v41, %v3866_v31  ;;  %v3869_v33 = vadd.f32 %v4813_v36, %v7706_v12  ;;  %4083 = vadd.xlane.f32.xlu1 %v4066_v23 }
 0x42e   : > { %v7722_v48 = vmax.f32 %v3963_v52, 0.0  ;;  %v3966_v11 = vadd.f32 %v4877_v24, %v3869_v33  ;;  %v5561_v33 = vld [vmem:[%s7944_s5 + $0x10] sm:$0xff]  }
 0x42f   : > { %v4814_v7 = vpop.f32.mrb[40].mxu0  ;;  %v4878_v14 = vpop.f32.mrb[40].mxu1  ;;  %4934 = vmatprep.subr.bf16.mxu0 %v5561_v33  ;;  %4964 = vmatprep.subr.bf16.mxu1 %v5561_v33 }
 0x430   : > { %v7724_v16 = vmax.f32 %v3966_v11, 0.0  ;;  %v4815_v60 = vpop.f32.mrb[41].mxu0  ;;  %v4879_v40 = vpop.f32.mrb[41].mxu1  ;;  %4037 = vadd.xlane.f32.xlu0 %v7722_v48  ;;  %v4067_v6 = vmul.f32 %v7722_v48, %v7722_v48  ;;  %4935 = vmatpush3.bf16.msra.mxu0 %v5561_v33 }
 0x431   : > { %v4816_v35 = vadd.f32 %v4815_v60, %v4814_v7  ;;  %v4880_v1 = vadd.f32 %v4879_v40, %v4878_v14  ;;  %v4817_v50 = vpop.f32.mrb[42].mxu0  ;;  %v4881_v47 = vpop.f32.mrb[42].mxu1  ;;  %v5562_v14 = vld [vmem:[%s7944_s5 + $0x18] sm:$0xff]   ;;  %4972 = vmatpush3.bf16.msra.mxu1 %v5561_v33 }
 0x432   : > { %v4818_v45 = vpop.f32.mrb[43].mxu0  ;;  %v4882_v0 = vpop.f32.mrb[43].mxu1  ;;  %4039 = vadd.xlane.f32.xlu1 %v7724_v16  ;;  %v4068_v25 = vmul.f32 %v7724_v16, %v7724_v16  ;;  %4936 = vmatprep.subr.bf16.mxu0 %v5562_v14 }
 0x433   : > { %v3874_v53 = vadd.f32 %v4816_v35, %v7706_v12  ;;  %v4819_v43 = vadd.f32 %v4818_v45, %v4817_v50  ;;  %v4883_v57 = vadd.f32 %v4882_v0, %v4881_v47  ;;  %4965 = vmatprep.subr.bf16.mxu1 %v5562_v14 }
 0x434   : > { %4085 = vadd.xlane.f32.xlu0 %v4067_v6  ;;  %4937 = vmatpush3.bf16.msra.mxu0 %v5562_v14 }
 0x435   : > { %v3971_v55 = vadd.f32 %v4880_v1, %v3874_v53  ;;  %v3877_v32 = vadd.f32 %v4819_v43, %v7706_v12  ;;  %4973 = vmatpush3.bf16.msra.mxu1 %v5562_v14 }
 0x436   : > { %4087 = vadd.xlane.f32.xlu1 %v4068_v25 }
 0x437   : > { %v7734_v26 = vmax.f32 %v3971_v55, 0.0  ;;  %v3974_v9 = vadd.f32 %v4883_v57, %v3877_v32 }
 0x439   : > { %v7736_v19 = vmax.f32 %v3974_v9, 0.0  ;;  %4041 = vadd.xlane.f32.xlu0 %v7734_v26  ;;  %v4069_v13 = vmul.f32 %v7734_v26, %v7734_v26 }
 0x43b   : > { %4043 = vadd.xlane.f32.xlu1 %v7736_v19  ;;  %v4070_v37 = vmul.f32 %v7736_v19, %v7736_v19 }
 0x43c   : > { %v4820_v17 = vpop.f32.mrb[44].mxu0  ;;  %v4884_v5 = vpop.f32.mrb[44].mxu1 }
 0x43d   : > { %v4821_v56 = vpop.f32.mrb[45].mxu0  ;;  %4089 = vadd.xlane.f32.xlu0 %v4069_v13  ;;  %v4885_v3 = vpop.f32.mrb[45].mxu1 }
 0x43e   : > { %v4822_v15 = vadd.f32 %v4821_v56, %v4820_v17  ;;  %v4823_v46 = vpop.f32.mrb[46].mxu0  ;;  %v4886_v29 = vadd.f32 %v4885_v3, %v4884_v5  ;;  %v4887_v61 = vpop.f32.mrb[46].mxu1 }
 0x43f   : > { %v4824_v20 = vpop.f32.mrb[47].mxu0  ;;  %4091 = vadd.xlane.f32.xlu1 %v4070_v37  ;;  %v4888_v21 = vpop.f32.mrb[47].mxu1  ;;  %v5563_v37 = vld [vmem:[%s7944_s5 + $0x20] sm:$0xff]  }
 0x440   : > { %v3882_v4 = vadd.f32 %v4822_v15, %v7706_v12  ;;  %v4825_v39 = vadd.f32 %v4824_v20, %v4823_v46  ;;  %v4889_v42 = vadd.f32 %v4888_v21, %v4887_v61  ;;  %4938 = vmatprep.subr.bf16.mxu0 %v5563_v37  ;;  %4966 = vmatprep.subr.bf16.mxu1 %v5563_v37 }
 0x441   : > { %4939 = vmatpush3.bf16.msra.mxu0 %v5563_v37  ;;  %4974 = vmatpush3.bf16.msra.mxu1 %v5563_v37 }
 0x442   : > { %v3979_v8 = vadd.f32 %v4886_v29, %v3882_v4  ;;  %v3885_v51 = vadd.f32 %v4825_v39, %v7706_v12  ;;  %v5564_v4 = vld [vmem:[%s7944_s5 + $0x28] sm:$0xff]  }
 0x443   : > { %4940 = vmatprep.subr.bf16.mxu0 %v5564_v4  ;;  %4967 = vmatprep.subr.bf16.mxu1 %v5564_v4 }
 0x444   : > { %v7752_v18 = vmax.f32 %v3979_v8, 0.0  ;;  %v3982_v49 = vadd.f32 %v4889_v42, %v3885_v51 }
 0x445   : > { %v4826_v2 = vpop.f32.mrb[48].mxu0  ;;  %v4890_v59 = vpop.f32.mrb[48].mxu1  ;;  %4941 = vmatpush3.bf16.msra.mxu0 %v5564_v4  ;;  %4975 = vmatpush3.bf16.msra.mxu1 %v5564_v4 }
 0x446   : > { %v7754_v30 = vmax.f32 %v3982_v49, 0.0  ;;  %v4827_v54 = vpop.f32.mrb[49].mxu0  ;;  %v4891_v34 = vpop.f32.mrb[49].mxu1  ;;  %4045 = vadd.xlane.f32.xlu0 %v7752_v18  ;;  %v4071_v31 = vmul.f32 %v7752_v18, %v7752_v18 }
 0x447   : > { %v4828_v41 = vadd.f32 %v4827_v54, %v4826_v2  ;;  %v4892_v62 = vadd.f32 %v4891_v34, %v4890_v59  ;;  %v4829_v44 = vpop.f32.mrb[50].mxu0  ;;  %v4893_v27 = vpop.f32.mrb[50].mxu1 }
 0x448   : > { %v4830_v38 = vpop.f32.mrb[51].mxu0  ;;  %v4894_v58 = vpop.f32.mrb[51].mxu1  ;;  %4047 = vadd.xlane.f32.xlu1 %v7754_v30  ;;  %v4072_v52 = vmul.f32 %v7754_v30, %v7754_v30 }
 0x449   : > { %v3890_v36 = vadd.f32 %v4828_v41, %v7706_v12  ;;  %v4831_v24 = vadd.f32 %v4830_v38, %v4829_v44  ;;  %v4895_v23 = vadd.f32 %v4894_v58, %v4893_v27 }
 0x44a   : > { %4093 = vadd.xlane.f32.xlu0 %v4071_v31 }
 0x44b   : > { %v3987_v11 = vadd.f32 %v4892_v62, %v3890_v36  ;;  %v3893_v7 = vadd.f32 %v4831_v24, %v7706_v12 }
 0x44c   : > { %4095 = vadd.xlane.f32.xlu1 %v4072_v52 }
 0x44d   : > { %v7770_v60 = vmax.f32 %v3987_v11, 0.0  ;;  %v3990_v40 = vadd.f32 %v4895_v23, %v3893_v7  ;;  %v4832_v35 = vpop.f32.mrb[52].mxu0  ;;  %v4896_v1 = vpop.f32.mrb[52].mxu1 }
 0x44e   : > { %v4833_v50 = vpop.f32.mrb[53].mxu0  ;;  %v4897_v47 = vpop.f32.mrb[53].mxu1 }
 0x44f   : > { %v7772_v45 = vmax.f32 %v3990_v40, 0.0  ;;  %v4834_v0 = vadd.f32 %v4833_v50, %v4832_v35  ;;  %v4898_v6 = vadd.f32 %v4897_v47, %v4896_v1  ;;  %4049 = vadd.xlane.f32.xlu0 %v7770_v60  ;;  %v4835_v53 = vpop.f32.mrb[54].mxu0  ;;  %v4899_v43 = vpop.f32.mrb[54].mxu1  ;;  %v4073_v13 = vmul.f32 %v7770_v60, %v7770_v60  ;;  %v5565_v40 = vld [vmem:[%s7944_s5 + $0x30] sm:$0xff]  }
 0x450   : > { %v4836_v57 = vpop.f32.mrb[55].mxu0  ;;  %v4900_v25 = vpop.f32.mrb[55].mxu1  ;;  %4942 = vmatprep.subr.bf16.mxu0 %v5565_v40  ;;  %4968 = vmatprep.subr.bf16.mxu1 %v5565_v40 }
 0x451   : > { %v3898_v55 = vadd.f32 %v4834_v0, %v7706_v12  ;;  %v4837_v32 = vadd.f32 %v4836_v57, %v4835_v53  ;;  %v4901_v9 = vadd.f32 %v4900_v25, %v4899_v43  ;;  %4051 = vadd.xlane.f32.xlu1 %v7772_v45  ;;  %v4074_v56 = vmul.f32 %v7772_v45, %v7772_v45  ;;  %v5566_v0 = vld [vmem:[%s7944_s5 + $0x38] sm:$0xff]  }
 0x452   : > { %4943 = vmatpush3.bf16.msra.mxu0 %v5565_v40  ;;  %4976 = vmatpush3.bf16.msra.mxu1 %v5565_v40 }
 0x453   : > { %v3995_v17 = vadd.f32 %v4898_v6, %v3898_v55  ;;  %v3901_v5 = vadd.f32 %v4837_v32, %v7706_v12  ;;  %4097 = vadd.xlane.f32.xlu0 %v4073_v13  ;;  %4944 = vmatprep.subr.bf16.mxu0 %v5566_v0 }
 0x454   : > { %4969 = vmatprep.subr.bf16.mxu1 %v5566_v0 }
 0x455   : > { %v7785_v15 = vmax.f32 %v3995_v17, 0.0  ;;  %v3998_v3 = vadd.f32 %v4901_v9, %v3901_v5  ;;  %4099 = vadd.xlane.f32.xlu1 %v4074_v56  ;;  %v4838_v46 = vpop.f32.mrb[56].mxu0  ;;  %v4902_v29 = vpop.f32.mrb[56].mxu1 }
 0x456   : > { %v4839_v61 = vpop.f32.mrb[57].mxu0  ;;  %v4903_v20 = vpop.f32.mrb[57].mxu1  ;;  %4945 = vmatpush3.bf16.msra.mxu0 %v5566_v0  ;;  %4977 = vmatpush3.bf16.msra.mxu1 %v5566_v0 }
 0x457   : > { %v7790_v39 = vmax.f32 %v3998_v3, 0.0  ;;  %v4840_v21 = vadd.f32 %v4839_v61, %v4838_v46  ;;  %v4904_v42 = vadd.f32 %v4903_v20, %v4902_v29  ;;  %4053 = vadd.xlane.f32.xlu0 %v7785_v15  ;;  %v4841_v28 = vpop.f32.mrb[58].mxu0  ;;  %v4905_v8 = vpop.f32.mrb[58].mxu1  ;;  %v4075_v54 = vmul.f32 %v7785_v15, %v7785_v15 }
 0x458   : > { %v4842_v51 = vpop.f32.mrb[59].mxu0  ;;  %v4906_v10 = vpop.f32.mrb[59].mxu1 }
 0x459   : > { %v3906_v49 = vadd.f32 %v4840_v21, %v7706_v12  ;;  %v4843_v2 = vadd.f32 %v4842_v51, %v4841_v28  ;;  %v4907_v59 = vadd.f32 %v4906_v10, %v4905_v8  ;;  %4055 = vadd.xlane.f32.xlu1 %v7790_v39  ;;  %v4076_v62 = vmul.f32 %v7790_v39, %v7790_v39 }
 0x45b   : > { %v4003_v34 = vadd.f32 %v4904_v42, %v3906_v49  ;;  %v3909_v41 = vadd.f32 %v4843_v2, %v7706_v12  ;;  %4101 = vadd.xlane.f32.xlu0 %v4075_v54 }
 0x45d   : > { %v7800_v44 = vmax.f32 %v4003_v34, 0.0  ;;  %v4006_v27 = vadd.f32 %v4907_v59, %v3909_v41  ;;  %4103 = vadd.xlane.f32.xlu1 %v4076_v62  ;;  %v4844_v38 = vpop.f32.mrb[60].mxu0  ;;  %v4908_v58 = vpop.f32.mrb[60].mxu1 }
 0x45e   : > { %v4845_v31 = vpop.f32.mrb[61].mxu0  ;;  %v4909_v36 = vpop.f32.mrb[61].mxu1 }
 0x45f   : > { %v7802_v24 = vmax.f32 %v4006_v27, 0.0  ;;  %v4846_v23 = vadd.f32 %v4845_v31, %v4844_v38  ;;  %v4910_v52 = vadd.f32 %v4909_v36, %v4908_v58  ;;  %4057 = vadd.xlane.f32.xlu0 %v7800_v44  ;;  %v4847_v33 = vpop.f32.mrb[62].mxu0  ;;  %v4911_v11 = vpop.f32.mrb[62].mxu1  ;;  %v4077_v47 = vmul.f32 %v7800_v44, %v7800_v44 }
 0x460   : > { %v4848_v7 = vpop.f32.mrb[63].mxu0  ;;  %v4912_v14 = vpop.f32.mrb[63].mxu1 }
 0x461   : > { %v3914_v35 = vadd.f32 %v4846_v23, %v7706_v12  ;;  %v4849_v1 = vadd.f32 %v4848_v7, %v4847_v33  ;;  %v4913_v50 = vadd.f32 %v4912_v14, %v4911_v11  ;;  %4059 = vadd.xlane.f32.xlu1 %v7802_v24  ;;  %v4078_v43 = vmul.f32 %v7802_v24, %v7802_v24 }
 0x463   : > { %v4011_v6 = vadd.f32 %v4910_v52, %v3914_v35  ;;  %v3917_v53 = vadd.f32 %v4849_v1, %v7706_v12  ;;  %4105 = vadd.xlane.f32.xlu0 %v4077_v47 }
 0x465   : > { %v7818_v57 = vmax.f32 %v4011_v6, 0.0  ;;  %v4014_v25 = vadd.f32 %v4913_v50, %v3917_v53  ;;  %4107 = vadd.xlane.f32.xlu1 %v4078_v43 }
 0x467   : > { %v7820_v55 = vmax.f32 %v4014_v25, 0.0  ;;  %4061 = vadd.xlane.f32.xlu0 %v7818_v57  ;;  %v4079_v12 = vmul.f32 %v7818_v57, %v7818_v57 }
 0x469   : > { %4063 = vadd.xlane.f32.xlu1 %v7820_v55  ;;  %v4080_v32 = vmul.f32 %v7820_v55, %v7820_v55 }
 0x46b   : > { %4109 = vadd.xlane.f32.xlu0 %v4079_v12 }
 0x46d   : > { %4111 = vadd.xlane.f32.xlu1 %v4080_v32 }
 0x4b3   : > { %v4034_v9 = vpop.xlane.xlu0 %4033 }
 0x4b4   : > { %v4113_v13 = vmul.f32 0.0078125, %v4034_v9 }
 0x4b5   : > { %v4036_v17 = vpop.xlane.xlu1 %4035 }
 0x4b6   : > { %v4114_v5 = vmul.f32 0.0078125, %v4036_v17  ;;  %v4145_v37 = vmul.f32 %v4113_v13, %v4113_v13  ;;  %v4193_v47 = vsub.f32 %v7710_v22, %v4113_v13 }
 0x4b7   : > { %v4082_v56 = vpop.xlane.xlu0 %4081 }
 0x4b8   : > { %v4129_v3 = vmul.f32 0.0078125, %v4082_v56  ;;  %v4146_v29 = vmul.f32 %v4114_v5, %v4114_v5  ;;  %v4194_v0 = vsub.f32 %v7712_v63, %v4114_v5 }
 0x4b9   : > { %v4084_v46 = vpop.xlane.xlu1 %4083 }
 0x4ba   : > { %v4161_v61 = vsub.f32 %v4129_v3, %v4145_v37  ;;  %v4130_v20 = vmul.f32 0.0078125, %v4084_v46 }
 0x4bc   : > { %v4177_v4 = vmax.f32 %v4161_v61, 0.0  ;;  %v4162_v21 = vsub.f32 %v4130_v20, %v4146_v29 }
 0x4bd   : > { %v4038_v42 = vpop.xlane.xlu0 %4037 }
 0x4be   : > { %v4115_v28 = vmul.f32 0.0078125, %v4038_v42  ;;  %v4209_v8 = vadd.f32 1e-05, %v4177_v4  ;;  %v4178_v51 = vmax.f32 %v4162_v21, 0.0 }
 0x4bf   : > { %v4040_v10 = vpop.xlane.xlu1 %4039 }
 0x4c0   : > { %v4116_v49 = vmul.f32 0.0078125, %v4040_v10  ;;  %5631 = vrsqrt.f32 %v4209_v8  ;;  %v4210_v2 = vadd.f32 1e-05, %v4178_v51  ;;  %v4147_v54 = vmul.f32 %v4115_v28, %v4115_v28 }
 0x4c1   : > { %v4086_v59 = vpop.xlane.xlu0 %4085  ;;  %v4195_v63 = vsub.f32 %v7722_v48, %v4115_v28 }
 0x4c2   : > { %v4131_v34 = vmul.f32 0.0078125, %v4086_v59  ;;  %5633 = vrsqrt.f32 %v4210_v2  ;;  %v4148_v62 = vmul.f32 %v4116_v49, %v4116_v49  ;;  %v4196_v5 = vsub.f32 %v7724_v16, %v4116_v49 }
 0x4c3   : > { %v4088_v41 = vpop.xlane.xlu1 %4087 }
 0x4c4   : > { %v4163_v27 = vsub.f32 %v4131_v34, %v4147_v54  ;;  %v4132_v38 = vmul.f32 0.0078125, %v4088_v41 }
 0x4c6   : > { %v4179_v58 = vmax.f32 %v4163_v27, 0.0  ;;  %v4164_v31 = vsub.f32 %v4132_v38, %v4148_v62  ;;  %v4042_v36 = vpop.xlane.xlu0 %4041 }
 0x4c7   : > { %v7828_v23 = vmul.f32 0.0078125, %v4042_v36 }
 0x4c8   : > { %v4211_v52 = vadd.f32 1e-05, %v4179_v58  ;;  %v4180_v33 = vmax.f32 %v4164_v31, 0.0  ;;  %v4044_v11 = vpop.xlane.xlu1 %4043 }
 0x4c9   : > { %v4118_v7 = vmul.f32 0.0078125, %v4044_v11  ;;  %v4149_v1 = vmul.f32 %v7828_v23, %v7828_v23  ;;  %v4197_v38 = vsub.f32 %v7734_v26, %v7828_v23 }
 0x4ca   : > { %5635 = vrsqrt.f32 %v4211_v52  ;;  %v4212_v14 = vadd.f32 1e-05, %v4180_v33  ;;  %v4090_v40 = vpop.xlane.xlu0 %4089  ;;  %v5632_v35 = vpop.eup %5631 }
 0x4cb   : > { %v4133_v50 = vmul.f32 0.0078125, %v4090_v40  ;;  %v4150_v43 = vmul.f32 %v4118_v7, %v4118_v7  ;;  %v4241_v32 = vmul.f32 %v5632_v35, %v4193_v47  ;;  %v4198_v58 = vsub.f32 %v7736_v19, %v4118_v7 }
 0x4cc   : > { %5637 = vrsqrt.f32 %v4212_v14  ;;  %v4092_v6 = vpop.xlane.xlu1 %4091  ;;  %v5634_v53 = vpop.eup %5633 }
 0x4cd   : > { %v4165_v25 = vsub.f32 %v4133_v50, %v4149_v1  ;;  %v4134_v12 = vmul.f32 0.0078125, %v4092_v6  ;;  %v4242_v9 = vmul.f32 %v5634_v53, %v4194_v0 }
 0x4cf   : > { %v4181_v17 = vmax.f32 %v4165_v25, 0.0  ;;  %v4166_v56 = vsub.f32 %v4134_v12, %v4150_v43  ;;  %v4257_v37 = vpack.c.bf16 %v4242_v9, %v4241_v32 }
 0x4d1   : > { %v4213_v3 = vadd.f32 1e-05, %v4181_v17  ;;  %v4182_v46 = vmax.f32 %v4166_v56, 0.0  ;;  %4946 = vmatprep.mubr.bf16.mxu0 %v4257_v37 }
 0x4d3   : > { %5639 = vrsqrt.f32 %v4213_v3  ;;  %v4214_v29 = vadd.f32 1e-05, %v4182_v46  ;;  %v4046_v61 = vpop.xlane.xlu0 %4045 }
 0x4d4   : > { %v5636_v22 = vpop.eup %5635  ;;  %v7834_v13 = vmul.f32 0.0078125, %v4046_v61 }
 0x4d5   : > { %5641 = vrsqrt.f32 %v4214_v29  ;;  %v4048_v20 = vpop.xlane.xlu1 %4047  ;;  %v4243_v8 = vmul.f32 %v5636_v22, %v4195_v63 }
 0x4d6   : > { %v5638_v4 = vpop.eup %5637  ;;  %v7838_v21 = vmul.f32 0.0078125, %v4048_v20  ;;  %v4151_v10 = vmul.f32 %v7834_v13, %v7834_v13 }
 0x4d7   : > { %v4094_v42 = vpop.xlane.xlu0 %4093  ;;  %v4244_v51 = vmul.f32 %v5638_v4, %v4196_v5 }
 0x4d8   : > { %v4135_v2 = vmul.f32 0.0078125, %v4094_v42  ;;  %v4152_v34 = vmul.f32 %v7838_v21, %v7838_v21  ;;  %v4200_v29 = vsub.f32 %v7754_v30, %v7838_v21  ;;  %v4199_v42 = vsub.f32 %v7752_v18, %v7834_v13 }
 0x4d9   : > { %v4096_v59 = vpop.xlane.xlu1 %4095  ;;  %v4258_v54 = vpack.c.bf16 %v4244_v51, %v4243_v8 }
 0x4da   : > { %v4167_v48 = vsub.f32 %v4135_v2, %v4151_v10  ;;  %v4136_v28 = vmul.f32 0.0078125, %v4096_v59 }
 0x4db   : > { %4947 = vmatmul.mubr.bf16.vlgmr.msra.gmra.mrb[64].mxu0 %v4258_v54 }
 0x4dc   : > { %v4183_v16 = vmax.f32 %v4167_v48, 0.0  ;;  %v4168_v49 = vsub.f32 %v4136_v28, %v4152_v34  ;;  %v4050_v41 = vpop.xlane.xlu0 %4049 }
 0x4dd   : > { %v5640_v62 = vpop.eup %5639  ;;  %v7844_v27 = vmul.f32 0.0078125, %v4050_v41 }
 0x4de   : > { %v4215_v31 = vadd.f32 1e-05, %v4183_v16  ;;  %v4184_v36 = vmax.f32 %v4168_v49, 0.0  ;;  %v4052_v52 = vpop.xlane.xlu1 %4051  ;;  %v4245_v35 = vmul.f32 %v5640_v62, %v4197_v38 }
 0x4df   : > { %v5642_v33 = vpop.eup %5641  ;;  %v7849_v11 = vmul.f32 0.0078125, %v4052_v52  ;;  %v4153_v50 = vmul.f32 %v7844_v27, %v7844_v27 }
 0x4e0   : > { %v4216_v14 = vadd.f32 1e-05, %v4184_v36  ;;  %v4098_v40 = vpop.xlane.xlu0 %4097  ;;  %v4246_v1 = vmul.f32 %v5642_v33, %v4198_v58  ;;  %5643 = vrsqrt.f32 %v4215_v31  ;;  %v4201_v36 = vsub.f32 %v7770_v60, %v7844_v27 }
 0x4e1   : > { %v4137_v47 = vmul.f32 0.0078125, %v4098_v40  ;;  %v4154_v19 = vmul.f32 %v7849_v11, %v7849_v11  ;;  %v4202_v52 = vsub.f32 %v7772_v45, %v7849_v11 }
 0x4e2   : > { %5645 = vrsqrt.f32 %v4216_v14  ;;  %v4100_v0 = vpop.xlane.xlu1 %4099  ;;  %v4259_v26 = vpack.c.bf16 %v4246_v1, %v4245_v35 }
 0x4e3   : > { %v4169_v23 = vsub.f32 %v4137_v47, %v4153_v50  ;;  %v4138_v7 = vmul.f32 0.0078125, %v4100_v0 }
 0x4e4   : > { %v4054_v6 = vpop.xlane.xlu0 %4053  ;;  %4950 = vmatprep.mubr.bf16.mxu0 %v4259_v26 }
 0x4e5   : > { %v4185_v53 = vmax.f32 %v4169_v23, 0.0  ;;  %v4170_v43 = vsub.f32 %v4138_v7, %v4154_v19  ;;  %v7855_v25 = vmul.f32 0.0078125, %v4054_v6 }
 0x4e6   : > { %v4056_v12 = vpop.xlane.xlu1 %4055 }
 0x4e7   : > { %v4217_v32 = vadd.f32 1e-05, %v4185_v53  ;;  %v4186_v9 = vmax.f32 %v4170_v43, 0.0  ;;  %v7857_v17 = vmul.f32 0.0078125, %v4056_v12  ;;  %v4155_v3 = vmul.f32 %v7855_v25, %v7855_v25 }
 0x4e8   : > { %v4102_v56 = vpop.xlane.xlu0 %4101 }
 0x4e9   : > { %5647 = vrsqrt.f32 %v4217_v32  ;;  %v4218_v37 = vadd.f32 1e-05, %v4186_v9  ;;  %v4139_v46 = vmul.f32 0.0078125, %v4102_v56  ;;  %v4156_v63 = vmul.f32 %v7857_v17, %v7857_v17 }
 0x4ea   : > { %v4104_v61 = vpop.xlane.xlu1 %4103  ;;  %v5644_v22 = vpop.eup %5643  ;;  %v4203_v9 = vsub.f32 %v7785_v15, %v7855_v25  ;;  %v4204_v56 = vsub.f32 %v7790_v39, %v7857_v17 }
 0x4eb   : > { %5649 = vrsqrt.f32 %v4218_v37  ;;  %v4171_v5 = vsub.f32 %v4139_v46, %v4155_v3  ;;  %v4140_v20 = vmul.f32 0.0078125, %v4104_v61  ;;  %v4247_v30 = vmul.f32 %v5644_v22, %v4199_v42 }
 0x4ec   : > { %v5646_v4 = vpop.eup %5645  ;;  %v4058_v8 = vpop.xlane.xlu0 %4057 }
 0x4ed   : > { %v4187_v51 = vmax.f32 %v4171_v5, 0.0  ;;  %v4172_v10 = vsub.f32 %v4140_v20, %v4156_v63  ;;  %v7867_v2 = vmul.f32 0.0078125, %v4058_v8  ;;  %v4248_v59 = vmul.f32 %v5646_v4, %v4200_v29 }
 0x4ee   : > { %v4060_v54 = vpop.xlane.xlu1 %4059 }
 0x4ef   : > { %v4219_v21 = vadd.f32 1e-05, %v4187_v51  ;;  %v4188_v34 = vmax.f32 %v4172_v10, 0.0  ;;  %v4126_v48 = vmul.f32 0.0078125, %v4060_v54  ;;  %v4260_v16 = vpack.c.bf16 %v4248_v59, %v4247_v30 }
 0x4f0   : > { %v4106_v28 = vpop.xlane.xlu0 %4105  ;;  %v4157_v41 = vmul.f32 %v7867_v2, %v7867_v2  ;;  %v4205_v15 = vsub.f32 %v7800_v44, %v7867_v2  ;;  %v4775_v44 = vld [vmem:[%s7945_s6] ss:$0 sm:$0xff] }
 0x4f1   : > { %5651 = vrsqrt.f32 %v4219_v21  ;;  %v4220_v49 = vadd.f32 1e-05, %v4188_v34  ;;  %v4141_v62 = vmul.f32 0.0078125, %v4106_v28  ;;  %4951 = vmatmul.mubr.bf16.gmra.mrb[68].mxu0 %v4260_v16  ;;  %v4158_v38 = vmul.f32 %v4126_v48, %v4126_v48 }
 0x4f2   : > { %v4108_v18 = vpop.xlane.xlu1 %4107  ;;  %v4206_v25 = vsub.f32 %v7802_v24, %v4126_v48 }
 0x4f3   : > { %v5648_v13 = vpop.eup %5647  ;;  %5653 = vrsqrt.f32 %v4220_v49  ;;  %v4173_v58 = vsub.f32 %v4141_v62, %v4157_v41  ;;  %v4142_v31 = vmul.f32 0.0078125, %v4108_v18 }
 0x4f4   : > { %v4062_v33 = vpop.xlane.xlu0 %4061  ;;  %v4249_v47 = vmul.f32 %v5648_v13, %v4201_v36 }
 0x4f5   : > { %v5650_v14 = vpop.eup %5649  ;;  %v4189_v40 = vmax.f32 %v4173_v58, 0.0  ;;  %v4174_v35 = vsub.f32 %v4142_v31, %v4158_v38  ;;  %v4127_v1 = vmul.f32 0.0078125, %v4062_v33 }
 0x4f6   : > { %v4064_v50 = vpop.xlane.xlu1 %4063  ;;  %v4250_v0 = vmul.f32 %v5650_v14, %v4202_v52 }
 0x4f7   : > { %v4221_v26 = vadd.f32 1e-05, %v4189_v40  ;;  %v4190_v19 = vmax.f32 %v4174_v35, 0.0  ;;  %v4128_v23 = vmul.f32 0.0078125, %v4064_v50  ;;  %v4159_v43 = vmul.f32 %v4127_v1, %v4127_v1 }
 0x4f8   : > { %v4110_v7 = vpop.xlane.xlu0 %4109  ;;  %v4261_v6 = vpack.c.bf16 %v4250_v0, %v4249_v47  ;;  %v4207_v10 = vsub.f32 %v7818_v57, %v4127_v1 }
 0x4f9   : > { %5655 = vrsqrt.f32 %v4221_v26  ;;  %v4222_v53 = vadd.f32 1e-05, %v4190_v19  ;;  %v4143_v60 = vmul.f32 0.0078125, %v4110_v7  ;;  %v4160_v11 = vmul.f32 %v4128_v23, %v4128_v23 }
 0x4fa   : > { %v4112_v27 = vpop.xlane.xlu1 %4111  ;;  %4954 = vmatprep.mubr.bf16.mxu1 %v4261_v6  ;;  %v4208_v59 = vsub.f32 %v7820_v55, %v4128_v23 }
 0x4fb   : > { %v5652_v45 = vpop.eup %5651  ;;  %5657 = vrsqrt.f32 %v4222_v53  ;;  %v4175_v12 = vsub.f32 %v4143_v60, %v4159_v43  ;;  %v4144_v32 = vmul.f32 0.0078125, %v4112_v27 }
 0x4fc   : > { %v4251_v29 = vmul.f32 %v5652_v45, %v4203_v9 }
 0x4fd   : > { %v5654_v37 = vpop.eup %5653  ;;  %v4191_v3 = vmax.f32 %v4175_v12, 0.0  ;;  %v4176_v46 = vsub.f32 %v4144_v32, %v4160_v11 }
 0x4fe   : > { %v4252_v61 = vmul.f32 %v5654_v37, %v4204_v56 }
 0x4ff   : > { %v4223_v22 = vadd.f32 1e-05, %v4191_v3  ;;  %v4192_v63 = vmax.f32 %v4176_v46, 0.0 }
 0x500   : > { %v4262_v5 = vpack.c.bf16 %v4252_v61, %v4251_v29 }
 0x501   : > { %5659 = vrsqrt.f32 %v4223_v22  ;;  %v4224_v20 = vadd.f32 1e-05, %v4192_v63 }
 0x502   : > { %4955 = vmatmul.mubr.bf16.vlgmr.msra.gmra.mrb[64].mxu1 %v4262_v5 }
 0x503   : > { %v5656_v4 = vpop.eup %5655  ;;  %5661 = vrsqrt.f32 %v4224_v20 }
 0x504   : > { %v4253_v17 = vmul.f32 %v5656_v4, %v4205_v15 }
 0x505   : > { %v5658_v39 = vpop.eup %5657 }
 0x506   : > { %v4254_v42 = vmul.f32 %v5658_v39, %v4206_v25 }
 0x508   : > { %v4263_v8 = vpack.c.bf16 %v4254_v42, %v4253_v17 }
 0x50a   : > { %4958 = vmatprep.mubr.bf16.mxu1 %v4263_v8 }
 0x50b   : > { %v5660_v51 = vpop.eup %5659 }
 0x50c   : > { %v4255_v30 = vmul.f32 %v5660_v51, %v4207_v10 }
 0x50d   : > { %v5662_v54 = vpop.eup %5661 }
 0x50e   : > { %v4256_v21 = vmul.f32 %v5662_v54, %v4208_v59 }
 0x510   : > { %v4264_v34 = vpack.c.bf16 %v4256_v21, %v4255_v30 }
 0x512   : > { %4959 = vmatmul.mubr.bf16.gmra.mrb[68].mxu1 %v4264_v34 }
 0x5ae   : > { %v4948_v24 = vpop.f32.mrb[64].mxu0 }
 0x5af   : > { %v4379_v57 = vadd.f32 %v4948_v24, %v4775_v44  ;;  %v4370_v55 = vpop.f32.mrb[65].mxu0 }
 0x5b0   : > { %v4371_v2 = vadd.f32 %v4775_v44, %v4370_v55  ;;  %v4949_v48 = vpop.f32.mrb[66].mxu0 }
 0x5b1   : > { %4436 = vst.msk [vmem:[%s7892_s18 + $0x10] sm:$0xff] %vm4433_vm0, %v4379_v57  ;;  %v4382_v28 = vadd.f32 %v4949_v48, %v4775_v44  ;;  %v4373_v16 = vpop.f32.mrb[67].mxu0 }
 0x5b2   : > { %4434 = vst.msk [vmem:[%s7892_s18] sm:$0xff] %vm4433_vm0, %v4371_v2  ;;  %v4374_v49 = vadd.f32 %v4775_v44, %v4373_v16 }
 0x5b3   : > { %4437 = vst.msk [vmem:[%s7892_s18 + $0x18] sm:$0xff] %vm4433_vm0, %v4382_v28 }
 0x5b4   : > { %4435 = vst.msk [vmem:[%s7892_s18 + $0x8] sm:$0xff] %vm4433_vm0, %v4374_v49 }
 0x5c4   : > { %v4952_v41 = vpop.f32.mrb[68].mxu0 }
 0x5c5   : > { %v4395_v62 = vadd.f32 %v4952_v41, %v4775_v44  ;;  %v4386_v18 = vpop.f32.mrb[69].mxu0 }
 0x5c6   : > { %v4387_v13 = vadd.f32 %v4775_v44, %v4386_v18  ;;  %v4953_v38 = vpop.f32.mrb[70].mxu0 }
 0x5c7   : > { %4440 = vst.msk [vmem:[%s7892_s18 + $0x30] sm:$0xff] %vm4433_vm0, %v4395_v62  ;;  %v4398_v58 = vadd.f32 %v4953_v38, %v4775_v44  ;;  %v4389_v31 = vpop.f32.mrb[71].mxu0 }
 0x5c8   : > { %4438 = vst.msk [vmem:[%s7892_s18 + $0x20] sm:$0xff] %vm4433_vm0, %v4387_v13  ;;  %v4390_v36 = vadd.f32 %v4775_v44, %v4389_v31 }
 0x5c9   : > { %4441 = vst.msk [vmem:[%s7892_s18 + $0x38] sm:$0xff] %vm4433_vm0, %v4398_v58 }
 0x5ca   : > { %4439 = vst.msk [vmem:[%s7892_s18 + $0x28] sm:$0xff] %vm4433_vm0, %v4390_v36 }
 0x5d5   : > { %v4956_v52 = vpop.f32.mrb[64].mxu1 }
 0x5d6   : > { %v4411_v33 = vadd.f32 %v4956_v52, %v4775_v44  ;;  %v4402_v14 = vpop.f32.mrb[65].mxu1 }
 0x5d7   : > { %v4403_v40 = vadd.f32 %v4775_v44, %v4402_v14  ;;  %v4957_v35 = vpop.f32.mrb[66].mxu1 }
 0x5d8   : > { %4444 = vst.msk [vmem:[%s7892_s18 + $0x50] sm:$0xff] %vm4433_vm0, %v4411_v33  ;;  %v4414_v1 = vadd.f32 %v4957_v35, %v4775_v44  ;;  %v4405_v50 = vpop.f32.mrb[67].mxu1 }
 0x5d9   : > { %4442 = vst.msk [vmem:[%s7892_s18 + $0x40] sm:$0xff] %vm4433_vm0, %v4403_v40  ;;  %v4406_v47 = vadd.f32 %v4775_v44, %v4405_v50 }
 0x5da   : > { %4445 = vst.msk [vmem:[%s7892_s18 + $0x58] sm:$0xff] %vm4433_vm0, %v4414_v1 }
 0x5db   : > { %4443 = vst.msk [vmem:[%s7892_s18 + $0x48] sm:$0xff] %vm4433_vm0, %v4406_v47 }
 0x5e5   : > { %v4960_v0 = vpop.f32.mrb[68].mxu1 }
 0x5e6   : > { %v4427_v26 = vadd.f32 %v4960_v0, %v4775_v44  ;;  %v4418_v19 = vpop.f32.mrb[69].mxu1 }
 0x5e7   : > { %v4419_v23 = vadd.f32 %v4775_v44, %v4418_v19  ;;  %v4961_v7 = vpop.f32.mrb[70].mxu1 }
 0x5e8   : > { %4448 = vst.msk [vmem:[%s7892_s18 + $0x70] sm:$0xff] %vm4433_vm0, %v4427_v26  ;;  %v4430_v6 = vadd.f32 %v4961_v7, %v4775_v44  ;;  %v4421_v53 = vpop.f32.mrb[71].mxu1 }
 0x5e9   : > { %4446 = vst.msk [vmem:[%s7892_s18 + $0x60] sm:$0xff] %vm4433_vm0, %v4419_v23  ;;  %v4422_v43 = vadd.f32 %v4775_v44, %v4421_v53 }
 0x5ea   : > { %4449 = vst.msk [vmem:[%s7892_s18 + $0x78] sm:$0xff] %vm4433_vm0, %v4430_v6 }
 0x5eb   : > { %4447 = vst.msk [vmem:[%s7892_s18 + $0x68] sm:$0xff] %vm4433_vm0, %v4422_v43 }
 0x5ec PF: > { %s8310_s27 = smov %s5934_s24  ;;  %p18_p6 = scmp.ge.s32.totalorder %s5934_s24, 5  }
 0x5ed   : > { %s8311_s24 = smov %s5779_s25  ;;  %s8312_s25 = smov %s5783_s26 }
 0x5ee   : > { %s8313_s26 = smov %s5943_s14  ;;  %20 = sbr.rel (!%p18_p6) target bundleno = 4 (0x4), region = 96 }
 0x5f5   :  { %4472 = vsyncpa [#allocation3], 1 }
 0x5f6   :  { %4474 = vsyncpa [#allocation3 + $0x1], 1 }
 0x5f7   :  { %4475 = vsyncpa [#allocation5], 1 }

</bundles_post_ra>
